<compile_context>
chip_gen: v7x
topology: tpu7x:2x2x1
jax: 0.10.0
libtpu: 0.0.40
codegen_flags: <defaults>
</compile_context>

<pallas_src>
import functools

import jax
import jax.numpy as jnp
from jax import lax
from jax.experimental import pallas as pl
from jax.experimental.pallas import tpu as pltpu

BN_EPS = 1e-5
EXPANSION = 4  # ResNeXt bottleneck expansion


# ----------------------------------------------------------------------------
# Fused bottleneck kernel (one grid step == one image)
# ----------------------------------------------------------------------------
def _pad_layout(H, W):
    """Row layout of the flat, zero-padded conv1 output held in VMEM scratch."""
    left = ((W + 1 + 7) // 8) * 8            # aligned start row of the interior
    rows = left + H * W + W + 1              # worst tap start + H*W fits
    rows = ((rows + 7) // 8) * 8
    return left, rows


def _bottleneck_kernel(x_ref, w1_ref, b1_ref, w2_ref, b2_ref, w3_ref, b3_ref,
                       *rest, H, W, has_proj):
    if has_proj:
        wsc_ref, o_ref, pad_ref = rest
    else:
        o_ref, pad_ref = rest

    HW = H * W
    left, _ = _pad_layout(H, W)

    x = x_ref[0]                                        # (HW, Cin) f32
    xb = x.astype(jnp.bfloat16)

    # ---- conv1 (1x1) + BN1 + ReLU ------------------------------------------
    a1 = jnp.dot(xb, w1_ref[...], preferred_element_type=jnp.float32)
    a1 = jnp.maximum(a1 + b1_ref[...], 0.0)             # (HW, width) f32

    # ---- conv2 (3x3, pad=1, groups folded block-diagonally) + BN2 + ReLU ---
    # pad_ref row (left + q) holds a1[q]; rows outside the interior stay zero
    # and implement the top/bottom spatial zero padding. Left/right padding is
    # handled with per-tap column masks on the flat layout.
    pad_ref[...] = jnp.zeros_like(pad_ref)
    pad_ref[left:left + HW, :] = a1

    pos = lax.broadcasted_iota(jnp.int32, (HW, 1), 0)
    col = pos % W                                       # output column index
    mask_l = (col >= 1).astype(jnp.float32)             # tap reads column w-1
    mask_r = (col <= W - 2).astype(jnp.float32)         # tap reads column w+1

    width = w1_ref.shape[1]
    acc2 = jnp.zeros((HW, width), jnp.float32)
    for di in range(3):
        for dj in range(3):
            start = left + (di - 1) * W + (dj - 1)
            tap = pad_ref[start:start + HW, :]          # (HW, width) f32
            if dj == 0:
                tap = tap * mask_l
            elif dj == 2:
                tap = tap * mask_r
            acc2 = acc2 + jnp.dot(tap.astype(jnp.bfloat16), w2_ref[di * 3 + dj],
                                  preferred_element_type=jnp.float32)
    a2 = jnp.maximum(acc2 + b2_ref[...], 0.0).astype(jnp.bfloat16)   # (HW, width)

    # ---- conv3 (1x1) + BN3, fused with the shortcut, + final ReLU ----------
    acc3 = jnp.dot(a2, w3_ref[...], preferred_element_type=jnp.float32)
    acc3 = acc3 + b3_ref[...]        # bias already includes the shortcut's BN bias
    if has_proj:
        acc3 = acc3 + jnp.dot(xb, wsc_ref[...], preferred_element_type=jnp.float32)
    else:
        acc3 = acc3 + x              # identity shortcut, kept in f32
    o_ref[0] = jnp.maximum(acc3, 0.0).astype(o_ref.dtype)


def bottleneck_forward(x_nchw, fp):
    """Forward pass. `fp` is the folded-params dict (jit closure constants)."""
    N, Cin, H, W = x_nchw.shape
    HW = H * W
    width = fp["w1"].shape[1]
    out_planes = fp["w3"].shape[1]
    stride = fp["stride"]
    has_proj = "wsc" in fp

    x = jnp.transpose(x_nchw, (0, 2, 3, 1)).reshape(N, HW, Cin).astype(jnp.float32)

    args = [x, fp["w1"], fp["b1"], fp["w2"], fp["b2"], fp["w3"], fp["b3"]]
    in_specs = [
        pl.BlockSpec((1, HW, Cin), lambda n: (n, 0, 0)),
        pl.BlockSpec((Cin, width), lambda n: (0, 0)),
        pl.BlockSpec((1, width), lambda n: (0, 0)),
        pl.BlockSpec((9, width, width), lambda n: (0, 0, 0)),
        pl.BlockSpec((1, width), lambda n: (0, 0)),
        pl.BlockSpec((width, out_planes), lambda n: (0, 0)),
        pl.BlockSpec((1, out_planes), lambda n: (0, 0)),
    ]
    if has_proj:
        args.append(fp["wsc"])
        in_specs.append(pl.BlockSpec((Cin, out_planes), lambda n: (0, 0)))

    _, pad_rows = _pad_layout(H, W)

    y = pl.pallas_call(
        functools.partial(_bottleneck_kernel, H=H, W=W, has_proj=has_proj),
        out_shape=jax.ShapeDtypeStruct((N, HW, out_planes), jnp.float32),
        grid=(N,),
        in_specs=in_specs,
        out_specs=pl.BlockSpec((1, HW, out_planes), lambda n: (n, 0, 0)),
        scratch_shapes=[pltpu.VMEM((pad_rows, width), jnp.float32)],
        compiler_params=pltpu.CompilerParams(
            dimension_semantics=("parallel",)),
    )(*args)

    y = y.reshape(N, H, W, out_planes)
    if stride != 1:
        # Pointwise conv3/shortcut/ReLU commute with this spatial subsample, so
        # the result is exact.
        # TODO(synk): strided in-kernel taps to avoid the stride^2 extra compute.
        y = y[:, ::stride, ::stride, :]
    return jnp.transpose(y, (0, 3, 1, 2))                # NHWC -> NCHW


# ----------------------------------------------------------------------------
# Parameters: raw (PyTorch-like) + one-time folding for the kernel
# ----------------------------------------------------------------------------
class _ParamGen:
    def __init__(self, key):
        self._key = key

    def _next(self):
        self._key, k = jax.random.split(self._key)
        return k

    def conv(self, kh, kw, ci, co):
        fan_in = kh * kw * ci
        return jax.random.normal(self._next(), (kh, kw, ci, co),
                                 jnp.float32) * (2.0 / fan_in) ** 0.5

    def bn(self, c):
        return {"gamma": jnp.ones((c,), jnp.float32),
                "beta": jnp.zeros((c,), jnp.float32),
                "mean": jnp.zeros((c,), jnp.float32),
                "var": jnp.ones((c,), jnp.float32)}


def make_bottleneck_params(key, in_channels, out_channels, groups, base_width,
                           stride):
    pg = _ParamGen(key)
    width = int(out_channels * (base_width / 64.0)) * groups
    out_planes = out_channels * EXPANSION
    cig = width // groups
    p = {
        "stride": stride,
        "groups": groups,
        "conv1_w": pg.conv(1, 1, in_channels, width),
        "bn1": pg.bn(width),
        "conv2_w": jnp.stack([pg.conv(3, 3, cig, cig) for _ in range(groups)]),
        "bn2": pg.bn(width),
        "conv3_w": pg.conv(1, 1, width, out_planes),
        "bn3": pg.bn(out_planes),
    }
    if stride != 1 or in_channels != out_planes:
        p["sc_w"] = pg.conv(1, 1, in_channels, out_planes)
        p["sc_bn"] = pg.bn(out_planes)
    return p


def _bn_fold(w_mat, bn):
    """Fold eval-mode BN into a (K, Cout) matmul weight: bf16 weight, f32 bias."""
    scale = bn["gamma"] / jnp.sqrt(bn["var"] + BN_EPS)
    bias = bn["beta"] - bn["mean"] * scale
    return (w_mat * scale[None, :]).astype(jnp.bfloat16), bias.astype(jnp.float32)


def fold_bottleneck_params(p):
    """One-time weight prep: BN fold, block-diag grouped weight, bf16 casts."""
    groups = p["groups"]
    _, kh, kw, cig, cog = p["conv2_w"].shape
    width = groups * cog

    w1, b1 = _bn_fold(p["conv1_w"].reshape(-1, p["conv1_w"].shape[-1]), p["bn1"])

    # Block-diagonal dense weight -> grouped 3x3 conv becomes one matmul per tap.
    # Exact, and the zeros are free while the block-diagonal fits one MXU tile.
    # TODO(synk): per-group formulation for large cardinality/width.
    w2d = jnp.zeros((kh, kw, width, width), jnp.float32)
    for g in range(groups):
        w2d = w2d.at[:, :, g * cig:(g + 1) * cig,
                     g * cog:(g + 1) * cog].set(p["conv2_w"][g])
    scale2 = p["bn2"]["gamma"] / jnp.sqrt(p["bn2"]["var"] + BN_EPS)
    b2 = p["bn2"]["beta"] - p["bn2"]["mean"] * scale2
    w2 = (w2d * scale2[None, None, None, :]).reshape(kh * kw, width, width)
    w2 = w2.astype(jnp.bfloat16)

    w3, b3 = _bn_fold(p["conv3_w"].reshape(-1, p["conv3_w"].shape[-1]), p["bn3"])

    fp = {"stride": p["stride"],
          "w1": w1, "b1": b1.reshape(1, -1),
          "w2": w2, "b2": b2.astype(jnp.float32).reshape(1, -1),
          "w3": w3}
    if "sc_w" in p:
        wsc, bsc = _bn_fold(p["sc_w"].reshape(-1, p["sc_w"].shape[-1]), p["sc_bn"])
        fp["wsc"] = wsc
        fp["b3"] = (b3 + bsc).reshape(1, -1)   # conv3 + shortcut share one accumulator
    else:
        fp["b3"] = b3.reshape(1, -1)
    return fp


# ----------------------------------------------------------------------------
# Pure-JAX f32 reference (matches the PyTorch module, eval-mode BN)
# ----------------------------------------------------------------------------
def reference_forward(x_nchw, p):
    dn = ("NCHW", "HWIO", "NCHW")

    def bn(x, b):
        scale = b["gamma"] / jnp.sqrt(b["var"] + BN_EPS)
        shift = b["beta"] - b["mean"] * scale
        return x * scale[None, :, None, None] + shift[None, :, None, None]

    s, g = p["stride"], p["groups"]
    out = lax.conv_general_dilated(x_nchw, p["conv1_w"], (1, 1), "VALID",
                                   dimension_numbers=dn)
    out = jax.nn.relu(bn(out, p["bn1"]))
    w2 = jnp.concatenate([p["conv2_w"][i] for i in range(g)], axis=-1)
    out = lax.conv_general_dilated(out, w2, (s, s), ((1, 1), (1, 1)),
                                   dimension_numbers=dn, feature_group_count=g)
    out = jax.nn.relu(bn(out, p["bn2"]))
    out = lax.conv_general_dilated(out, p["conv3_w"], (1, 1), "VALID",
                                   dimension_numbers=dn)
    out = bn(out, p["bn3"])
    if "sc_w" in p:
        sc = lax.conv_general_dilated(x_nchw, p["sc_w"], (s, s), "VALID",
                                      dimension_numbers=dn)
        sc = bn(sc, p["sc_bn"])
    else:
        sc = x_nchw
    return jax.nn.relu(out + sc)


if __name__ == "__main__":
    key = jax.random.PRNGKey(0)
    k_param, k_x = jax.random.split(key)

    # Small BottleNeck config: cardinality=4, base_width=16 -> width=64,
    # out_planes=256 (projection shortcut path is exercised and fused).
    in_channels, out_channels, groups, base_width, stride = 64, 64, 4, 16, 1

    params = make_bottleneck_params(k_param, in_channels, out_channels,
                                    groups, base_width, stride)
    folded = fold_bottleneck_params(params)        # one-time weight prep

    # CIFAR-style input (NCHW): batch=2, 64 channels, 16x16 spatial.
    x = jax.random.normal(k_x, (2, in_channels, 16, 16), jnp.float32)

    fwd = jax.jit(lambda inp: bottleneck_forward(inp, folded))
    y = jax.block_until_ready(fwd(x))

    h_out = 16 // stride
    assert y.shape == (2, out_channels * EXPANSION, h_out, h_out), y.shape
    assert bool(jnp.all(jnp.isfinite(y)))

    # Loose numerical check vs. the f32 reference (kernel matmuls are bf16).
    ref = reference_forward(x, params)
    max_err = float(jnp.max(jnp.abs(y - ref)))
    assert max_err < 0.5, max_err

    print("KERNEL_OK")
</pallas_src>

<mosaic_0001>
module attributes {stable_mosaic.version = 11 : i64} {
  func.func @_bottleneck_kernel(%arg0: i32, %arg1: memref<1x256x64xf32, #tpu.memory_space<vmem>>, %arg2: memref<64x64xbf16, #tpu.memory_space<vmem>>, %arg3: memref<1x64xf32, #tpu.memory_space<vmem>>, %arg4: memref<9x64x64xbf16, #tpu.memory_space<vmem>>, %arg5: memref<1x64xf32, #tpu.memory_space<vmem>>, %arg6: memref<64x256xbf16, #tpu.memory_space<vmem>>, %arg7: memref<1x256xf32, #tpu.memory_space<vmem>>, %arg8: memref<64x256xbf16, #tpu.memory_space<vmem>>, %arg9: memref<1x256x256xf32, #tpu.memory_space<vmem>>, %arg10: memref<304x64xf32, #tpu.memory_space<vmem>>) attributes {dimension_semantics = [#tpu.dimension_semantics<parallel>], iteration_bounds = array<i64: 2>, scalar_prefetch = 0 : i64, scratch_operands = 1 : i64, tpu.core_type = #tpu.core_type<tc>, window_params = [{transform_indices = @transform_0, window_bounds = array<i64: 1, 256, 64>}, {pipeline_mode = #tpu.pipeline_mode<synchronous>, transform_indices = @transform_1, window_bounds = array<i64: 64, 64>}, {pipeline_mode = #tpu.pipeline_mode<synchronous>, transform_indices = @transform_2, window_bounds = array<i64: 1, 64>}, {pipeline_mode = #tpu.pipeline_mode<synchronous>, transform_indices = @transform_3, window_bounds = array<i64: 9, 64, 64>}, {pipeline_mode = #tpu.pipeline_mode<synchronous>, transform_indices = @transform_4, window_bounds = array<i64: 1, 64>}, {pipeline_mode = #tpu.pipeline_mode<synchronous>, transform_indices = @transform_5, window_bounds = array<i64: 64, 256>}, {pipeline_mode = #tpu.pipeline_mode<synchronous>, transform_indices = @transform_6, window_bounds = array<i64: 1, 256>}, {pipeline_mode = #tpu.pipeline_mode<synchronous>, transform_indices = @transform_7, window_bounds = array<i64: 64, 256>}, {transform_indices = @transform_8, window_bounds = array<i64: 1, 256, 256>}]} {
    %c0 = arith.constant 0 : index
    %c0_0 = arith.constant 0 : index
    %c0_1 = arith.constant 0 : index
    %0 = vector.load %arg1[%c0, %c0_0, %c0_1] : memref<1x256x64xf32, #tpu.memory_space<vmem>>, vector<1x256x64xf32>
    %1 = vector.shape_cast %0 : vector<1x256x64xf32> to vector<256x64xf32>
    %2 = arith.truncf %1 : vector<256x64xf32> to vector<256x64xbf16>
    %c0_2 = arith.constant 0 : index
    %c0_3 = arith.constant 0 : index
    %3 = vector.load %arg2[%c0_2, %c0_3] : memref<64x64xbf16, #tpu.memory_space<vmem>>, vector<64x64xbf16>
    %cst = arith.constant dense<0.000000e+00> : vector<256x64xf32>
    %4 = tpu.matmul %2, %3, %cst {dimension_numbers = #tpu.dot_dimension_numbers<[1], [0], [0], [1], [0, 0, 1, 1], [], []>} : vector<256x64xbf16>, vector<64x64xbf16>, vector<256x64xf32> -> vector<256x64xf32>
    %c0_4 = arith.constant 0 : index
    %c0_5 = arith.constant 0 : index
    %5 = vector.load %arg3[%c0_4, %c0_5] : memref<1x64xf32, #tpu.memory_space<vmem>>, vector<1x64xf32>
    %6 = vector.broadcast %5 : vector<1x64xf32> to vector<256x64xf32>
    %7 = arith.addf %4, %6 : vector<256x64xf32>
    %cst_6 = arith.constant 0.000000e+00 : f32
    %8 = vector.broadcast %cst_6 : f32 to vector<256x64xf32>
    %9 = arith.maximumf %7, %8 : vector<256x64xf32>
    %cst_7 = arith.constant 0.000000e+00 : f32
    %10 = vector.broadcast %cst_7 : f32 to vector<304x64xf32>
    %c0_8 = arith.constant 0 : index
    %c0_9 = arith.constant 0 : index
    %11 = vector.load %arg10[%c0_8, %c0_9] : memref<304x64xf32, #tpu.memory_space<vmem>>, vector<304x64xf32>
    tpu.vector_store %arg10[%c0_8, %c0_9], %10 {strides = array<i32>} : memref<304x64xf32, #tpu.memory_space<vmem>>, vector<304x64xf32>,
    %c24 = arith.constant 24 : index
    %c0_10 = arith.constant 0 : index
    %12 = vector.load %arg10[%c24, %c0_10] : memref<304x64xf32, #tpu.memory_space<vmem>>, vector<256x64xf32>
    tpu.vector_store %arg10[%c24, %c0_10], %9 {strides = array<i32>} : memref<304x64xf32, #tpu.memory_space<vmem>>, vector<256x64xf32>,
    %13 = tpu.iota {dimensions = array<i32: 0>} : vector<256x1xi32>
    %c16_i32 = arith.constant 16 : i32
    %c0_i32 = arith.constant 0 : i32
    %14 = arith.cmpi eq, %c16_i32, %c0_i32 : i32
    %c1_i32 = arith.constant 1 : i32
    %15 = arith.select %14, %c1_i32, %c16_i32 : i32
    %16 = vector.broadcast %15 : i32 to vector<256x1xi32>
    %17 = arith.remsi %13, %16 : vector<256x1xi32>
    %c0_i32_11 = arith.constant 0 : i32
    %18 = vector.broadcast %c0_i32_11 : i32 to vector<256x1xi32>
    %19 = arith.cmpi ne, %17, %18 : vector<256x1xi32>
    %c0_i32_12 = arith.constant 0 : i32
    %20 = vector.broadcast %c0_i32_12 : i32 to vector<256x1xi32>
    %21 = arith.cmpi slt, %17, %20 : vector<256x1xi32>
    %c0_i32_13 = arith.constant 0 : i32
    %22 = arith.cmpi slt, %15, %c0_i32_13 : i32
    %23 = vector.broadcast %22 : i1 to vector<256x1xi1>
    %24 = vector.broadcast %23 : vector<256x1xi1> to vector<256x1xi1>
    %25 = arith.xori %21, %24 : vector<256x1xi1>
    %26 = arith.andi %25, %19 : vector<256x1xi1>
    %27 = vector.broadcast %15 : i32 to vector<256x1xi32>
    %28 = arith.addi %17, %27 : vector<256x1xi32>
    %29 = arith.select %26, %28, %17 : vector<256x1xi1>, vector<256x1xi32>
    %c1_i32_14 = arith.constant 1 : i32
    %30 = vector.broadcast %c1_i32_14 : i32 to vector<256x1xi32>
    %31 = arith.cmpi sge, %29, %30 : vector<256x1xi32>
    %32 = arith.extui %31 : vector<256x1xi1> to vector<256x1xi32>
    %33 = arith.sitofp %32 : vector<256x1xi32> to vector<256x1xf32>
    %c14_i32 = arith.constant 14 : i32
    %34 = vector.broadcast %c14_i32 : i32 to vector<256x1xi32>
    %35 = arith.cmpi sle, %29, %34 : vector<256x1xi32>
    %36 = arith.extui %35 : vector<256x1xi1> to vector<256x1xi32>
    %37 = arith.sitofp %36 : vector<256x1xi32> to vector<256x1xf32>
    %cst_15 = arith.constant 0.000000e+00 : f32
    %38 = vector.broadcast %cst_15 : f32 to vector<256x64xf32>
    %c7 = arith.constant 7 : index
    %c0_16 = arith.constant 0 : index
    %39 = vector.load %arg10[%c7, %c0_16] : memref<304x64xf32, #tpu.memory_space<vmem>>, vector<256x64xf32>
    %40 = vector.broadcast %33 : vector<256x1xf32> to vector<256x64xf32>
    %41 = arith.mulf %39, %40 : vector<256x64xf32>
    %42 = arith.truncf %41 : vector<256x64xf32> to vector<256x64xbf16>
    %c0_17 = arith.constant 0 : index
    %c0_18 = arith.constant 0 : index
    %c0_19 = arith.constant 0 : index
    %43 = vector.load %arg4[%c0_17, %c0_18, %c0_19] : memref<9x64x64xbf16, #tpu.memory_space<vmem>>, vector<1x64x64xbf16>
    %44 = vector.shape_cast %43 : vector<1x64x64xbf16> to vector<64x64xbf16>
    %cst_20 = arith.constant dense<0.000000e+00> : vector<256x64xf32>
    %45 = tpu.matmul %42, %44, %cst_20 {dimension_numbers = #tpu.dot_dimension_numbers<[1], [0], [0], [1], [0, 0, 1, 1], [], []>} : vector<256x64xbf16>, vector<64x64xbf16>, vector<256x64xf32> -> vector<256x64xf32>
    %46 = arith.addf %38, %45 : vector<256x64xf32>
    %c8 = arith.constant 8 : index
    %c0_21 = arith.constant 0 : index
    %47 = vector.load %arg10[%c8, %c0_21] : memref<304x64xf32, #tpu.memory_space<vmem>>, vector<256x64xf32>
    %48 = arith.truncf %47 : vector<256x64xf32> to vector<256x64xbf16>
    %c1 = arith.constant 1 : index
    %c0_22 = arith.constant 0 : index
    %c0_23 = arith.constant 0 : index
    %49 = vector.load %arg4[%c1, %c0_22, %c0_23] : memref<9x64x64xbf16, #tpu.memory_space<vmem>>, vector<1x64x64xbf16>
    %50 = vector.shape_cast %49 : vector<1x64x64xbf16> to vector<64x64xbf16>
    %cst_24 = arith.constant dense<0.000000e+00> : vector<256x64xf32>
    %51 = tpu.matmul %48, %50, %cst_24 {dimension_numbers = #tpu.dot_dimension_numbers<[1], [0], [0], [1], [0, 0, 1, 1], [], []>} : vector<256x64xbf16>, vector<64x64xbf16>, vector<256x64xf32> -> vector<256x64xf32>
    %52 = arith.addf %46, %51 : vector<256x64xf32>
    %c9 = arith.constant 9 : index
    %c0_25 = arith.constant 0 : index
    %53 = vector.load %arg10[%c9, %c0_25] : memref<304x64xf32, #tpu.memory_space<vmem>>, vector<256x64xf32>
    %54 = vector.broadcast %37 : vector<256x1xf32> to vector<256x64xf32>
    %55 = arith.mulf %53, %54 : vector<256x64xf32>
    %56 = arith.truncf %55 : vector<256x64xf32> to vector<256x64xbf16>
    %c2 = arith.constant 2 : index
    %c0_26 = arith.constant 0 : index
    %c0_27 = arith.constant 0 : index
    %57 = vector.load %arg4[%c2, %c0_26, %c0_27] : memref<9x64x64xbf16, #tpu.memory_space<vmem>>, vector<1x64x64xbf16>
    %58 = vector.shape_cast %57 : vector<1x64x64xbf16> to vector<64x64xbf16>
    %cst_28 = arith.constant dense<0.000000e+00> : vector<256x64xf32>
    %59 = tpu.matmul %56, %58, %cst_28 {dimension_numbers = #tpu.dot_dimension_numbers<[1], [0], [0], [1], [0, 0, 1, 1], [], []>} : vector<256x64xbf16>, vector<64x64xbf16>, vector<256x64xf32> -> vector<256x64xf32>
    %60 = arith.addf %52, %59 : vector<256x64xf32>
    %c23 = arith.constant 23 : index
    %c0_29 = arith.constant 0 : index
    %61 = vector.load %arg10[%c23, %c0_29] : memref<304x64xf32, #tpu.memory_space<vmem>>, vector<256x64xf32>
    %62 = vector.broadcast %33 : vector<256x1xf32> to vector<256x64xf32>
    %63 = arith.mulf %61, %62 : vector<256x64xf32>
    %64 = arith.truncf %63 : vector<256x64xf32> to vector<256x64xbf16>
    %c3 = arith.constant 3 : index
    %c0_30 = arith.constant 0 : index
    %c0_31 = arith.constant 0 : index
    %65 = vector.load %arg4[%c3, %c0_30, %c0_31] : memref<9x64x64xbf16, #tpu.memory_space<vmem>>, vector<1x64x64xbf16>
    %66 = vector.shape_cast %65 : vector<1x64x64xbf16> to vector<64x64xbf16>
    %cst_32 = arith.constant dense<0.000000e+00> : vector<256x64xf32>
    %67 = tpu.matmul %64, %66, %cst_32 {dimension_numbers = #tpu.dot_dimension_numbers<[1], [0], [0], [1], [0, 0, 1, 1], [], []>} : vector<256x64xbf16>, vector<64x64xbf16>, vector<256x64xf32> -> vector<256x64xf32>
    %68 = arith.addf %60, %67 : vector<256x64xf32>
    %c24_33 = arith.constant 24 : index
    %c0_34 = arith.constant 0 : index
    %69 = vector.load %arg10[%c24_33, %c0_34] : memref<304x64xf32, #tpu.memory_space<vmem>>, vector<256x64xf32>
    %70 = arith.truncf %69 : vector<256x64xf32> to vector<256x64xbf16>
    %c4 = arith.constant 4 : index
    %c0_35 = arith.constant 0 : index
    %c0_36 = arith.constant 0 : index
    %71 = vector.load %arg4[%c4, %c0_35, %c0_36] : memref<9x64x64xbf16, #tpu.memory_space<vmem>>, vector<1x64x64xbf16>
    %72 = vector.shape_cast %71 : vector<1x64x64xbf16> to vector<64x64xbf16>
    %cst_37 = arith.constant dense<0.000000e+00> : vector<256x64xf32>
    %73 = tpu.matmul %70, %72, %cst_37 {dimension_numbers = #tpu.dot_dimension_numbers<[1], [0], [0], [1], [0, 0, 1, 1], [], []>} : vector<256x64xbf16>, vector<64x64xbf16>, vector<256x64xf32> -> vector<256x64xf32>
    %74 = arith.addf %68, %73 : vector<256x64xf32>
    %c25 = arith.constant 25 : index
    %c0_38 = arith.constant 0 : index
    %75 = vector.load %arg10[%c25, %c0_38] : memref<304x64xf32, #tpu.memory_space<vmem>>, vector<256x64xf32>
    %76 = vector.broadcast %37 : vector<256x1xf32> to vector<256x64xf32>
    %77 = arith.mulf %75, %76 : vector<256x64xf32>
    %78 = arith.truncf %77 : vector<256x64xf32> to vector<256x64xbf16>
    %c5 = arith.constant 5 : index
    %c0_39 = arith.constant 0 : index
    %c0_40 = arith.constant 0 : index
    %79 = vector.load %arg4[%c5, %c0_39, %c0_40] : memref<9x64x64xbf16, #tpu.memory_space<vmem>>, vector<1x64x64xbf16>
    %80 = vector.shape_cast %79 : vector<1x64x64xbf16> to vector<64x64xbf16>
    %cst_41 = arith.constant dense<0.000000e+00> : vector<256x64xf32>
    %81 = tpu.matmul %78, %80, %cst_41 {dimension_numbers = #tpu.dot_dimension_numbers<[1], [0], [0], [1], [0, 0, 1, 1], [], []>} : vector<256x64xbf16>, vector<64x64xbf16>, vector<256x64xf32> -> vector<256x64xf32>
    %82 = arith.addf %74, %81 : vector<256x64xf32>
    %c39 = arith.constant 39 : index
    %c0_42 = arith.constant 0 : index
    %83 = vector.load %arg10[%c39, %c0_42] : memref<304x64xf32, #tpu.memory_space<vmem>>, vector<256x64xf32>
    %84 = vector.broadcast %33 : vector<256x1xf32> to vector<256x64xf32>
    %85 = arith.mulf %83, %84 : vector<256x64xf32>
    %86 = arith.truncf %85 : vector<256x64xf32> to vector<256x64xbf16>
    %c6 = arith.constant 6 : index
    %c0_43 = arith.constant 0 : index
    %c0_44 = arith.constant 0 : index
    %87 = vector.load %arg4[%c6, %c0_43, %c0_44] : memref<9x64x64xbf16, #tpu.memory_space<vmem>>, vector<1x64x64xbf16>
    %88 = vector.shape_cast %87 : vector<1x64x64xbf16> to vector<64x64xbf16>
    %cst_45 = arith.constant dense<0.000000e+00> : vector<256x64xf32>
    %89 = tpu.matmul %86, %88, %cst_45 {dimension_numbers = #tpu.dot_dimension_numbers<[1], [0], [0], [1], [0, 0, 1, 1], [], []>} : vector<256x64xbf16>, vector<64x64xbf16>, vector<256x64xf32> -> vector<256x64xf32>
    %90 = arith.addf %82, %89 : vector<256x64xf32>
    %c40 = arith.constant 40 : index
    %c0_46 = arith.constant 0 : index
    %91 = vector.load %arg10[%c40, %c0_46] : memref<304x64xf32, #tpu.memory_space<vmem>>, vector<256x64xf32>
    %92 = arith.truncf %91 : vector<256x64xf32> to vector<256x64xbf16>
    %c7_47 = arith.constant 7 : index
    %c0_48 = arith.constant 0 : index
    %c0_49 = arith.constant 0 : index
    %93 = vector.load %arg4[%c7_47, %c0_48, %c0_49] : memref<9x64x64xbf16, #tpu.memory_space<vmem>>, vector<1x64x64xbf16>
    %94 = vector.shape_cast %93 : vector<1x64x64xbf16> to vector<64x64xbf16>
    %cst_50 = arith.constant dense<0.000000e+00> : vector<256x64xf32>
    %95 = tpu.matmul %92, %94, %cst_50 {dimension_numbers = #tpu.dot_dimension_numbers<[1], [0], [0], [1], [0, 0, 1, 1], [], []>} : vector<256x64xbf16>, vector<64x64xbf16>, vector<256x64xf32> -> vector<256x64xf32>
    %96 = arith.addf %90, %95 : vector<256x64xf32>
    %c41 = arith.constant 41 : index
    %c0_51 = arith.constant 0 : index
    %97 = vector.load %arg10[%c41, %c0_51] : memref<304x64xf32, #tpu.memory_space<vmem>>, vector<256x64xf32>
    %98 = vector.broadcast %37 : vector<256x1xf32> to vector<256x64xf32>
    %99 = arith.mulf %97, %98 : vector<256x64xf32>
    %100 = arith.truncf %99 : vector<256x64xf32> to vector<256x64xbf16>
    %c8_52 = arith.constant 8 : index
    %c0_53 = arith.constant 0 : index
    %c0_54 = arith.constant 0 : index
    %101 = vector.load %arg4[%c8_52, %c0_53, %c0_54] : memref<9x64x64xbf16, #tpu.memory_space<vmem>>, vector<1x64x64xbf16>
    %102 = vector.shape_cast %101 : vector<1x64x64xbf16> to vector<64x64xbf16>
    %cst_55 = arith.constant dense<0.000000e+00> : vector<256x64xf32>
    %103 = tpu.matmul %100, %102, %cst_55 {dimension_numbers = #tpu.dot_dimension_numbers<[1], [0], [0], [1], [0, 0, 1, 1], [], []>} : vector<256x64xbf16>, vector<64x64xbf16>, vector<256x64xf32> -> vector<256x64xf32>
    %104 = arith.addf %96, %103 : vector<256x64xf32>
    %c0_56 = arith.constant 0 : index
    %c0_57 = arith.constant 0 : index
    %105 = vector.load %arg5[%c0_56, %c0_57] : memref<1x64xf32, #tpu.memory_space<vmem>>, vector<1x64xf32>
    %106 = vector.broadcast %105 : vector<1x64xf32> to vector<256x64xf32>
    %107 = arith.addf %104, %106 : vector<256x64xf32>
    %cst_58 = arith.constant 0.000000e+00 : f32
    %108 = vector.broadcast %cst_58 : f32 to vector<256x64xf32>
    %109 = arith.maximumf %107, %108 : vector<256x64xf32>
    %110 = arith.truncf %109 : vector<256x64xf32> to vector<256x64xbf16>
    %c0_59 = arith.constant 0 : index
    %c0_60 = arith.constant 0 : index
    %111 = vector.load %arg6[%c0_59, %c0_60] : memref<64x256xbf16, #tpu.memory_space<vmem>>, vector<64x256xbf16>
    %cst_61 = arith.constant dense<0.000000e+00> : vector<256x256xf32>
    %112 = tpu.matmul %110, %111, %cst_61 {dimension_numbers = #tpu.dot_dimension_numbers<[1], [0], [0], [1], [0, 0, 1, 1], [], []>} : vector<256x64xbf16>, vector<64x256xbf16>, vector<256x256xf32> -> vector<256x256xf32>
    %c0_62 = arith.constant 0 : index
    %c0_63 = arith.constant 0 : index
    %113 = vector.load %arg7[%c0_62, %c0_63] : memref<1x256xf32, #tpu.memory_space<vmem>>, vector<1x256xf32>
    %114 = vector.broadcast %113 : vector<1x256xf32> to vector<256x256xf32>
    %115 = arith.addf %112, %114 : vector<256x256xf32>
    %c0_64 = arith.constant 0 : index
    %c0_65 = arith.constant 0 : index
    %116 = vector.load %arg8[%c0_64, %c0_65] : memref<64x256xbf16, #tpu.memory_space<vmem>>, vector<64x256xbf16>
    %cst_66 = arith.constant dense<0.000000e+00> : vector<256x256xf32>
    %117 = tpu.matmul %2, %116, %cst_66 {dimension_numbers = #tpu.dot_dimension_numbers<[1], [0], [0], [1], [0, 0, 1, 1], [], []>} : vector<256x64xbf16>, vector<64x256xbf16>, vector<256x256xf32> -> vector<256x256xf32>
    %118 = arith.addf %115, %117 : vector<256x256xf32>
    %cst_67 = arith.constant 0.000000e+00 : f32
    %119 = vector.broadcast %cst_67 : f32 to vector<256x256xf32>
    %120 = arith.maximumf %118, %119 : vector<256x256xf32>
    %c0_68 = arith.constant 0 : index
    %c0_69 = arith.constant 0 : index
    %c0_70 = arith.constant 0 : index
    %121 = vector.load %arg9[%c0_68, %c0_69, %c0_70] : memref<1x256x256xf32, #tpu.memory_space<vmem>>, vector<1x256x256xf32>
    %122 = vector.shape_cast %121 : vector<1x256x256xf32> to vector<256x256xf32>
    %123 = vector.shape_cast %120 : vector<256x256xf32> to vector<1x256x256xf32>
    tpu.vector_store %arg9[%c0_68, %c0_69, %c0_70], %123 {strides = array<i32>} : memref<1x256x256xf32, #tpu.memory_space<vmem>>, vector<1x256x256xf32>,
    return
  }
  func.func @transform_0(%arg0: i32) -> (i32, i32, i32) {
    %c0_i32 = arith.constant 0 : i32
    %c0_i32_0 = arith.constant 0 : i32
    %c0_i32_1 = arith.constant 0 : i32
    return %arg0, %c0_i32, %c0_i32_0 : i32, i32, i32
  }
  func.func @transform_1(%arg0: i32) -> (i32, i32) {
    %c0_i32 = arith.constant 0 : i32
    %c0_i32_0 = arith.constant 0 : i32
    %c0_i32_1 = arith.constant 0 : i32
    return %c0_i32, %c0_i32_0 : i32, i32
  }
  func.func @transform_2(%arg0: i32) -> (i32, i32) {
    %c0_i32 = arith.constant 0 : i32
    %c0_i32_0 = arith.constant 0 : i32
    %c0_i32_1 = arith.constant 0 : i32
    return %c0_i32, %c0_i32_0 : i32, i32
  }
  func.func @transform_3(%arg0: i32) -> (i32, i32, i32) {
    %c0_i32 = arith.constant 0 : i32
    %c0_i32_0 = arith.constant 0 : i32
    %c0_i32_1 = arith.constant 0 : i32
    %c0_i32_2 = arith.constant 0 : i32
    return %c0_i32, %c0_i32_0, %c0_i32_1 : i32, i32, i32
  }
  func.func @transform_4(%arg0: i32) -> (i32, i32) {
    %c0_i32 = arith.constant 0 : i32
    %c0_i32_0 = arith.constant 0 : i32
    %c0_i32_1 = arith.constant 0 : i32
    return %c0_i32, %c0_i32_0 : i32, i32
  }
  func.func @transform_5(%arg0: i32) -> (i32, i32) {
    %c0_i32 = arith.constant 0 : i32
    %c0_i32_0 = arith.constant 0 : i32
    %c0_i32_1 = arith.constant 0 : i32
    return %c0_i32, %c0_i32_0 : i32, i32
  }
  func.func @transform_6(%arg0: i32) -> (i32, i32) {
    %c0_i32 = arith.constant 0 : i32
    %c0_i32_0 = arith.constant 0 : i32
    %c0_i32_1 = arith.constant 0 : i32
    return %c0_i32, %c0_i32_0 : i32, i32
  }
  func.func @transform_7(%arg0: i32) -> (i32, i32) {
    %c0_i32 = arith.constant 0 : i32
    %c0_i32_0 = arith.constant 0 : i32
    %c0_i32_1 = arith.constant 0 : i32
    return %c0_i32, %c0_i32_0 : i32, i32
  }
  func.func @transform_8(%arg0: i32) -> (i32, i32, i32) {
    %c0_i32 = arith.constant 0 : i32
    %c0_i32_0 = arith.constant 0 : i32
    %c0_i32_1 = arith.constant 0 : i32
    return %arg0, %c0_i32, %c0_i32_0 : i32, i32, i32
  }
}

</mosaic_0001>

<bundles_post_ra>
// kernel: _lambda_.1
= control target key start
LH: loop header
LB: loop body
LE: loop exit
PB: predicated region body
PF: predicated region fallthrough
CT: control target
= control target key end

     0   :  { %13 = vsyncpa [#allocation4], 0  ;;  %s8972_s0 = inlined_call_operand.hbm [shape: f32[2,256,64], index: 0, kind: input, shape index: {}]   ;;  %s8973_s1 = inlined_call_operand.hbm [shape: bf16[64,64], index: 1, kind: input, shape index: {}]   ;;  %s8974_s2 = inlined_call_operand.vmem [shape: f32[1,64], index: 2, kind: input, shape index: {}, may-alias: {2,4}]   ;;  %s8975_s3 = inlined_call_operand.vmem [shape: bf16[9,64,64], index: 3, kind: input, shape index: {}]   ;;  %s8976_s4 = inlined_call_operand.vmem [shape: f32[1,64], index: 4, kind: input, shape index: {}, may-alias: {2,4}]   ;;  %s8977_s5 = inlined_call_operand.vmem [shape: bf16[64,256], index: 5, kind: input, shape index: {}]   ;;  %s8978_s6 = inlined_call_operand.vmem [shape: f32[1,256], index: 6, kind: input, shape index: {}]   ;;  %s8979_s7 = inlined_call_operand.vmem [shape: bf16[64,256], index: 7, kind: input, shape index: {}]   ;;  %s8980_s8 = inlined_call_operand.hbm [shape: f32[2,256,256], index: 8, kind: output, shape index: {}]  }
   0x1   :  { %15 = vsyncpa [#allocation4 + $0x1], 0 }
   0x2   :  { %16 = vsyncpa [#allocation7], 0 }
   0x3   :  { %17 = vsyncpa [#allocation5], 0 }
   0x4   :  { %19 = vsyncpa [#allocation5 + $0x1], 0  ;;  %s6954_s27 = smov 0   ;;  %s6956_s28 = smov 0  }
   0x5   :  { %s6958_s29 = smov 0   ;;  %s6960_s30 = smov 0  }
   0x6 LB: > { %s6975_s9 = sadd.s32 4294967295, %s6896_s30   ;;  %s5291_s10 = sadd.s32 4294967294, %s6896_s30   ;;  %s6896_s30 = sphi %s6960_s30, %s9337_s30   ;;  %s6892_s29 = sphi %s6958_s29, %s9340_s29   ;;  %s6888_s28 = sphi %s6956_s28, %s9339_s28   ;;  %s6884_s27 = sphi %s6954_s27, %s9338_s27  }
   0x7   : > { %p45_p0 = scmp.ne.s32.totalorder %s6888_s28, %s6884_s27  ;;  %p8981_p1 = scmp.eq.s32.totalorder %s6975_s9, 0 }
   0x8   : > { %p222_p3 = scmp.eq.s32.totalorder %s5291_s10, 1  ;;  %p5292_p5 = scmp.ge.s32.totalorder %s6896_s30, 1 }
   0x9   : > { %p6984_p4 = por %p8981_p1, %p45_p0  ;;  %p229_p7 = scmp.lt.s32.totalorder %s6896_s30, 3 }
   0xa   : > { %p6989_p6 = por %p222_p3, %p45_p0  ;;  %s6898_s14 = smov [#allocation6]  }
   0xb   : > { %s9076_s11 = scalar_select %p6984_p4, 1, 0 }
   0xc   : > { %s9077_s12 = scalar_select %p6989_p6, 1, 0 }
   0xd   : > { %p6994_p8 = pnand %p5292_p5, %p229_p7  ;;  %s241_s15 = sshll.u32 %s6898_s14, 4  ;;  %s6998_s15 = int_to_ptr.vmem [resolvable:$true] %s241_s15 }
   0xe   : > { %s7010_s17 = sadd.s32 1, %s6896_s30   ;;  %s32_s18 = sadd.s32 1, %s6892_s29 }
   0xf   : > { %s9078_s13 = scalar_select %p6994_p8, 1, 0 }
  0x10   : > { %p6647_p9 = pneg %p6994_p8  ;;  %9080 = sst [smem:[#allocation12_spill]] %s7010_s17 }
  0x11   : > { %s29_s19 = ssub.s32 %s6896_s30, %s7010_s17  ;;  %s6768_s22 = scalar_lea.hbm %s8973_s1, 512 }
  0x12   : > { %p7005_p11 = pnand %p6647_p9, %p8981_p1  ;;  %p6769_p12 = scmp.ne.s32.totalorder %s8973_s1, %s6768_s22 }
  0x13   : > { %p6775_p5 = scmp.lt.u32.totalorder %s6768_s22, %s8973_s1 }
  0x14   : > { %p6770_p13 = pneg %p7005_p11 }
  0x16   : > { %p6771_p0 = pnand %p6770_p13, %p6769_p12 }
  0x18   : > { %p6772_p3 = pneg %p6771_p0 }
  0x1a   : > { %p6777_p7 = pnand %p6775_p5, %p6772_p3 }
  0x1c   : > { %6780 = shalt.err (!%p6777_p7)
}
  0x1d   : > { %s6781_s10 = scalar_lea.vmem %s6998_s15, 512  ;;  %p6789_p2 = scmp.lt.s32.totalorder %s6998_s15, %s6998_s15 }
  0x1e   : > { %p6782_p9 = scmp.ne.s32.totalorder %s6998_s15, %s6781_s10  ;;  %p6790_p6 = scmp.lt.s32.totalorder %s6781_s10, %s6781_s10 }
  0x20   : > { %p6784_p10 = pnand %p6782_p9, %p6770_p13  ;;  %p6791_p4 = por %p6790_p6, %p6789_p2 }
  0x22   : > { %p6785_p1 = pneg %p6784_p10 }
  0x24   : > { %p6792_p8 = pnand %p6791_p4, %p6785_p1 }
  0x26   : > { %6795 = shalt.err (!%p6792_p8)
}
  0x27   : > { %s6899_s14 = smov 64   ;;  %s6900_s20 = smov 4  }
  0x28   : > { %6650 = dma.hbm_to_vmem [thread:$0]  (!%p7005_p11), %s8973_s1, 512, %s6998_s15, [#allocation7], %s6899_s14, %s6899_s14, %s6900_s20  }
  0x29   : > { %p30_p2 = scmp.eq.s32.totalorder %s29_s19, 0  ;;  %p39_p1 = scmp.ne.s32.totalorder %s6892_s29, %s6888_s28 }
  0x2a   : > { %p40_p4 = scmp.eq.s32.totalorder %s6896_s30, 0  ;;  %p6660_p6 = scmp.lt.s32.totalorder %s6896_s30, 2 }
  0x2b   : > { %s7041_s23 = scalar_select %p30_p2, %s6892_s29, %s32_s18  }
  0x2c   : > { %p41_p8 = por %p40_p4, %p39_p1  ;;  %p9081_p10 = scmp.eq.s32.totalorder %s6975_s9, 1 }
  0x2d   : > { %s273_s25 = sand.u32 1, %s6892_s29   ;;  %s5653_s26 = sshll.u32 %s6896_s30, 12 }
  0x2e   : > { %p7045_p12 = por %p9081_p10, %p39_p1  ;;  %s5295_s10 = sshll.u32 %s273_s25, 8 }
  0x2f   : > { %s7054_s21 = scalar_lea.hbm %s8972_s0, %s5653_s26  ;;  %s277_s15 = scalar_lea.vmem [#allocation3], %s5295_s10 }
  0x30   : > { %s284_s18 = sshll.u32 %s277_s15, 4  ;;  %p7056_p11 = pnand %p6660_p6, %p41_p8  ;;  %s7060_s18 = int_to_ptr.vmem [resolvable:$true] %s284_s18 }
  0x31   : > { %s7062_s14 = scalar_lea.sflag [#allocation4], %s273_s25  ;;  %s6796_s20 = scalar_lea.hbm %s7054_s21, 4096 }
  0x32   : > { %p6797_p13 = scmp.ne.s32.totalorder %s7054_s21, %s6796_s20  ;;  %p6798_p0 = pneg %p7056_p11 }
  0x33   : > { %s6801_s26 = scalar_lea.hbm %s8972_s0, 8192  ;;  %p6802_p7 = scmp.lt.u32.totalorder %s7054_s21, %s8972_s0 }
  0x34   : > { %p6799_p3 = pnand %p6798_p0, %p6797_p13  ;;  %p6803_p9 = scmp.lt.u32.totalorder %s6801_s26, %s6796_s20 }
  0x35   : > { %p6805_p1 = scmp.lt.u32.totalorder %s6796_s20, %s7054_s21 }
  0x36   : > { %p6800_p5 = pneg %p6799_p3  ;;  %p6804_p2 = por %p6803_p9, %p6802_p7 }
  0x38   : > { %p6806_p4 = por %p6805_p1, %p6804_p2 }
  0x3a   : > { %p6807_p6 = pnand %p6806_p4, %p6800_p5 }
  0x3c   : > { %6810 = shalt.err (!%p6807_p6)
}
  0x3d   : > { %s6811_s25 = scalar_lea.vmem %s7060_s18, 4096  ;;  %s6901_s15 = smov [#allocation3]  }
  0x3e   : > { %p6812_p8 = scmp.ne.s32.totalorder %s7060_s18, %s6811_s25  ;;  %s6816_s17 = sshll.u32 %s6901_s15, 4  ;;  %s6817_s17 = int_to_ptr.vmem [resolvable:$false] %s6816_s17 }
  0x3f   : > { %s6818_s22 = scalar_lea.vmem %s6817_s17, 8192  ;;  %p6819_p3 = scmp.lt.s32.totalorder %s7060_s18, %s6817_s17 }
  0x40   : > { %p6814_p10 = pnand %p6812_p8, %p6798_p0  ;;  %p6820_p7 = scmp.lt.s32.totalorder %s6818_s22, %s6811_s25 }
  0x42   : > { %p6815_p13 = pneg %p6814_p10  ;;  %p6821_p9 = por %p6820_p7, %p6819_p3 }
  0x44   : > { %p6822_p2 = pnand %p6821_p9, %p6815_p13 }
  0x46   : > { %6825 = shalt.err (!%p6822_p2)
}
  0x47   : > { %s6902_s20 = smov 128   ;;  %s6903_s26 = smov 8  }
  0x48   : > { %6654 = dma.hbm_to_vmem [thread:$0]  (!%p7056_p11), %s7054_s21, 4096, %s7060_s18, %s7062_s14, %s6902_s20, %s6902_s20, %s6903_s26  }
  0x49   : > { %p9084_p0 = scmp.ne.s32.totalorder %s9078_s13, 0 }
  0x4b   : > { %296 = sbr.rel (%p9084_p0) target bundleno = 1428 (0x594), region = 52 }
  0x52   : > { %s7093_s10 = sand.u32 1, %s6888_s28   ;;  %p9085_p5 = scmp.ne.s32.totalorder %s9076_s11, 0 }
  0x53   : > { %s5299_s16 = sshll.u32 %s7093_s10, 8  ;;  %s299_s25 = scalar_lea.sflag [#allocation4], %s7093_s10 }
  0x54   : > { %s7097_s15 = scalar_lea.vmem [#allocation3], %s5299_s16 }
  0x55   : > { %6871 = dma.done.wait (%p9085_p5), %s299_s25, 4096  }
  0x56   : > { %6873 = vsyncadd (%p9085_p5), %s299_s25, 4294963200  ;;  %p9086_p11 = scmp.eq.s32.totalorder %s6975_s9, 0 }
  0x58   : > { %6875 = dma.done.wait (%p9086_p11), [#allocation7], 512   ;;  %p9087_p1 = pmov %p9086_p11 }
  0x59   : > { %v6704_v0 = vld [vmem:[#allocation6] sm:$0xff]   ;;  %v6705_v1 = vld [vmem:[#allocation6 + $0x8] sm:$0xff]   ;;  %v6706_v2 = vld [vmem:[#allocation6 + $0x10] sm:$0xff]   ;;  %vm427_vm0 = vcmask 523264   ;;  %v8986_v54 = vmov 0.0   ;;  %s5301_s17 = sshll.u32 %s7093_s10, 9 }
  0x5a   : > { %6877 = vsyncadd (%p9087_p1), [#allocation7], 4294966784  ;;  %5855 = vmatprep.subr.bf16.mxu0 %v6704_v0  ;;  %v340_v3 = vld [vmem:[%s7097_s15] sm:$0xff]  ;;  %v341_v4 = vld [vmem:[%s7097_s15 + $0x8] sm:$0xff]  ;;  %674 = vst.msk [vmem:[#allocation2 + $0x28] sm:$0xff] %vm427_vm0, %v8986_v54  ;;  %s8795_s22 = scalar_lea.vmem [#allocation8], %s5301_s17 }
  0x5b   : > { %5856 = vmatpush3.bf16.msra.mxu0 %v6704_v0  ;;  %v7109_v5 = vpack.c.bf16 %v341_v4, %v340_v3  ;;  %v6707_v6 = vld [vmem:[#allocation6 + $0x18] sm:$0xff]   ;;  %v342_v7 = vld [vmem:[%s7097_s15 + $0x10] sm:$0xff]  ;;  %v344_v9 = vld [vmem:[%s7097_s15 + $0x20] sm:$0xff]  ;;  %669 = vst.msk [vmem:[#allocation2] sm:$0xff] %vm427_vm0, %v8986_v54  ;;  %s5654_s20 = sshll.u32 %s6975_s9, 13  ;;  %s5208_s26 = sshll.u32 %s8795_s22, 4  ;;  %s8925_s26 = int_to_ptr.vmem [resolvable:$true] %s5208_s26 }
  0x5c   : > { %5857 = vmatprep.subr.bf16.mxu0 %v6705_v1  ;;  %v343_v8 = vld [vmem:[%s7097_s15 + $0x18] sm:$0xff]  ;;  %v345_v10 = vld [vmem:[%s7097_s15 + $0x28] sm:$0xff]  ;;  %v346_v13 = vld [vmem:[%s7097_s15 + $0x30] sm:$0xff]  ;;  %670 = vst.msk [vmem:[#allocation2 + $0x8] sm:$0xff] %vm427_vm0, %v8986_v54  ;;  %s5195_s9 = scalar_lea.sflag [#allocation5], %s7093_s10  ;;  %s6826_s11 = scalar_lea.vmem %s8925_s26, 8192 }
  0x5d   : > { %9088 = vst [vmem:[#allocation13_spill] sm:$0xff] %v7109_v5  ;;  %5863 = vmatprep.mubr.msk.bf16.mxu0 %vm427_vm0, %v7109_v5  ;;  %v7117_v11 = vpack.c.bf16 %v343_v8, %v342_v7  ;;  %v7119_v12 = vpack.c.bf16 %v345_v10, %v344_v9  ;;  %v347_v14 = vld [vmem:[%s7097_s15 + $0x38] sm:$0xff]  ;;  %v348_v15 = vld [vmem:[%s7097_s15 + $0x40] sm:$0xff]  ;;  %v349_v16 = vld [vmem:[%s7097_s15 + $0x48] sm:$0xff]  ;;  %p6827_p4 = scmp.ne.s32.totalorder %s8925_s26, %s6826_s11  ;;  %s6906_s13 = smov [#allocation8]  }
  0x5e   : > { %v7129_v17 = vpack.c.bf16 %v347_v14, %v346_v13  ;;  %v7131_v18 = vpack.c.bf16 %v349_v16, %v348_v15  ;;  %v350_v19 = vld [vmem:[%s7097_s15 + $0x50] sm:$0xff]  ;;  %v351_v20 = vld [vmem:[%s7097_s15 + $0x58] sm:$0xff]  ;;  %v352_v21 = vld [vmem:[%s7097_s15 + $0x60] sm:$0xff]  ;;  %671 = vst.msk [vmem:[#allocation2 + $0x10] sm:$0xff] %vm427_vm0, %v8986_v54  ;;  %s6830_s21 = sshll.u32 %s6906_s13, 4  ;;  %s6831_s21 = int_to_ptr.vmem [resolvable:$false] %s6830_s21 }
  0x5f   : > { %5858 = vmatpush3.bf16.msra.mxu0 %v6705_v1  ;;  %9089 = vst [vmem:[#allocation14_spill] sm:$0xff] %v7117_v11  ;;  %9090 = vst [vmem:[#allocation15_spill] sm:$0xff] %v7119_v12  ;;  %v353_v22 = vld [vmem:[%s7097_s15 + $0x68] sm:$0xff]  ;;  %v7141_v23 = vpack.c.bf16 %v351_v20, %v350_v19  ;;  %v354_v25 = vld [vmem:[%s7097_s15 + $0x70] sm:$0xff]  ;;  %p6828_p6 = pnand %p6827_p4, %p7045_p12  ;;  %s6832_s18 = scalar_lea.vmem %s6831_s21, 16384 }
  0x60   : > { %5859 = vmatprep.subr.bf16.mxu0 %v6706_v2  ;;  %9091 = vst [vmem:[#allocation16_spill] sm:$0xff] %v7129_v17  ;;  %9092 = vst [vmem:[#allocation17_spill] sm:$0xff] %v7131_v18  ;;  %v7143_v24 = vpack.c.bf16 %v353_v22, %v352_v21  ;;  %v355_v26 = vld [vmem:[%s7097_s15 + $0x78] sm:$0xff]  ;;  %v356_v27 = vld [vmem:[%s7097_s15 + $0x80] sm:$0xff]  ;;  %p6833_p10 = scmp.lt.s32.totalorder %s8925_s26, %s6831_s21  ;;  %p6834_p13 = scmp.lt.s32.totalorder %s6832_s18, %s6826_s11 }
  0x61   : > { %9093 = vst [vmem:[#allocation18_spill] sm:$0xff] %v7141_v23  ;;  %v357_v28 = vld [vmem:[%s7097_s15 + $0x88] sm:$0xff]  ;;  %v7153_v29 = vpack.c.bf16 %v355_v26, %v354_v25  ;;  %v358_v31 = vld [vmem:[%s7097_s15 + $0x90] sm:$0xff]  ;;  %v359_v32 = vld [vmem:[%s7097_s15 + $0x98] sm:$0xff]  ;;  %p6829_p8 = pneg %p6828_p6 }
  0x62   : > { %9094 = vst [vmem:[#allocation19_spill] sm:$0xff] %v7143_v24  ;;  %v7155_v30 = vpack.c.bf16 %v357_v28, %v356_v27  ;;  %v360_v33 = vld [vmem:[%s7097_s15 + $0xa0] sm:$0xff]  ;;  %v361_v34 = vld [vmem:[%s7097_s15 + $0xa8] sm:$0xff]  ;;  %v7165_v35 = vpack.c.bf16 %v359_v32, %v358_v31  ;;  %v362_v37 = vld [vmem:[%s7097_s15 + $0xb0] sm:$0xff]  ;;  %p6835_p3 = por %p6834_p13, %p6833_p10 }
  0x63   : > { %5860 = vmatpush3.bf16.msra.mxu0 %v6706_v2  ;;  %9095 = vst [vmem:[#allocation20_spill] sm:$0xff] %v7153_v29  ;;  %v7167_v36 = vpack.c.bf16 %v361_v34, %v360_v33  ;;  %v363_v38 = vld [vmem:[%s7097_s15 + $0xb8] sm:$0xff]  ;;  %v364_v39 = vld [vmem:[%s7097_s15 + $0xc0] sm:$0xff]  ;;  %v365_v40 = vld [vmem:[%s7097_s15 + $0xc8] sm:$0xff]  ;;  %v739_v2 = vlaneseq }
  0x64   : > { %5861 = vmatprep.subr.bf16.mxu0 %v6707_v6  ;;  %9096 = vst [vmem:[#allocation21_spill] sm:$0xff] %v7155_v30  ;;  %9097 = vst [vmem:[#allocation22_spill] sm:$0xff] %v7165_v35  ;;  %v7177_v41 = vpack.c.bf16 %v363_v38, %v362_v37  ;;  %v7179_v42 = vpack.c.bf16 %v365_v40, %v364_v39  ;;  %v366_v43 = vld [vmem:[%s7097_s15 + $0xd0] sm:$0xff]  ;;  %v367_v44 = vld [vmem:[%s7097_s15 + $0xd8] sm:$0xff]  ;;  %p6836_p7 = pnand %p6835_p3, %p6829_p8 }
  0x65   : > { %9098 = vst [vmem:[#allocation23_spill] sm:$0xff] %v7167_v36  ;;  %v368_v45 = vld [vmem:[%s7097_s15 + $0xe0] sm:$0xff]  ;;  %v369_v46 = vld [vmem:[%s7097_s15 + $0xe8] sm:$0xff]  ;;  %v7189_v47 = vpack.c.bf16 %v367_v44, %v366_v43  ;;  %v370_v49 = vld [vmem:[%s7097_s15 + $0xf0] sm:$0xff]  ;;  %v7316_v3 = vshrl.u32 %v739_v2, 7 }
  0x66   : > { %9099 = vst [vmem:[#allocation24_spill] sm:$0xff] %v7177_v41  ;;  %9100 = vst [vmem:[#allocation25_spill] sm:$0xff] %v7179_v42  ;;  %v7191_v48 = vpack.c.bf16 %v369_v46, %v368_v45  ;;  %v371_v50 = vld [vmem:[%s7097_s15 + $0xf8] sm:$0xff]  ;;  %v6708_v52 = vld [vmem:[%s8975_s3 + $0x20] sm:$0xff]   ;;  %s8923_s15 = scalar_lea.hbm %s8980_s8, %s5654_s20 }
  0x67   : > { %5862 = vmatpush3.bf16.msra.mxu0 %v6707_v6  ;;  %9101 = vst [vmem:[#allocation26_spill] sm:$0xff] %v7189_v47  ;;  %v7199_v51 = vpack.c.bf16 %v371_v50, %v370_v49  ;;  %v6709_v53 = vld [vmem:[%s8975_s3 + $0x40] sm:$0xff]   ;;  %672 = vst.msk [vmem:[#allocation2 + $0x18] sm:$0xff] %vm427_vm0, %v8986_v54  ;;  %v6710_v55 = vld [vmem:[%s8975_s3 + $0x28] sm:$0xff]   ;;  %v741_v4 = vadd.s32 8, %v7316_v3  ;;  %v742_v6 = vadd.s32 16, %v7316_v3 }
  0x68   : > { %9102 = vst [vmem:[#allocation27_spill] sm:$0xff] %v7191_v48  ;;  %5895 = vmatprep.subr.bf16.mxu0 %v6708_v52  ;;  %673 = vst.msk [vmem:[#allocation2 + $0x20] sm:$0xff] %vm427_vm0, %v8986_v54  ;;  %5975 = vmatprep.subr.bf16.mxu1 %v6709_v53  ;;  %v6711_v56 = vld [vmem:[%s8975_s3 + $0x48] sm:$0xff]   ;;  %v6712_v57 = vld [vmem:[%s8975_s3 + $0x30] sm:$0xff]   ;;  %v743_v7 = vadd.s32 24, %v7316_v3  ;;  %v776_v13 = vand.u32 15, %v7316_v3 }
  0x69   : > { %9103 = vst [vmem:[#allocation28_spill] sm:$0xff] %v7199_v51  ;;  %675 = vst.msk [vmem:[#allocation2 + $0x30] sm:$0xff] %vm427_vm0, %v8986_v54  ;;  %5976 = vmatpush3.bf16.msra.mxu1 %v6709_v53  ;;  %v6713_v58 = vld [vmem:[%s8975_s3 + $0x50] sm:$0xff]   ;;  %v6714_v59 = vld [vmem:[%s8975_s3 + $0x38] sm:$0xff]   ;;  %v783_v9 = vand.u32 15, %v741_v4  ;;  %v790_v14 = vand.u32 15, %v742_v6 }
  0x6a   : > { %5864 = vmatmul.mubr.msk.bf16.vlgmr.msra.gmra.mrb[0].mxu0 %vm427_vm0, %v7117_v11  ;;  %676 = vst.msk [vmem:[#allocation2 + $0x38] sm:$0xff] %vm427_vm0, %v8986_v54  ;;  %677 = vst.msk [vmem:[#allocation2 + $0x40] sm:$0xff] %vm427_vm0, %v8986_v54  ;;  %5977 = vmatprep.subr.bf16.mxu1 %v6711_v56  ;;  %v6715_v60 = vld [vmem:[%s8975_s3 + $0x58] sm:$0xff]   ;;  %v1436_v61 = vld [vmem:[#allocation2 + $0x8] sm:$0xff]  ;;  %v797_v19 = vand.u32 15, %v743_v7  ;;  %v745_v20 = vadd.s32 40, %v7316_v3 }
  0x6b   : > { %5867 = vmatprep.mubr.msk.bf16.mxu0 %vm427_vm0, %v7119_v12  ;;  %5896 = vmatpush3.bf16.msra.mxu0 %v6708_v52  ;;  %678 = vst.msk [vmem:[#allocation2 + $0x48] sm:$0xff] %vm427_vm0, %v8986_v54  ;;  %679 = vst.msk [vmem:[#allocation2 + $0x50] sm:$0xff] %vm427_vm0, %v8986_v54  ;;  %v1437_v62 = vld [vmem:[#allocation2 + $0x10] sm:$0xff]  ;;  %v7307_v0 = vld [vmem:[%s8975_s3 + $0x60] sm:$0xff]   ;;  %v744_v21 = vadd.s32 32, %v7316_v3  ;;  %v747_v26 = vadd.s32 56, %v7316_v3 }
  0x6c   : > { %680 = vst.msk [vmem:[#allocation2 + $0x58] sm:$0xff] %vm427_vm0, %v8986_v54  ;;  %681 = vst.msk [vmem:[#allocation2 + $0x60] sm:$0xff] %vm427_vm0, %v8986_v54  ;;  %5897 = vmatprep.subr.bf16.mxu0 %v6710_v55  ;;  %v1468_v63 = vpack.c.bf16 %v1437_v62, %v1436_v61  ;;  %v7313_v1 = vld [vmem:[%s8975_s3] sm:$0xff]   ;;  %v746_v27 = vadd.s32 48, %v7316_v3  ;;  %vm7334_vm1 = vcmp.le.s32.totalorder %v783_v9, 14  ;;  %vm7339_vm2 = vcmp.ge.s32.totalorder %v776_v13, 1 }
  0x6d   : > { %682 = vst.msk [vmem:[#allocation2 + $0x68] sm:$0xff] %vm427_vm0, %v8986_v54  ;;  %683 = vst.msk [vmem:[#allocation2 + $0x70] sm:$0xff] %vm427_vm0, %v8986_v54  ;;  %5978 = vmatpush3.bf16.msra.mxu1 %v6711_v56  ;;  %v7324_v8 = vld [vmem:[%s8974_s2] ss:$0 sm:$0xff]  ;;  %vm7343_vm3 = vcmp.ge.s32.totalorder %v790_v14, 1  ;;  %vm1255_vm4 = vcmp.le.s32.totalorder %v797_v19, 14 }
  0x6e   : > { %684 = vst.msk [vmem:[#allocation2 + $0x78] sm:$0xff] %vm427_vm0, %v8986_v54  ;;  %685 = vst.msk [vmem:[#allocation2 + $0x80] sm:$0xff] %vm427_vm0, %v8986_v54  ;;  %5979 = vmatprep.subr.bf16.mxu1 %v6713_v58  ;;  %v811_v43 = vand.u32 15, %v745_v20  ;;  %v804_v44 = vand.u32 15, %v744_v21  ;;  %v825_v46 = vand.u32 15, %v747_v26  ;;  %v818_v49 = vand.u32 15, %v746_v27 }
  0x6f   : > { %686 = vst.msk [vmem:[#allocation2 + $0x88] sm:$0xff] %vm427_vm0, %v8986_v54  ;;  %687 = vst.msk [vmem:[#allocation2 + $0x90] sm:$0xff] %vm427_vm0, %v8986_v54  ;;  %5898 = vmatpush3.bf16.msra.mxu0 %v6710_v55  ;;  %v748_v50 = vadd.s32 64, %v7316_v3  ;;  %v749_v52 = vadd.s32 72, %v7316_v3  ;;  %v7356_v55 = vsel %vm7334_vm1, 1.0, %v8986_v54  ;;  %v7359_v56 = vsel %vm1255_vm4, 1.0, %v8986_v54 }
  0x70   : > { %688 = vst.msk [vmem:[#allocation2 + $0x98] sm:$0xff] %vm427_vm0, %v8986_v54  ;;  %689 = vst.msk [vmem:[#allocation2 + $0xa0] sm:$0xff] %vm427_vm0, %v8986_v54  ;;  %5899 = vmatprep.subr.bf16.mxu0 %v6712_v57  ;;  %vm1257_vm5 = vcmp.le.s32.totalorder %v811_v43, 14  ;;  %v751_v61 = vadd.s32 88, %v7316_v3  ;;  %vm1160_vm6 = vcmp.ge.s32.totalorder %v804_v44, 1  ;;  %vm7374_vm7 = vcmp.le.s32.totalorder %v825_v46, 14 }
  0x71   : > { %690 = vst.msk [vmem:[#allocation2 + $0xa8] sm:$0xff] %vm427_vm0, %v8986_v54  ;;  %691 = vst.msk [vmem:[#allocation2 + $0xb0] sm:$0xff] %vm427_vm0, %v8986_v54  ;;  %5980 = vmatpush3.bf16.msra.mxu1 %v6713_v58  ;;  %v7369_v58 = vsel %vm7343_vm3, 1.0, %v8986_v54  ;;  %vm7378_vm8 = vcmp.ge.s32.totalorder %v818_v49, 1  ;;  %v832_v6 = vand.u32 15, %v748_v50  ;;  %v839_v13 = vand.u32 15, %v749_v52 }
  0x72   : > { %5868 = vmatmul.mubr.msk.bf16.gmra.mrb[4].mxu0 %vm427_vm0, %v7129_v17  ;;  %692 = vst.msk [vmem:[#allocation2 + $0xb8] sm:$0xff] %vm427_vm0, %v8986_v54  ;;  %693 = vst.msk [vmem:[#allocation2 + $0xc0] sm:$0xff] %vm427_vm0, %v8986_v54  ;;  %5981 = vmatprep.subr.bf16.mxu1 %v6715_v60  ;;  %v750_v14 = vadd.s32 80, %v7316_v3  ;;  %v7386_v19 = vsel %vm1257_vm5, 1.0, %v8986_v54  ;;  %v7389_v20 = vsel %vm1160_vm6, 1.0, %v8986_v54  ;;  %v7395_v26 = vsel %vm7374_vm7, 1.0, %v8986_v54 }
  0x73   : > { %5871 = vmatprep.mubr.msk.bf16.mxu0 %vm427_vm0, %v7131_v18  ;;  %694 = vst.msk [vmem:[#allocation2 + $0xc8] sm:$0xff] %vm427_vm0, %v8986_v54  ;;  %695 = vst.msk [vmem:[#allocation2 + $0xd0] sm:$0xff] %vm427_vm0, %v8986_v54  ;;  %5900 = vmatpush3.bf16.msra.mxu0 %v6712_v57  ;;  %v7364_v57 = vsel %vm7339_vm2, 1.0, %v8986_v54  ;;  %v853_v27 = vand.u32 15, %v751_v61  ;;  %vm7404_vm9 = vcmp.ge.s32.totalorder %v832_v6, 1  ;;  %vm7412_vm10 = vcmp.le.s32.totalorder %v839_v13, 14 }
  0x74   : > { %696 = vst.msk [vmem:[#allocation2 + $0xd8] sm:$0xff] %vm427_vm0, %v8986_v54  ;;  %697 = vst.msk [vmem:[#allocation2 + $0xe0] sm:$0xff] %vm427_vm0, %v8986_v54  ;;  %5901 = vmatprep.subr.bf16.mxu0 %v6714_v59  ;;  %v753_v44 = vadd.s32 104, %v7316_v3  ;;  %v7433_v6 = vsel %vm7404_vm9, 1.0, %v8986_v54  ;;  %v7441_v13 = vsel %vm7412_vm10, 1.0, %v8986_v54  ;;  %v7477_v43 = vadd.s32 112, %v7316_v3 }
  0x75   : > { %698 = vst.msk [vmem:[#allocation2 + $0xe8] sm:$0xff] %vm427_vm0, %v8986_v54  ;;  %699 = vst.msk [vmem:[#allocation2 + $0xf0] sm:$0xff] %vm427_vm0, %v8986_v54  ;;  %5982 = vmatpush3.bf16.msra.mxu1 %v6715_v60  ;;  %vm7426_vm11 = vcmp.le.s32.totalorder %v853_v27, 14 }
  0x76   : > { %700 = vst.msk [vmem:[#allocation2 + $0xf8] sm:$0xff] %vm427_vm0, %v8986_v54  ;;  %701 = vst.msk [vmem:[#allocation2 + $0x100] sm:$0xff] %vm427_vm0, %v8986_v54  ;;  %6015 = vmatprep.subr.bf16.mxu1 %v7307_v0  ;;  %v867_v27 = vand.u32 15, %v753_v44  ;;  %v7480_v44 = vadd.s32 128, %v7316_v3 }
  0x77   : > { %702 = vst.msk [vmem:[#allocation2 + $0x108] sm:$0xff] %vm427_vm0, %v8986_v54  ;;  %703 = vst.msk [vmem:[#allocation2 + $0x110] sm:$0xff] %vm427_vm0, %v8986_v54  ;;  %5902 = vmatpush3.bf16.msra.mxu0 %v6714_v59 }
  0x78   : > { %704 = vst.msk [vmem:[#allocation2 + $0x118] sm:$0xff] %vm427_vm0, %v8986_v54  ;;  %705 = vst.msk [vmem:[#allocation2 + $0x120] sm:$0xff] %vm427_vm0, %v8986_v54  ;;  %5935 = vmatprep.subr.bf16.mxu0 %v7313_v1  ;;  %vm7499_vm13 = vcmp.le.s32.totalorder %v867_v27, 14 }
  0x79   : > { %706 = vst.msk [vmem:[#allocation2 + $0x128] sm:$0xff] %vm427_vm0, %v8986_v54  ;;  %9104 = vst [vmem:[#allocation29_spill] sm:$0xff] %v7316_v3 }
  0x7a   : > { %5872 = vmatmul.mubr.msk.bf16.gmra.mrb[8].mxu0 %vm427_vm0, %v7141_v23  ;;  %9122 = vst [vmem:[#allocation31_spill] sm:$0xff] %v7441_v13 }
  0x7b   : > { %5875 = vmatprep.mubr.msk.bf16.mxu0 %vm427_vm0, %v7143_v24 }
  0x82   : > { %5876 = vmatmul.mubr.msk.bf16.gmra.mrb[12].mxu0 %vm427_vm0, %v7153_v29 }
  0x83   : > { %5879 = vmatprep.mubr.msk.bf16.mxu0 %vm427_vm0, %v7155_v30 }
  0x8a   : > { %5880 = vmatmul.mubr.msk.bf16.gmra.mrb[16].mxu0 %vm427_vm0, %v7165_v35 }
  0x8b   : > { %5883 = vmatprep.mubr.msk.bf16.mxu0 %vm427_vm0, %v7167_v36 }
  0x92   : > { %5884 = vmatmul.mubr.msk.bf16.gmra.mrb[20].mxu0 %vm427_vm0, %v7177_v41 }
  0x93   : > { %5887 = vmatprep.mubr.msk.bf16.mxu0 %vm427_vm0, %v7179_v42 }
  0x9a   : > { %5888 = vmatmul.mubr.msk.bf16.gmra.mrb[24].mxu0 %vm427_vm0, %v7189_v47 }
  0x9b   : > { %5891 = vmatprep.mubr.msk.bf16.mxu0 %vm427_vm0, %v7191_v48 }
  0xa2   : > { %5892 = vmatmul.mubr.msk.bf16.gmra.mrb[28].mxu0 %vm427_vm0, %v7199_v51 }
  0xa3   : > { %5903 = vmatprep.mubr.msk.bf16.mxu0 %vm427_vm0, %v1468_v63 }
 0x13d   : > { %v5865_v10 = vpop.f32.mrb[0].mxu0 }
 0x13e   : > { %v519_v15 = vadd.f32 %v5865_v10, %v7324_v8  ;;  %v510_v16 = vpop.f32.mrb[1].mxu0 }
 0x13f   : > { %v511_v22 = vadd.f32 %v7324_v8, %v510_v16  ;;  %v5866_v25 = vpop.f32.mrb[2].mxu0 }
 0x140   : > { %v639_v28 = vmax.f32 %v519_v15, 0.0  ;;  %v522_v31 = vadd.f32 %v5866_v25, %v7324_v8  ;;  %v513_v32 = vpop.f32.mrb[3].mxu0 }
 0x141   : > { %v637_v34 = vmax.f32 %v511_v22, 0.0  ;;  %v514_v37 = vadd.f32 %v7324_v8, %v513_v32  ;;  %v1959_v22 = vld [vmem:[#allocation2 + $0x9] sm:$0xff] }
 0x142   : > { %709 = vst.msk [vmem:[#allocation2 + $0x28] sm:$0xff] %vm427_vm0, %v639_v28  ;;  %v640_v40 = vmax.f32 %v522_v31, 0.0  ;;  %v7400_v28 = vsel %vm7378_vm8, 1.0, %v8986_v54 }
 0x143   : > { %707 = vst.msk [vmem:[#allocation2 + $0x18] sm:$0xff] %vm427_vm0, %v637_v34  ;;  %v638_v45 = vmax.f32 %v514_v37, 0.0  ;;  %v7409_v37 = vadd.s32 96, %v7316_v3  ;;  %v7460_v34 = vsel %vm7426_vm11, 1.0, %v8986_v54 }
 0x144   : > { %710 = vst.msk [vmem:[#allocation2 + $0x30] sm:$0xff] %vm427_vm0, %v640_v40  ;;  %9123 = vst [vmem:[#allocation32_spill] sm:$0xff] %v7460_v34 }
 0x145   : > { %708 = vst.msk [vmem:[#allocation2 + $0x20] sm:$0xff] %vm427_vm0, %v638_v45  ;;  %v5869_v53 = vpop.f32.mrb[4].mxu0  ;;  %v846_v45 = vand.u32 15, %v750_v14  ;;  %v6717_v14 = vld [vmem:[%s8975_s3 + $0x68] sm:$0xff]  }
 0x146   : > { %v535_v59 = vadd.f32 %v5869_v53, %v7324_v8  ;;  %v526_v60 = vpop.f32.mrb[5].mxu0 }
 0x147   : > { %v527_v62 = vadd.f32 %v7324_v8, %v526_v60  ;;  %v5870_v63 = vpop.f32.mrb[6].mxu0  ;;  %v6721_v60 = vld [vmem:[%s8975_s3 + $0x8] sm:$0xff]   ;;  %vm7465_vm12 = vcmp.ge.s32.totalorder %v846_v45, 1 }
 0x148   : > { %v643_v7 = vmax.f32 %v535_v59, 0.0  ;;  %v538_v9 = vadd.f32 %v5870_v63, %v7324_v8  ;;  %v529_v10 = vpop.f32.mrb[7].mxu0 }
 0x149   : > { %v641_v15 = vmax.f32 %v527_v62, 0.0  ;;  %v530_v16 = vadd.f32 %v7324_v8, %v529_v10  ;;  %v1440_v53 = vld [vmem:[#allocation2 + $0x28] sm:$0xff] }
 0x14a   : > { %713 = vst.msk [vmem:[#allocation2 + $0x48] sm:$0xff] %vm427_vm0, %v643_v7  ;;  %v644_v21 = vmax.f32 %v538_v9, 0.0  ;;  %v1960_v25 = vld [vmem:[#allocation2 + $0x11] sm:$0xff] }
 0x14b   : > { %711 = vst.msk [vmem:[#allocation2 + $0x38] sm:$0xff] %vm427_vm0, %v641_v15  ;;  %v642_v31 = vmax.f32 %v530_v16, 0.0  ;;  %v1992_v32 = vmul.f32 %v7356_v55, %v1960_v25  ;;  %v1441_v33 = vld [vmem:[#allocation2 + $0x30] sm:$0xff]  ;;  %v1438_v38 = vld [vmem:[#allocation2 + $0x18] sm:$0xff]  ;;  %v860_v16 = vand.u32 15, %v7409_v37 }
 0x14c   : > { %714 = vst.msk [vmem:[#allocation2 + $0x50] sm:$0xff] %vm427_vm0, %v644_v21  ;;  %v1439_v39 = vld [vmem:[#allocation2 + $0x20] sm:$0xff]  ;;  %v1470_v63 = vpack.c.bf16 %v1441_v33, %v1440_v53  ;;  %v6722_v37 = vld [vmem:[%s8975_s3 + $0x10] sm:$0xff]  }
 0x14d   : > { %v2990_v40 = vld [vmem:[#allocation2 + $0x21] sm:$0xff]  ;;  %712 = vst.msk [vmem:[#allocation2 + $0x40] sm:$0xff] %vm427_vm0, %v642_v31  ;;  %v5873_v46 = vpop.f32.mrb[8].mxu0  ;;  %v1469_v49 = vpack.c.bf16 %v1439_v39, %v1438_v38  ;;  %v2023_v50 = vpack.c.bf16 %v1992_v32, %v1959_v22  ;;  %v1961_v2 = vld [vmem:[#allocation2 + $0x19] sm:$0xff]  ;;  %v7452_v31 = vadd.s32 120, %v7316_v3  ;;  %vm7504_vm14 = vcmp.ge.s32.totalorder %v860_v16, 1 }
 0x14e   : > { %v7419_v52 = vmul.f32 %v7356_v55, %v2990_v40  ;;  %v1994_v59 = vmul.f32 %v7359_v56, %v2990_v40  ;;  %v551_v61 = vadd.f32 %v5873_v46, %v7324_v8  ;;  %v542_v62 = vpop.f32.mrb[9].mxu0  ;;  %v7446_v15 = vld [vmem:[#allocation2 + $0x27] sm:$0xff]  ;;  %v7474_v40 = vld [vmem:[%s8975_s3 + $0x70] sm:$0xff]  }
 0x14f   : > { %v543_v7 = vadd.f32 %v7324_v8, %v542_v62  ;;  %v5874_v9 = vpop.f32.mrb[10].mxu0  ;;  %5904 = vmatmul.mubr.msk.bf16.vlgmr.msra.gmra.mrb[32].mxu0 %vm427_vm0, %v1469_v49  ;;  %5983 = vmatprep.mubr.msk.bf16.mxu1 %vm427_vm0, %v2023_v50  ;;  %v7484_v45 = vmul.f32 %v7364_v57, %v7446_v15  ;;  %v7490_v49 = vld [vmem:[#allocation2 + $0x29] sm:$0xff]  ;;  %v881_v4 = vand.u32 15, %v7452_v31 }
 0x150   : > { %9119 = vst [vmem:[#allocation30_spill] sm:$0xff] %v7419_v52  ;;  %v2024_v10 = vpack.c.bf16 %v1994_v59, %v1961_v2  ;;  %v647_v21 = vmax.f32 %v551_v61, 0.0  ;;  %v554_v22 = vadd.f32 %v5874_v9, %v7324_v8  ;;  %v545_v25 = vpop.f32.mrb[11].mxu0  ;;  %5907 = vmatprep.mubr.msk.bf16.mxu0 %vm427_vm0, %v1470_v63  ;;  %5936 = vmatpush3.bf16.msra.mxu0 %v7313_v1  ;;  %9128 = vst [vmem:[#allocation35_spill] sm:$0xff] %v7490_v49  ;;  %v7496_v61 = vld [vmem:[#allocation2 + $0x2f] sm:$0xff] }
 0x151   : > { %v645_v32 = vmax.f32 %v543_v7, 0.0  ;;  %v546_v33 = vadd.f32 %v7324_v8, %v545_v25  ;;  %5937 = vmatprep.subr.bf16.mxu0 %v6721_v60  ;;  %9126 = vst [vmem:[#allocation33_spill] sm:$0xff] %v7484_v45  ;;  %vm7566_vm15 = vcmp.le.s32.totalorder %v881_v4, 14 }
 0x152   : > { %5984 = vmatmul.mubr.msk.bf16.vlgmr.msra.gmra.mrb[0].mxu1 %vm427_vm0, %v2024_v10  ;;  %717 = vst.msk [vmem:[#allocation2 + $0x68] sm:$0xff] %vm427_vm0, %v647_v21  ;;  %v648_v1 = vmax.f32 %v554_v22, 0.0  ;;  %v4020_v39 = vld [vmem:[#allocation2 + $0x31] sm:$0xff] }
 0x153   : > { %6016 = vmatpush3.bf16.msra.mxu1 %v7307_v0  ;;  %715 = vst.msk [vmem:[#allocation2 + $0x58] sm:$0xff] %vm427_vm0, %v645_v32  ;;  %v7488_v46 = vmul.f32 %v7356_v55, %v4020_v39  ;;  %v646_v0 = vmax.f32 %v546_v33, 0.0  ;;  %v7493_v50 = vmul.f32 %v7359_v56, %v4020_v39  ;;  %v1996_v53 = vmul.f32 %v7386_v19, %v4020_v39  ;;  %v1445_v59 = vld [vmem:[#allocation2 + $0x50] sm:$0xff]  ;;  %v1442_v63 = vld [vmem:[#allocation2 + $0x38] sm:$0xff] }
 0x154   : > { %6017 = vmatprep.subr.bf16.mxu1 %v6717_v14  ;;  %718 = vst.msk [vmem:[#allocation2 + $0x70] sm:$0xff] %vm427_vm0, %v648_v1  ;;  %v4022_v62 = vld [vmem:[#allocation2 + $0x41] sm:$0xff]  ;;  %5938 = vmatpush3.bf16.msra.mxu0 %v6721_v60  ;;  %v7517_v16 = vld [vmem:[#allocation2 + $0x39] sm:$0xff]  ;;  %v874_v39 = vand.u32 15, %v7477_v43 }
 0x155   : > { %9127 = vst [vmem:[#allocation34_spill] sm:$0xff] %v7488_v46  ;;  %9129 = vst [vmem:[#allocation36_spill] sm:$0xff] %v7493_v50  ;;  %v1443_v2 = vld [vmem:[#allocation2 + $0x40] sm:$0xff]  ;;  %v7514_v21 = vmul.f32 %v7359_v56, %v4022_v62  ;;  %v5877_v22 = vpop.f32.mrb[12].mxu0  ;;  %v2025_v27 = vpack.c.bf16 %v1996_v53, %v7490_v49  ;;  %v1444_v60 = vld [vmem:[#allocation2 + $0x48] sm:$0xff]  ;;  %5939 = vmatprep.subr.bf16.mxu0 %v6722_v37  ;;  %v1998_v1 = vmul.f32 %v7395_v26, %v4022_v62 }
 0x156   : > { %716 = vst.msk [vmem:[#allocation2 + $0x60] sm:$0xff] %vm427_vm0, %v646_v0  ;;  %v1471_v25 = vpack.c.bf16 %v1443_v2, %v1442_v63  ;;  %9135 = vst [vmem:[#allocation38_spill] sm:$0xff] %v7517_v16  ;;  %v567_v31 = vadd.f32 %v5877_v22, %v7324_v8  ;;  %v558_v32 = vpop.f32.mrb[13].mxu0  ;;  %v1472_v33 = vpack.c.bf16 %v1445_v59, %v1444_v60  ;;  %v6723_v56 = vld [vmem:[%s8975_s3 + $0x18] sm:$0xff]   ;;  %v7531_v59 = vadd.s32 136, %v7316_v3 }
 0x157   : > { %9134 = vst [vmem:[#allocation37_spill] sm:$0xff] %v7514_v21  ;;  %6018 = vmatpush3.bf16.msra.mxu1 %v6717_v14  ;;  %v559_v53 = vadd.f32 %v7324_v8, %v558_v32  ;;  %v5878_v63 = vpop.f32.mrb[14].mxu0  ;;  %5987 = vmatprep.mubr.msk.bf16.mxu1 %vm427_vm0, %v2025_v27  ;;  %v888_v14 = vand.u32 15, %v7480_v44  ;;  %v2026_v43 = vpack.c.bf16 %v1998_v1, %v7517_v16  ;;  %v7539_v60 = vadd.s32 152, %v7316_v3  ;;  %v7547_v32 = vld [vmem:[#allocation2 + $0x47] sm:$0xff]  ;;  %v7621_v41 = vld [vmem:[#allocation2 + $0x3f] sm:$0xff] }
 0x158   : > { %5908 = vmatmul.mubr.msk.bf16.gmra.mrb[36].mxu0 %vm427_vm0, %v1471_v25  ;;  %v651_v62 = vmax.f32 %v567_v31, 0.0  ;;  %v570_v2 = vadd.f32 %v5878_v63, %v7324_v8  ;;  %v561_v22 = vpop.f32.mrb[15].mxu0  ;;  %6019 = vmatprep.subr.bf16.mxu1 %v7474_v40  ;;  %v6720_v25 = vld [vmem:[%s8975_s3 + $0x78] sm:$0xff]   ;;  %v7557_v1 = vsel %vm7504_vm14, 1.0, %v8986_v54  ;;  %v7564_v63 = vsel %vm7499_vm13, 1.0, %v8986_v54 }
 0x159   : > { %5911 = vmatprep.mubr.msk.bf16.mxu0 %vm427_vm0, %v1472_v33  ;;  %v649_v27 = vmax.f32 %v559_v53, 0.0  ;;  %v562_v44 = vadd.f32 %v7324_v8, %v561_v22  ;;  %5940 = vmatpush3.bf16.msra.mxu0 %v6722_v37  ;;  %v7545_v31 = vld [vmem:[#allocation2 + $0x37] sm:$0xff]  ;;  %v7552_v33 = vsel %vm7465_vm12, 1.0, %v8986_v54  ;;  %9136 = vst [vmem:[#allocation39_spill] sm:$0xff] %v7564_v63  ;;  %vm7572_vm1 = vcmp.ge.s32.totalorder %v874_v39, 1  ;;  %v1448_v51 = vld [vmem:[#allocation2 + $0x68] sm:$0xff] }
 0x15a   : > { %721 = vst.msk [vmem:[#allocation2 + $0x88] sm:$0xff] %vm427_vm0, %v651_v62  ;;  %v652_v53 = vmax.f32 %v570_v2, 0.0  ;;  %5988 = vmatmul.mubr.msk.bf16.gmra.mrb[4].mxu1 %vm427_vm0, %v2026_v43  ;;  %v1968_v37 = vld [vmem:[#allocation2 + $0x51] sm:$0xff]  ;;  %5941 = vmatprep.subr.bf16.mxu0 %v6723_v56  ;;  %v1967_v2 = vld [vmem:[#allocation2 + $0x49] sm:$0xff]  ;;  %vm7579_vm2 = vcmp.ge.s32.totalorder %v888_v14, 1  ;;  %v758_v0 = vadd.s32 144, %v7316_v3 }
 0x15b   : > { %v7570_v22 = vld [vmem:[#allocation2 + $0x57] sm:$0xff]  ;;  %719 = vst.msk [vmem:[#allocation2 + $0x78] sm:$0xff] %vm427_vm0, %v649_v27  ;;  %v650_v62 = vmax.f32 %v562_v44, 0.0  ;;  %v2000_v43 = vmul.f32 %v7441_v13, %v1968_v37  ;;  %6020 = vmatpush3.bf16.msra.mxu1 %v7474_v40  ;;  %v895_v27 = vand.u32 15, %v7531_v59  ;;  %v909_v44 = vand.u32 15, %v7539_v60  ;;  %v7602_v60 = vld [vmem:[%s8975_s3 + $0x80] sm:$0xff]  }
 0x15c   : > { %v1449_v55 = vld [vmem:[#allocation2 + $0x70] sm:$0xff]  ;;  %722 = vst.msk [vmem:[#allocation2 + $0x90] sm:$0xff] %vm427_vm0, %v652_v53  ;;  %v1446_v39 = vld [vmem:[#allocation2 + $0x58] sm:$0xff]  ;;  %6021 = vmatprep.subr.bf16.mxu1 %v6720_v25  ;;  %v7589_v37 = vmul.f32 %v7369_v58, %v7545_v31  ;;  %v7593_v40 = vmul.f32 %v7389_v20, %v7547_v32  ;;  %v7606_v48 = vmul.f32 %v7400_v28, %v7570_v22  ;;  %v902_v38 = vand.u32 15, %v758_v0 }
 0x15d   : > { %v1447_v9 = vld [vmem:[#allocation2 + $0x60] sm:$0xff]  ;;  %720 = vst.msk [vmem:[#allocation2 + $0x80] sm:$0xff] %vm427_vm0, %v650_v62  ;;  %v5881_v14 = vpop.f32.mrb[16].mxu0  ;;  %v2027_v54 = vpack.c.bf16 %v2000_v43, %v1967_v2  ;;  %5942 = vmatpush3.bf16.msra.mxu0 %v6723_v56  ;;  %v7609_v42 = vpack.c.bf16 %v1449_v55, %v1448_v51  ;;  %v9148_v2 = vmov 0.0   ;;  %v760_v56 = vadd.s32 160, %v7316_v3  ;;  %v1971_v24 = vld [vmem:[#allocation2 + $0x69] sm:$0xff] }
 0x15e   : > { %v1970_v10 = vld [vmem:[#allocation2 + $0x61] sm:$0xff]  ;;  %9143 = vst [vmem:[#allocation40_spill] sm:$0xff] %v7589_v37  ;;  %9144 = vst [vmem:[#allocation41_spill] sm:$0xff] %v7593_v40  ;;  %v7596_v53 = vpack.c.bf16 %v1447_v9, %v1446_v39  ;;  %v583_v47 = vadd.f32 %v5881_v14, %v7324_v8  ;;  %v574_v62 = vpop.f32.mrb[17].mxu0  ;;  %v1969_v9 = vld [vmem:[#allocation2 + $0x59] sm:$0xff]  ;;  %v7626_v51 = vsel %vm7572_vm1, 1.0, %v9148_v2 }
 0x15f   : > { %v2002_v59 = vmul.f32 %v7460_v34, %v1970_v10  ;;  %9146 = vst [vmem:[#allocation43_spill] sm:$0xff] %v7606_v48  ;;  %9147 = vst [vmem:[#allocation44_spill] sm:$0xff] %v7609_v42  ;;  %v7614_v10 = vsel %vm7566_vm15, 1.0, %v9148_v2  ;;  %v575_v43 = vadd.f32 %v7324_v8, %v574_v62  ;;  %v5882_v39 = vpop.f32.mrb[18].mxu0  ;;  %5991 = vmatprep.mubr.msk.bf16.mxu1 %vm427_vm0, %v2027_v54  ;;  %v7632_v62 = vadd.s32 168, %v7316_v3  ;;  %v7653_v4 = vld [vmem:[#allocation2 + $0x67] sm:$0xff] }
 0x160   : > { %9145 = vst [vmem:[#allocation42_spill] sm:$0xff] %v7596_v53  ;;  %9149 = vst [vmem:[#allocation45_spill] sm:$0xff] %v7614_v10  ;;  %5912 = vmatmul.mubr.msk.bf16.gmra.mrb[40].mxu0 %vm427_vm0, %v7596_v53  ;;  %v655_v55 = vmax.f32 %v583_v47, 0.0  ;;  %v586_v36 = vadd.f32 %v5882_v39, %v7324_v8  ;;  %v577_v35 = vpop.f32.mrb[19].mxu0  ;;  %6022 = vmatpush3.bf16.msra.mxu1 %v6720_v25  ;;  %v7637_v54 = vsel %vm7579_vm2, 1.0, %v9148_v2  ;;  %vm7640_vm3 = vcmp.le.s32.totalorder %v895_v27, 14 }
 0x161   : > { %v2028_v14 = vpack.c.bf16 %v2002_v59, %v1969_v9  ;;  %5915 = vmatprep.mubr.msk.bf16.mxu0 %vm427_vm0, %v7609_v42  ;;  %v653_v7 = vmax.f32 %v575_v43, 0.0  ;;  %v578_v59 = vadd.f32 %v7324_v8, %v577_v35  ;;  %vm7644_vm4 = vcmp.le.s32.totalorder %v909_v44, 14  ;;  %6055 = vmatprep.subr.bf16.mxu1 %v7602_v60  ;;  %v7649_v9 = vld [vmem:[#allocation2 + $0x4f] sm:$0xff]  ;;  %v7651_v25 = vld [vmem:[#allocation2 + $0x5f] sm:$0xff] }
 0x162   : > { %725 = vst.msk [vmem:[#allocation2 + $0xa8] sm:$0xff] %vm427_vm0, %v655_v55  ;;  %v656_v43 = vmax.f32 %v586_v36, 0.0  ;;  %v1972_v35 = vld [vmem:[#allocation2 + $0x71] sm:$0xff]  ;;  %v916_v44 = vand.u32 15, %v760_v56  ;;  %v763_v36 = vadd.s32 184, %v7316_v3  ;;  %vm7666_vm5 = vcmp.ge.s32.totalorder %v902_v38, 1 }
 0x163   : > { %5992 = vmatmul.mubr.msk.bf16.gmra.mrb[8].mxu1 %vm427_vm0, %v2028_v14  ;;  %v7657_v27 = vld [vmem:[#allocation2 + $0x77] sm:$0xff]  ;;  %723 = vst.msk [vmem:[#allocation2 + $0x98] sm:$0xff] %vm427_vm0, %v653_v7  ;;  %v654_v29 = vmax.f32 %v578_v59, 0.0  ;;  %v2004_v23 = vmul.f32 %v7564_v63, %v1972_v35  ;;  %v923_v30 = vand.u32 15, %v7632_v62  ;;  %v762_v7 = vadd.s32 176, %v7316_v3  ;;  %v1452_v12 = vld [vmem:[#allocation2 + $0x88] sm:$0xff] }
 0x164   : > { %v1453_v55 = vld [vmem:[#allocation2 + $0x90] sm:$0xff]  ;;  %726 = vst.msk [vmem:[#allocation2 + $0xb0] sm:$0xff] %vm427_vm0, %v656_v43  ;;  %v1450_v56 = vld [vmem:[#allocation2 + $0x78] sm:$0xff]  ;;  %v1451_v39 = vld [vmem:[#allocation2 + $0x80] sm:$0xff]  ;;  %v7677_v35 = vmul.f32 %v7433_v6, %v7653_v4  ;;  %v7685_v62 = vmul.f32 %v7552_v33, %v7657_v27  ;;  %vm7695_vm6 = vcmp.ge.s32.totalorder %v916_v44, 1  ;;  %v937_v47 = vand.u32 15, %v763_v36 }
 0x165   : > { %v1974_v18 = vld [vmem:[#allocation2 + $0x81] sm:$0xff]  ;;  %724 = vst.msk [vmem:[#allocation2 + $0xa0] sm:$0xff] %vm427_vm0, %v654_v29  ;;  %v5885_v38 = vpop.f32.mrb[20].mxu0  ;;  %v7680_v17 = vpack.c.bf16 %v1451_v39, %v1450_v56  ;;  %v2029_v43 = vpack.c.bf16 %v2004_v23, %v1971_v24  ;;  %v7688_v16 = vpack.c.bf16 %v1453_v55, %v1452_v12  ;;  %v1973_v21 = vld [vmem:[#allocation2 + $0x79] sm:$0xff]  ;;  %v7693_v29 = vsel %vm7640_vm3, 1.0, %v9148_v2  ;;  %v7742_v46 = vld [vmem:[#allocation2 + $0x89] sm:$0xff] }
 0x166   : > { %9156 = vst [vmem:[#allocation46_spill] sm:$0xff] %v7677_v35  ;;  %v2006_v11 = vmul.f32 %v7614_v10, %v1974_v18  ;;  %9158 = vst [vmem:[#allocation48_spill] sm:$0xff] %v7685_v62  ;;  %v599_v5 = vadd.f32 %v5885_v38, %v7324_v8  ;;  %v590_v59 = vpop.f32.mrb[21].mxu0  ;;  %v7706_v39 = vsel %vm7644_vm4, 1.0, %v9148_v2  ;;  %v7708_v55 = vld [vmem:[#allocation2 + $0x7f] sm:$0xff]  ;;  %vm7719_vm7 = vcmp.le.s32.totalorder %v923_v30, 14 }
 0x167   : > { %9157 = vst [vmem:[#allocation47_spill] sm:$0xff] %v7680_v17  ;;  %9159 = vst [vmem:[#allocation49_spill] sm:$0xff] %v7688_v16  ;;  %v591_v18 = vadd.f32 %v7324_v8, %v590_v59  ;;  %v5886_v24 = vpop.f32.mrb[22].mxu0  ;;  %5995 = vmatprep.mubr.msk.bf16.mxu1 %vm427_vm0, %v2029_v43  ;;  %v7716_v59 = vsel %vm7666_vm5, 1.0, %v9148_v2  ;;  %v7725_v43 = vld [vmem:[#allocation2 + $0x87] sm:$0xff]  ;;  %v7735_v30 = vadd.s32 192, %v7316_v3 }
 0x168   : > { %9160 = vst [vmem:[#allocation50_spill] sm:$0xff] %v7693_v29  ;;  %5916 = vmatmul.mubr.msk.bf16.gmra.mrb[44].mxu0 %vm427_vm0, %v7680_v17  ;;  %v2030_v12 = vpack.c.bf16 %v2006_v11, %v1973_v21  ;;  %9163 = vst [vmem:[#allocation51_spill] sm:$0xff] %v7706_v39  ;;  %v659_v44 = vmax.f32 %v599_v5, 0.0  ;;  %v602_v56 = vadd.f32 %v5886_v24, %v7324_v8  ;;  %v593_v38 = vpop.f32.mrb[23].mxu0  ;;  %v930_v11 = vand.u32 15, %v762_v7  ;;  %v7723_v5 = vld [vmem:[#allocation2 + $0x6f] sm:$0xff] }
 0x169   : > { %5919 = vmatprep.mubr.msk.bf16.mxu0 %vm427_vm0, %v7688_v16  ;;  %v657_v21 = vmax.f32 %v591_v18, 0.0  ;;  %v594_v0 = vadd.f32 %v7324_v8, %v593_v38  ;;  %v7730_v24 = vsel %vm7695_vm6, 1.0, %v9148_v2  ;;  %9166 = vst [vmem:[#allocation52_spill] sm:$0xff] %v7742_v46  ;;  %vm7745_vm8 = vcmp.le.s32.totalorder %v937_v47, 14  ;;  %v1456_v37 = vld [vmem:[#allocation2 + $0xa8] sm:$0xff] }
 0x16a   : > { %729 = vst.msk [vmem:[#allocation2 + $0xc8] sm:$0xff] %vm427_vm0, %v659_v44  ;;  %v660_v14 = vmax.f32 %v602_v56, 0.0  ;;  %v1976_v7 = vld [vmem:[#allocation2 + $0x91] sm:$0xff]  ;;  %v765_v48 = vadd.s32 200, %v7316_v3  ;;  %vm7756_vm9 = vcmp.ge.s32.totalorder %v930_v11, 1  ;;  %v7765_v38 = vmul.f32 %v7557_v1, %v7725_v43 }
 0x16b   : > { %5996 = vmatmul.mubr.msk.bf16.gmra.mrb[12].mxu1 %vm427_vm0, %v2030_v12  ;;  %727 = vst.msk [vmem:[#allocation2 + $0xb8] sm:$0xff] %vm427_vm0, %v657_v21  ;;  %v658_v23 = vmax.f32 %v594_v0, 0.0  ;;  %v2008_v44 = vmul.f32 %v7693_v29, %v1976_v7  ;;  %v1457_v56 = vld [vmem:[#allocation2 + $0xb0] sm:$0xff]  ;;  %v1454_v18 = vld [vmem:[#allocation2 + $0x98] sm:$0xff]  ;;  %v7754_v21 = vsel %vm7719_vm7, 1.0, %v9148_v2  ;;  %v7761_v47 = vmul.f32 %v7614_v10, %v1976_v7 }
 0x16c   : > { %730 = vst.msk [vmem:[#allocation2 + $0xd0] sm:$0xff] %vm427_vm0, %v660_v14  ;;  %v1455_v35 = vld [vmem:[#allocation2 + $0xa0] sm:$0xff]  ;;  %9169 = vst [vmem:[#allocation53_spill] sm:$0xff] %v7754_v21  ;;  %v7776_v63 = vpack.c.bf16 %v1457_v56, %v1456_v37  ;;  %v767_v56 = vadd.s32 216, %v7316_v3  ;;  %v7807_v52 = vld [vmem:[#allocation2 + $0x8f] sm:$0xff] }
 0x16d   : > { %v1978_v40 = vld [vmem:[#allocation2 + $0xa1] sm:$0xff]  ;;  %9172 = vst [vmem:[#allocation54_spill] sm:$0xff] %v7761_v47  ;;  %9173 = vst [vmem:[#allocation55_spill] sm:$0xff] %v7765_v38  ;;  %v5889_v14 = vpop.f32.mrb[24].mxu0  ;;  %v7768_v62 = vpack.c.bf16 %v1455_v35, %v1454_v18  ;;  %v2031_v36 = vpack.c.bf16 %v2008_v44, %v7742_v46  ;;  %v7778_v49 = vld [vmem:[#allocation2 + $0x99] sm:$0xff]  ;;  %v7783_v35 = vsel %vm7745_vm8, 1.0, %v9148_v2 }
 0x16e   : > { %728 = vst.msk [vmem:[#allocation2 + $0xc0] sm:$0xff] %vm427_vm0, %v658_v23  ;;  %v2010_v11 = vmul.f32 %v7706_v39, %v1978_v40  ;;  %v7773_v45 = vmul.f32 %v7693_v29, %v1978_v40  ;;  %v615_v7 = vadd.f32 %v5889_v14, %v7324_v8  ;;  %v606_v10 = vpop.f32.mrb[25].mxu0  ;;  %9176 = vst [vmem:[#allocation58_spill] sm:$0xff] %v7776_v63  ;;  %v951_v40 = vand.u32 15, %v765_v48  ;;  %v7792_v14 = vld [vmem:[#allocation2 + $0x97] sm:$0xff]  ;;  %v7794_v12 = vld [vmem:[#allocation2 + $0xa7] sm:$0xff] }
 0x16f   : > { %9174 = vst [vmem:[#allocation56_spill] sm:$0xff] %v7768_v62  ;;  %9177 = vst [vmem:[#allocation59_spill] sm:$0xff] %v7778_v49  ;;  %v607_v23 = vadd.f32 %v7324_v8, %v606_v10  ;;  %v5890_v44 = vpop.f32.mrb[26].mxu0  ;;  %5999 = vmatprep.mubr.msk.bf16.mxu1 %vm427_vm0, %v2031_v36  ;;  %v7802_v10 = vsel %vm7756_vm9, 1.0, %v9148_v2  ;;  %v7826_v48 = vmul.f32 %v7637_v54, %v7794_v12  ;;  %v7836_v38 = vld [vmem:[#allocation2 + $0xaf] sm:$0xff] }
 0x170   : > { %9175 = vst [vmem:[#allocation57_spill] sm:$0xff] %v7773_v45  ;;  %9178 = vst [vmem:[#allocation60_spill] sm:$0xff] %v7783_v35  ;;  %5920 = vmatmul.mubr.msk.bf16.gmra.mrb[48].mxu0 %vm427_vm0, %v7768_v62  ;;  %v2032_v37 = vpack.c.bf16 %v2010_v11, %v7778_v49  ;;  %v663_v29 = vmax.f32 %v615_v7, 0.0  ;;  %v618_v18 = vadd.f32 %v5890_v44, %v7324_v8  ;;  %v609_v50 = vpop.f32.mrb[27].mxu0  ;;  %v7809_v7 = vld [vmem:[#allocation2 + $0x9f] sm:$0xff]  ;;  %v7812_v44 = vadd.s32 208, %v7316_v3 }
 0x171   : > { %9179 = vst [vmem:[#allocation61_spill] sm:$0xff] %v7794_v12  ;;  %5923 = vmatprep.mubr.msk.bf16.mxu0 %vm427_vm0, %v7776_v63  ;;  %v661_v36 = vmax.f32 %v607_v23, 0.0  ;;  %v610_v11 = vadd.f32 %v7324_v8, %v609_v50  ;;  %v7822_v50 = vmul.f32 %v7626_v51, %v7792_v14  ;;  %9181 = vst [vmem:[#allocation63_spill] sm:$0xff] %v7826_v48  ;;  %v7829_v49 = vld [vmem:[#allocation2 + $0xa9] sm:$0xff]  ;;  %vm7832_vm10 = vcmp.le.s32.totalorder %v951_v40, 14 }
 0x172   : > { %733 = vst.msk [vmem:[#allocation2 + $0xe8] sm:$0xff] %vm427_vm0, %v663_v29  ;;  %v664_v0 = vmax.f32 %v618_v18, 0.0  ;;  %v1980_v62 = vld [vmem:[#allocation2 + $0xb1] sm:$0xff]  ;;  %9182 = vst [vmem:[#allocation64_spill] sm:$0xff] %v7829_v49  ;;  %v965_v23 = vand.u32 15, %v767_v56  ;;  %v1460_v42 = vld [vmem:[#allocation2 + $0xc8] sm:$0xff] }
 0x173   : > { %6000 = vmatmul.mubr.msk.bf16.gmra.mrb[16].mxu1 %vm427_vm0, %v2032_v37  ;;  %9180 = vst [vmem:[#allocation62_spill] sm:$0xff] %v7822_v50  ;;  %731 = vst.msk [vmem:[#allocation2 + $0xd8] sm:$0xff] %vm427_vm0, %v661_v36  ;;  %v662_v63 = vmax.f32 %v610_v11, 0.0  ;;  %v2012_v29 = vmul.f32 %v7754_v21, %v1980_v62  ;;  %v1461_v18 = vld [vmem:[#allocation2 + $0xd0] sm:$0xff]  ;;  %v1458_v45 = vld [vmem:[#allocation2 + $0xb8] sm:$0xff]  ;;  %v769_v36 = vadd.s32 232, %v7316_v3  ;;  %v7841_v11 = vmul.f32 %v7706_v39, %v1980_v62 }
 0x174   : > { %9185 = vst [vmem:[#allocation65_spill] sm:$0xff] %v7836_v38  ;;  %734 = vst.msk [vmem:[#allocation2 + $0xf0] sm:$0xff] %vm427_vm0, %v664_v0  ;;  %v7856_v16 = vpack.c.bf16 %v1461_v18, %v1460_v42  ;;  %vm7871_vm11 = vcmp.le.s32.totalorder %v965_v23, 14  ;;  %v771_v18 = vadd.s32 248, %v7316_v3  ;;  %v7876_v37 = vld [vmem:[#allocation2 + $0xb7] sm:$0xff] }
 0x175   : > { %v1459_v46 = vld [vmem:[#allocation2 + $0xc0] sm:$0xff]  ;;  %9186 = vst [vmem:[#allocation66_spill] sm:$0xff] %v7841_v11  ;;  %732 = vst.msk [vmem:[#allocation2 + $0xe0] sm:$0xff] %vm427_vm0, %v662_v63  ;;  %v5893_v56 = vpop.f32.mrb[28].mxu0  ;;  %v2033_v0 = vpack.c.bf16 %v2012_v29, %v7829_v49  ;;  %v7918_v49 = vld [vmem:[#allocation2 + $0xcf] sm:$0xff] }
 0x176   : > { %v1982_v47 = vld [vmem:[#allocation2 + $0xc1] sm:$0xff]  ;;  %v7848_v17 = vpack.c.bf16 %v1459_v46, %v1458_v45  ;;  %v631_v62 = vadd.f32 %v5893_v56, %v7324_v8  ;;  %v622_v39 = vpop.f32.mrb[29].mxu0  ;;  %9189 = vst [vmem:[#allocation69_spill] sm:$0xff] %v7856_v16  ;;  %v7858_v50 = vld [vmem:[#allocation2 + $0xb9] sm:$0xff]  ;;  %v7863_v45 = vsel %vm7832_vm10, 1.0, %v9148_v2  ;;  %v958_v46 = vand.u32 15, %v7812_v44 }
 0x177   : > { %v2014_v53 = vmul.f32 %v7783_v35, %v1982_v47  ;;  %v7853_v12 = vmul.f32 %v7754_v21, %v1982_v47  ;;  %9190 = vst [vmem:[#allocation70_spill] sm:$0xff] %v7858_v50  ;;  %9191 = vst [vmem:[#allocation71_spill] sm:$0xff] %v7863_v45  ;;  %v623_v63 = vadd.f32 %v7324_v8, %v622_v39  ;;  %v5894_v29 = vpop.f32.mrb[30].mxu0  ;;  %6003 = vmatprep.mubr.msk.bf16.mxu1 %vm427_vm0, %v2033_v0  ;;  %v7878_v56 = vld [vmem:[#allocation2 + $0xc7] sm:$0xff]  ;;  %v7886_v48 = vld [vmem:[#allocation2 + $0xbf] sm:$0xff] }
 0x178   : > { %9187 = vst [vmem:[#allocation67_spill] sm:$0xff] %v7848_v17  ;;  %5924 = vmatmul.mubr.msk.bf16.gmra.mrb[52].mxu0 %vm427_vm0, %v7848_v17  ;;  %9194 = vst [vmem:[#allocation72_spill] sm:$0xff] %v7876_v37  ;;  %v667_v44 = vmax.f32 %v631_v62, 0.0  ;;  %v634_v39 = vadd.f32 %v5894_v29, %v7324_v8  ;;  %v625_v40 = vpop.f32.mrb[31].mxu0  ;;  %v979_v0 = vand.u32 15, %v769_v36  ;;  %v7889_v17 = vadd.s32 224, %v7316_v3 }
 0x179   : > { %9188 = vst [vmem:[#allocation68_spill] sm:$0xff] %v7853_v12  ;;  %v2034_v42 = vpack.c.bf16 %v2014_v53, %v7858_v50  ;;  %9195 = vst [vmem:[#allocation73_spill] sm:$0xff] %v7878_v56  ;;  %5927 = vmatprep.mubr.msk.bf16.mxu0 %vm427_vm0, %v7856_v16  ;;  %v665_v23 = vmax.f32 %v623_v63, 0.0  ;;  %v626_v21 = vadd.f32 %v7324_v8, %v625_v40  ;;  %v7898_v63 = vsel %vm7871_vm11, 1.0, %v9148_v2  ;;  %v1348_v47 = vld [vmem:[#allocation2 + $0x7] sm:$0xff] }
 0x17a   : > { %737 = vst.msk [vmem:[#allocation2 + $0x108] sm:$0xff] %vm427_vm0, %v667_v44  ;;  %v668_v29 = vmax.f32 %v634_v39, 0.0  ;;  %v1984_v36 = vld [vmem:[#allocation2 + $0xd1] sm:$0xff]  ;;  %9196 = vst [vmem:[#allocation74_spill] sm:$0xff] %v7898_v63  ;;  %v7902_v8 = vmul.f32 %v7716_v59, %v7876_v37  ;;  %v7906_v40 = vmul.f32 %v7730_v24, %v7878_v56  ;;  %v7909_v39 = vld [vmem:[#allocation2 + $0xc9] sm:$0xff]  ;;  %v993_v53 = vand.u32 15, %v771_v18 }
 0x17b   : > { %6004 = vmatmul.mubr.msk.bf16.gmra.mrb[20].mxu1 %vm427_vm0, %v2034_v42  ;;  %735 = vst.msk [vmem:[#allocation2 + $0xf8] sm:$0xff] %vm427_vm0, %v665_v23  ;;  %v666_v44 = vmax.f32 %v626_v21, 0.0  ;;  %9199 = vst [vmem:[#allocation77_spill] sm:$0xff] %v7909_v39  ;;  %v2016_v42 = vmul.f32 %v7863_v45, %v1984_v36  ;;  %v1465_v62 = vld [vmem:[#allocation2 + $0xf0] sm:$0xff]  ;;  %v9200_v50 = vand.u32 15, %v7735_v30  ;;  %v1462_v11 = vld [vmem:[#allocation2 + $0xd8] sm:$0xff]  ;;  %v7926_v18 = vmul.f32 %v7783_v35, %v1984_v36 }
 0x17c   : > { %9197 = vst [vmem:[#allocation75_spill] sm:$0xff] %v7902_v8  ;;  %9198 = vst [vmem:[#allocation76_spill] sm:$0xff] %v7906_v40  ;;  %v1463_v23 = vld [vmem:[#allocation2 + $0xe0] sm:$0xff]  ;;  %vm7921_vm13 = vcmp.le.s32.totalorder %v979_v0, 14  ;;  %v1464_v56 = vld [vmem:[#allocation2 + $0xe8] sm:$0xff]  ;;  %vm7953_vm14 = vcmp.ge.s32.totalorder %v958_v46, 1 }
 0x17d   : > { %vm7914_vm12 = vcmp.ge.s32.totalorder %v9200_v50, 1  ;;  %738 = vst.msk [vmem:[#allocation2 + $0x110] sm:$0xff] %vm427_vm0, %v668_v29  ;;  %v1986_v21 = vld [vmem:[#allocation2 + $0xe1] sm:$0xff]  ;;  %9205 = vst [vmem:[#allocation78_spill] sm:$0xff] %v7926_v18  ;;  %v7933_v3 = vpack.c.bf16 %v1463_v23, %v1462_v11  ;;  %v2035_v29 = vpack.c.bf16 %v2016_v42, %v7909_v39  ;;  %v7937_v38 = vld [vmem:[#allocation2 + $0xd7] sm:$0xff]  ;;  %v7944_v30 = vpack.c.bf16 %v1465_v62, %v1464_v56 }
 0x17e   : > { %736 = vst.msk [vmem:[#allocation2 + $0x100] sm:$0xff] %vm427_vm0, %v666_v44  ;;  %v2018_v0 = vmul.f32 %v7898_v63, %v1986_v21  ;;  %v7939_v37 = vld [vmem:[#allocation2 + $0xe7] sm:$0xff]  ;;  %v7942_v36 = vmul.f32 %v7863_v45, %v1986_v21  ;;  %v7946_v35 = vld [vmem:[#allocation2 + $0xd9] sm:$0xff]  ;;  %v7951_v11 = vsel %vm7914_vm12, 1.0, %v9148_v2  ;;  %v972_v42 = vand.u32 15, %v7889_v17  ;;  %v7984_v50 = vld [vmem:[#allocation2 + $0xef] sm:$0xff] }
 0x17f   : > { %9206 = vst [vmem:[#allocation79_spill] sm:$0xff] %v7933_v3  ;;  %9208 = vst [vmem:[#allocation81_spill] sm:$0xff] %v7944_v30  ;;  %6007 = vmatprep.mubr.msk.bf16.mxu1 %vm427_vm0, %v2035_v29  ;;  %vm1283_vm15 = vcmp.le.s32.totalorder %v993_v53, 14  ;;  %v7962_v62 = vld [vmem:[#allocation2 + $0xdf] sm:$0xff]  ;;  %v7973_v17 = vsel %vm7921_vm13, 1.0, %v9148_v2  ;;  %v1380_v23 = vmul.f32 %v7364_v57, %v1348_v47  ;;  %v7978_v53 = vmul.f32 %v7802_v10, %v7937_v38  ;;  %v2313_v29 = vld [vmem:[#allocation2 + $0x17] sm:$0xff] }
 0x180   : > { %9207 = vst [vmem:[#allocation80_spill] sm:$0xff] %v7942_v36  ;;  %9209 = vst [vmem:[#allocation82_spill] sm:$0xff] %v7946_v35  ;;  %5928 = vmatmul.mubr.msk.bf16.gmra.mrb[56].mxu0 %vm427_vm0, %v7933_v3  ;;  %v2036_v56 = vpack.c.bf16 %v2018_v0, %v7946_v35  ;;  %v7982_v21 = vmul.f32 %v7951_v11, %v7939_v37  ;;  %v1349_v0 = vld [vmem:[#allocation2 + $0xf] sm:$0xff]  ;;  %v7988_v16 = vsel %vm1283_vm15, 1.0, %v9148_v2  ;;  %vm1184_vm1 = vcmp.ge.s32.totalorder %v972_v42, 1  ;;  %v2314_v42 = vld [vmem:[#allocation2 + $0x1f] sm:$0xff] }
 0x181   : > { %5931 = vmatprep.mubr.msk.bf16.mxu0 %vm427_vm0, %v7944_v30  ;;  %9212 = vst [vmem:[#allocation83_spill] sm:$0xff] %v7978_v53  ;;  %9214 = vst [vmem:[#allocation85_spill] sm:$0xff] %v7988_v16  ;;  %v7996_v40 = vld [vmem:[#allocation2 + $0xe9] sm:$0xff]  ;;  %v2345_v47 = vmul.f32 %v7364_v57, %v2313_v29  ;;  %v1412_v53 = vpack.c.bf16 %v1349_v0, %v1380_v23  ;;  %v8036_v0 = vld [vmem:[#allocation2 + $0x61] sm:$0xff] }
 0x182   : > { %9213 = vst [vmem:[#allocation84_spill] sm:$0xff] %v7982_v21  ;;  %v1988_v46 = vld [vmem:[#allocation2 + $0xf1] sm:$0xff]  ;;  %9215 = vst [vmem:[#allocation86_spill] sm:$0xff] %v7996_v40 }
 0x183   : > { %6008 = vmatmul.mubr.msk.bf16.gmra.mrb[24].mxu1 %vm427_vm0, %v2036_v56  ;;  %v7990_v12 = vld [vmem:[#allocation2 + $0xf7] sm:$0xff]  ;;  %v2020_v8 = vmul.f32 %v7973_v17, %v1988_v46  ;;  %v8002_v56 = vsel %vm7953_vm14, 1.0, %v9148_v2  ;;  %v8005_v35 = vmul.f32 %v7898_v63, %v1988_v46  ;;  %9221 = vst [vmem:[#allocation92_spill] sm:$0xff] %v8036_v0 }
 0x184   : > { %v1466_v36 = vld [vmem:[#allocation2 + $0xf8] sm:$0xff]  ;;  %v8010_v45 = vmul.f32 %v8002_v56, %v7990_v12 }
 0x185   : > { %9216 = vst [vmem:[#allocation87_spill] sm:$0xff] %v8005_v35  ;;  %v1467_v39 = vld [vmem:[#allocation2 + $0x100] sm:$0xff]  ;;  %v2037_v44 = vpack.c.bf16 %v2020_v8, %v7996_v40  ;;  %v2377_v40 = vpack.c.bf16 %v2314_v42, %v2345_v47  ;;  %v1382_v35 = vmul.f32 %v7369_v58, %v2313_v29  ;;  %v8068_v29 = vld [vmem:[#allocation2 + $0x49] sm:$0xff] }
 0x186   : > { %v1990_v18 = vld [vmem:[#allocation2 + $0x101] sm:$0xff]  ;;  %9217 = vst [vmem:[#allocation88_spill] sm:$0xff] %v8010_v45  ;;  %v8012_v21 = vpack.c.bf16 %v1467_v39, %v1466_v36  ;;  %v8022_v57 = vld [vmem:[#allocation2 + $0xf9] sm:$0xff]  ;;  %v8032_v39 = vsel %vm1184_vm1, 1.0, %v9148_v2  ;;  %v8034_v36 = vld [vmem:[#allocation2 + $0x51] sm:$0xff]  ;;  %v8065_v45 = vmul.f32 %v7395_v26, %v8036_v0 }
 0x187   : > { %v2022_v30 = vmul.f32 %v7988_v16, %v1990_v18  ;;  %v8016_v3 = vld [vmem:[#allocation2 + $0xff] sm:$0xff]  ;;  %v8018_v46 = vld [vmem:[#allocation2 + $0x107] sm:$0xff]  ;;  %9219 = vst [vmem:[#allocation90_spill] sm:$0xff] %v8022_v57  ;;  %v8025_v23 = vmul.f32 %v7973_v17, %v1990_v18  ;;  %6011 = vmatprep.mubr.msk.bf16.mxu1 %vm427_vm0, %v2037_v44  ;;  %v8041_v18 = vld [vmem:[#allocation2 + $0x71] sm:$0xff]  ;;  %v8061_v44 = vmul.f32 %v7386_v19, %v8034_v36 }
 0x188   : > { %9218 = vst [vmem:[#allocation89_spill] sm:$0xff] %v8012_v21  ;;  %5932 = vmatmul.mubr.msk.bf16.gmra.mrb[60].mxu0 %vm427_vm0, %v8012_v21  ;;  %9222 = vst [vmem:[#allocation93_spill] sm:$0xff] %v8041_v18  ;;  %v8043_v16 = vld [vmem:[#allocation2 + $0x81] sm:$0xff]  ;;  %v8052_v21 = vld [vmem:[#allocation2 + $0x10f] sm:$0xff] }
 0x189   : > { %9220 = vst [vmem:[#allocation91_spill] sm:$0xff] %v8025_v23  ;;  %v2038_v8 = vpack.c.bf16 %v2022_v30, %v8022_v57  ;;  %5943 = vmatprep.mubr.msk.bf16.mxu0 %vm427_vm0, %v1412_v53  ;;  %9223 = vst [vmem:[#allocation94_spill] sm:$0xff] %v8043_v16  ;;  %v8049_v30 = vmul.f32 %v8032_v39, %v8018_v46  ;;  %v1384_v53 = vmul.f32 %v7389_v20, %v7446_v15  ;;  %v8070_v47 = vld [vmem:[#allocation2 + $0x59] sm:$0xff]  ;;  %v8082_v57 = vld [vmem:[#allocation2 + $0x69] sm:$0xff] }
 0x18a   : > { %v8078_v63 = vmul.f32 %v7460_v34, %v8043_v16  ;;  %v8084_v23 = vld [vmem:[#allocation2 + $0x79] sm:$0xff]  ;;  %v2349_v16 = vmul.f32 %v7389_v20, %v7545_v31  ;;  %v6725_v20 = vld [vmem:[%s8975_s3 + $0x88] sm:$0xff]  }
 0x18b   : > { %9224 = vst [vmem:[#allocation95_spill] sm:$0xff] %v8049_v30  ;;  %6012 = vmatmul.mubr.msk.bf16.gmra.mrb[28].mxu1 %vm427_vm0, %v2038_v8  ;;  %v8074_v8 = vmul.f32 %v7441_v13, %v8041_v18  ;;  %v2347_v30 = vmul.f32 %v7369_v58, %v7446_v15  ;;  %v4086_v18 = vpack.c.bf16 %v8065_v45, %v8070_v47  ;;  %v9312_v45 = vld [vmem:[#allocation45_spill] sm:$0xff] }
 0x18c   : > { %6023 = vmatprep.mubr.msk.bf16.mxu1 %vm427_vm0, %v2377_v40  ;;  %v8086_v40 = vld [vmem:[#allocation2 + $0x111] sm:$0xff]  ;;  %v1413_v13 = vpack.c.bf16 %v2314_v42, %v1382_v35  ;;  %v1414_v15 = vpack.c.bf16 %v7496_v61, %v1384_v53  ;;  %v8109_v42 = vld [vmem:[#allocation2 + $0x109] sm:$0xff]  ;;  %v2379_v58 = vpack.c.bf16 %v7621_v41, %v2349_v16  ;;  %v1386_v53 = vmul.f32 %v7400_v28, %v7545_v31 }
 0x18d   : > { %v4087_v34 = vpack.c.bf16 %v8074_v8, %v8082_v57  ;;  %v8102_v0 = vmul.f32 %v7973_v17, %v8086_v40  ;;  %v2378_v35 = vpack.c.bf16 %v7496_v61, %v2347_v30  ;;  %v1388_v17 = vmul.f32 %v7433_v6, %v7547_v32  ;;  %v6726_v31 = vld [vmem:[%s8975_s3 + $0x90] sm:$0xff]  }
 0x18e   : > { %v2351_v30 = vmul.f32 %v7400_v28, %v7547_v32  ;;  %v1415_v16 = vpack.c.bf16 %v7621_v41, %v1386_v53  ;;  %v6727_v28 = vld [vmem:[%s8975_s3 + $0x98] sm:$0xff]   ;;  %v8148_v53 = vld [vmem:[%s8975_s3 + $0xa0] sm:$0xff]  }
 0x190   : > { %5944 = vmatmul.mubr.msk.bf16.vlgmr.msra.gmra.mrb[32].mxu0 %vm427_vm0, %v1413_v13  ;;  %v4097_v13 = vpack.c.bf16 %v8102_v0, %v8109_v42 }
 0x191   : > { %5947 = vmatprep.mubr.msk.bf16.mxu0 %vm427_vm0, %v1414_v15  ;;  %v2353_v15 = vmul.f32 %v7433_v6, %v7570_v22  ;;  %v1392_v6 = vmul.f32 %v7557_v1, %v7653_v4 }
 0x193   : > { %6024 = vmatmul.mubr.msk.bf16.vlgmr.msra.gmra.mrb[0].mxu1 %vm427_vm0, %v2378_v35  ;;  %v1416_v35 = vpack.c.bf16 %v7649_v9, %v1388_v17  ;;  %v2381_v32 = vpack.c.bf16 %v7651_v25, %v2353_v15 }
 0x194   : > { %6056 = vmatpush3.bf16.msra.mxu1 %v7602_v60  ;;  %6027 = vmatprep.mubr.msk.bf16.mxu1 %vm427_vm0, %v2379_v58  ;;  %v2380_v60 = vpack.c.bf16 %v7649_v9, %v2351_v30  ;;  %v1390_v58 = vmul.f32 %v7552_v33, %v7570_v22  ;;  %v2357_v22 = vmul.f32 %v7557_v1, %v7657_v27 }
 0x195   : > { %6057 = vmatprep.subr.bf16.mxu1 %v6725_v20  ;;  %v1418_v30 = vpack.c.bf16 %v7723_v5, %v1392_v6  ;;  %v1396_v1 = vmul.f32 %v7637_v54, %v7725_v43  ;;  %v9226_v6 = vld [vmem:[#allocation72_spill] sm:$0xff] }
 0x196   : > { %v1417_v17 = vpack.c.bf16 %v7651_v25, %v1390_v58 }
 0x198   : > { %5948 = vmatmul.mubr.msk.bf16.gmra.mrb[36].mxu0 %vm427_vm0, %v1415_v16  ;;  %6058 = vmatpush3.bf16.msra.mxu1 %v6725_v20  ;;  %v2355_v20 = vmul.f32 %v7552_v33, %v7653_v4  ;;  %v2383_v4 = vpack.c.bf16 %v7708_v55, %v2357_v22  ;;  %v2359_v16 = vmul.f32 %v7626_v51, %v7725_v43 }
 0x199   : > { %5951 = vmatprep.mubr.msk.bf16.mxu0 %vm427_vm0, %v1416_v35  ;;  %6059 = vmatprep.subr.bf16.mxu1 %v6726_v31  ;;  %v2361_v35 = vmul.f32 %v7637_v54, %v7792_v14 }
 0x19a   : > { %v2382_v33 = vpack.c.bf16 %v7723_v5, %v2355_v20  ;;  %v2365_v20 = vmul.f32 %v7730_v24, %v9226_v6 }
 0x19b   : > { %6028 = vmatmul.mubr.msk.bf16.gmra.mrb[4].mxu1 %vm427_vm0, %v2380_v60  ;;  %v1420_v60 = vpack.c.bf16 %v7807_v52, %v1396_v1 }
 0x19c   : > { %6031 = vmatprep.mubr.msk.bf16.mxu1 %vm427_vm0, %v2381_v32  ;;  %6060 = vmatpush3.bf16.msra.mxu1 %v6726_v31  ;;  %v1394_v31 = vmul.f32 %v7626_v51, %v7657_v27  ;;  %v2384_v27 = vpack.c.bf16 %v7807_v52, %v2359_v16  ;;  %v1398_v32 = vmul.f32 %v7716_v59, %v7792_v14  ;;  %v9225_v51 = vld [vmem:[#allocation61_spill] sm:$0xff] }
 0x19d   : > { %6061 = vmatprep.subr.bf16.mxu1 %v6727_v28  ;;  %v1400_v43 = vmul.f32 %v7730_v24, %v9225_v51  ;;  %v2363_v54 = vmul.f32 %v7716_v59, %v9225_v51  ;;  %v9228_v59 = vld [vmem:[#allocation73_spill] sm:$0xff] }
 0x19e   : > { %v1419_v15 = vpack.c.bf16 %v7708_v55, %v1394_v31  ;;  %v1421_v58 = vpack.c.bf16 %v7809_v7, %v1398_v32  ;;  %v9229_v24 = vld [vmem:[#allocation29_spill] sm:$0xff]  ;;  %v2367_v1 = vmul.f32 %v7802_v10, %v9228_v59  ;;  %v1406_v32 = vmul.f32 %v8002_v56, %v7937_v38 }
 0x19f   : > { %v770_v31 = vadd.s32 240, %v9229_v24 }
 0x1a0   : > { %5952 = vmatmul.mubr.msk.bf16.gmra.mrb[40].mxu0 %vm427_vm0, %v1417_v17  ;;  %6062 = vmatpush3.bf16.msra.mxu1 %v6727_v28  ;;  %v2385_v28 = vpack.c.bf16 %v7809_v7, %v2361_v35  ;;  %v9227_v17 = vld [vmem:[#allocation65_spill] sm:$0xff]  ;;  %v1425_v51 = vpack.c.bf16 %v7962_v62, %v1406_v32  ;;  %v9232_v32 = vld [vmem:[#allocation47_spill] sm:$0xff] }
 0x1a1   : > { %5955 = vmatprep.mubr.msk.bf16.mxu0 %vm427_vm0, %v1418_v30  ;;  %6095 = vmatprep.subr.bf16.mxu1 %v8148_v53  ;;  %v1422_v22 = vpack.c.bf16 %v9227_v17, %v1400_v43  ;;  %v2386_v14 = vpack.c.bf16 %v9227_v17, %v2363_v54  ;;  %v2387_v30 = vpack.c.bf16 %v7886_v48, %v2365_v20 }
 0x1a2   : > { %v2373_v43 = vmul.f32 %v8032_v39, %v7990_v12 }
 0x1a3   : > { %6032 = vmatmul.mubr.msk.bf16.gmra.mrb[8].mxu1 %vm427_vm0, %v2382_v33  ;;  %v1402_v33 = vmul.f32 %v7802_v10, %v9226_v6  ;;  %v1408_v10 = vmul.f32 %v8032_v39, %v7939_v37  ;;  %v2668_v39 = vld [vmem:[#allocation2 + $0x20] sm:$0xff] }
 0x1a4   : > { %6035 = vmatprep.mubr.msk.bf16.mxu1 %vm427_vm0, %v2383_v4  ;;  %v1404_v4 = vmul.f32 %v7951_v11, %v9228_v59  ;;  %v2391_v6 = vpack.c.bf16 %v8016_v3, %v2373_v43  ;;  %v9236_v43 = vld [vmem:[#allocation67_spill] sm:$0xff] }
 0x1a5   : > { %v1423_v16 = vpack.c.bf16 %v7886_v48, %v1402_v33  ;;  %v1426_v54 = vpack.c.bf16 %v7984_v50, %v1408_v10  ;;  %v2669_v33 = vld [vmem:[#allocation2 + $0x28] sm:$0xff]  ;;  %v9233_v10 = vld [vmem:[#allocation49_spill] sm:$0xff] }
 0x1a6   : > { %v1424_v35 = vpack.c.bf16 %v7918_v49, %v1404_v4  ;;  %v2671_v4 = vld [vmem:[#allocation2 + $0x38] sm:$0xff] }
 0x1a8   : > { %5956 = vmatmul.mubr.msk.bf16.gmra.mrb[44].mxu0 %vm427_vm0, %v1419_v15  ;;  %v2369_v15 = vmul.f32 %v7951_v11, %v7937_v38  ;;  %v2371_v11 = vmul.f32 %v8002_v56, %v7939_v37 }
 0x1a9   : > { %5959 = vmatprep.mubr.msk.bf16.mxu0 %vm427_vm0, %v1420_v60  ;;  %v986_v60 = vand.u32 15, %v770_v31 }
 0x1ab   : > { %6036 = vmatmul.mubr.msk.bf16.gmra.mrb[12].mxu1 %vm427_vm0, %v2384_v27  ;;  %v2388_v27 = vpack.c.bf16 %v7918_v49, %v2367_v1  ;;  %vm1186_vm2 = vcmp.ge.s32.totalorder %v986_v60, 1  ;;  %v6730_v1 = vld [vmem:[%s8975_s3 + $0xb0] sm:$0xff]   ;;  %v6731_v60 = vld [vmem:[%s8975_s3 + $0xb8] sm:$0xff]  }
 0x1ac   : > { %6039 = vmatprep.mubr.msk.bf16.mxu1 %vm427_vm0, %v2385_v28  ;;  %v2389_v28 = vpack.c.bf16 %v7962_v62, %v2369_v15  ;;  %v8221_v38 = vsel %vm1186_vm2, 1.0, %v9148_v2  ;;  %v2673_v15 = vld [vmem:[#allocation2 + $0x48] sm:$0xff] }
 0x1ad   : > { %v1410_v37 = vmul.f32 %v8221_v38, %v7990_v12  ;;  %v2375_v56 = vmul.f32 %v8221_v38, %v8018_v46  ;;  %v2670_v12 = vld [vmem:[#allocation2 + $0x30] sm:$0xff]  ;;  %v6729_v46 = vld [vmem:[%s8975_s3 + $0xa8] sm:$0xff]  }
 0x1ae   : > { %v8238_v59 = vpack.c.bf16 %v2670_v12, %v2669_v33  ;;  %v2994_v12 = vld [vmem:[#allocation2 + $0x41] sm:$0xff]  ;;  %v2993_v33 = vld [vmem:[#allocation2 + $0x39] sm:$0xff] }
 0x1af   : > { %v1427_v2 = vpack.c.bf16 %v8016_v3, %v1410_v37  ;;  %v2392_v20 = vpack.c.bf16 %v8052_v21, %v2375_v56  ;;  %v9240_v37 = vld [vmem:[#allocation89_spill] sm:$0xff] }
 0x1b0   : > { %5960 = vmatmul.mubr.msk.bf16.gmra.mrb[48].mxu0 %vm427_vm0, %v1421_v58  ;;  %v2390_v58 = vpack.c.bf16 %v7984_v50, %v2371_v11  ;;  %v9234_v11 = vld [vmem:[#allocation56_spill] sm:$0xff]  ;;  %v2698_v56 = vld [vmem:[#allocation2 + $0x110] sm:$0xff] }
 0x1b1   : > { %5963 = vmatprep.mubr.msk.bf16.mxu0 %vm427_vm0, %v1422_v22  ;;  %v2667_v22 = vld [vmem:[#allocation2 + $0x18] sm:$0xff] }
 0x1b3   : > { %6040 = vmatmul.mubr.msk.bf16.gmra.mrb[16].mxu1 %vm427_vm0, %v2386_v14  ;;  %v2699_v14 = vpack.c.bf16 %v2668_v39, %v2667_v22  ;;  %v9241_v22 = vld [vmem:[#allocation30_spill] sm:$0xff] }
 0x1b4   : > { %6043 = vmatprep.mubr.msk.bf16.mxu1 %vm427_vm0, %v2387_v30  ;;  %v2672_v30 = vld [vmem:[#allocation2 + $0x40] sm:$0xff] }
 0x1b5   : > { %v8243_v31 = vpack.c.bf16 %v2672_v30, %v2671_v4  ;;  %v3026_v30 = vmul.f32 %v7386_v19, %v2994_v12  ;;  %v6733_v4 = vld [vmem:[%s8975_s3 + $0xc8] sm:$0xff]   ;;  %v6734_v19 = vld [vmem:[%s8975_s3 + $0xd0] sm:$0xff]   ;;  %v9255_v12 = vld [vmem:[#allocation59_spill] sm:$0xff] }
 0x1b8   : > { %5964 = vmatmul.mubr.msk.bf16.gmra.mrb[52].mxu0 %vm427_vm0, %v1423_v16  ;;  %v2674_v16 = vld [vmem:[#allocation2 + $0x50] sm:$0xff] }
 0x1b9   : > { %5967 = vmatprep.mubr.msk.bf16.mxu0 %vm427_vm0, %v1424_v35  ;;  %v8253_v35 = vpack.c.bf16 %v2674_v16, %v2673_v15  ;;  %v9243_v16 = vld [vmem:[#allocation35_spill] sm:$0xff] }
 0x1bb   : > { %6044 = vmatmul.mubr.msk.bf16.gmra.mrb[20].mxu1 %vm427_vm0, %v2388_v27  ;;  %v6732_v27 = vld [vmem:[%s8975_s3 + $0xc0] sm:$0xff]  }
 0x1bc   : > { %6047 = vmatprep.mubr.msk.bf16.mxu1 %vm427_vm0, %v2389_v28  ;;  %v9231_v28 = vld [vmem:[#allocation44_spill] sm:$0xff] }
 0x1c0   : > { %5968 = vmatmul.mubr.msk.bf16.gmra.mrb[56].mxu0 %vm427_vm0, %v1425_v51  ;;  %v9235_v51 = vld [vmem:[#allocation58_spill] sm:$0xff] }
 0x1c1   : > { %5971 = vmatprep.mubr.msk.bf16.mxu0 %vm427_vm0, %v1426_v54  ;;  %v9237_v54 = vld [vmem:[#allocation69_spill] sm:$0xff] }
 0x1c3   : > { %6048 = vmatmul.mubr.msk.bf16.gmra.mrb[24].mxu1 %vm427_vm0, %v2390_v58  ;;  %v9238_v58 = vld [vmem:[#allocation79_spill] sm:$0xff] }
 0x1c4   : > { %6051 = vmatprep.mubr.msk.bf16.mxu1 %vm427_vm0, %v2391_v6  ;;  %v9239_v6 = vld [vmem:[#allocation81_spill] sm:$0xff] }
 0x1c8   : > { %5972 = vmatmul.mubr.msk.bf16.gmra.mrb[60].mxu0 %vm427_vm0, %v1427_v2  ;;  %v2697_v2 = vld [vmem:[#allocation2 + $0x108] sm:$0xff] }
 0x1c9   : > { %v8285_v39 = vpack.c.bf16 %v2698_v56, %v2697_v2  ;;  %v9251_v2 = vld [vmem:[#allocation54_spill] sm:$0xff] }
 0x1cb   : > { %6052 = vmatmul.mubr.msk.bf16.gmra.mrb[28].mxu1 %vm427_vm0, %v2392_v20  ;;  %v2989_v20 = vld [vmem:[#allocation2 + $0x19] sm:$0xff] }
 0x1cc   : > { %6063 = vmatprep.mubr.msk.bf16.mxu1 %vm427_vm0, %v2699_v14  ;;  %v3053_v14 = vpack.c.bf16 %v9241_v22, %v2989_v20  ;;  %v9252_v20 = vld [vmem:[#allocation52_spill] sm:$0xff] }
 0x1cd   : > { %v9253_v22 = vpack.c.bf16 %v9251_v2, %v9252_v20  ;;  %v9276_v2 = vld [vmem:[#allocation33_spill] sm:$0xff] }
 0x1ce   : > { %v9277_v20 = vpack.c.bf16 %v7496_v61, %v9276_v2  ;;  %v6738_v61 = vld [vmem:[%s8975_s3 + $0xf0] sm:$0xff]  }
 0x1d3   : > { %6064 = vmatmul.mubr.msk.bf16.vlgmr.msra.gmra.mrb[0].mxu1 %vm427_vm0, %v8238_v59 }
 0x1d4   : > { %6096 = vmatpush3.bf16.msra.mxu1 %v8148_v53  ;;  %6067 = vmatprep.mubr.msk.bf16.mxu1 %vm427_vm0, %v8243_v31  ;;  %v9230_v53 = vld [vmem:[#allocation42_spill] sm:$0xff] }
 0x1d5   : > { %6097 = vmatprep.subr.bf16.mxu1 %v6729_v46 }
 0x1d8   : > { %6098 = vmatpush3.bf16.msra.mxu1 %v6729_v46  ;;  %v3055_v46 = vpack.c.bf16 %v3026_v30, %v2993_v33  ;;  %v9257_v33 = vld [vmem:[#allocation66_spill] sm:$0xff] }
 0x1d9   : > { %6099 = vmatprep.subr.bf16.mxu1 %v6730_v1 }
 0x1db   : > { %6068 = vmatmul.mubr.msk.bf16.gmra.mrb[4].mxu1 %vm427_vm0, %v8253_v35 }
 0x1dc   : > { %6071 = vmatprep.mubr.msk.bf16.mxu1 %vm427_vm0, %v9230_v53  ;;  %6100 = vmatpush3.bf16.msra.mxu1 %v6730_v1  ;;  %v9242_v1 = vld [vmem:[#allocation36_spill] sm:$0xff] }
 0x1dd   : > { %6101 = vmatprep.subr.bf16.mxu1 %v6731_v60  ;;  %v9244_v15 = vpack.c.bf16 %v9242_v1, %v9243_v16  ;;  %v9245_v53 = vld [vmem:[#allocation92_spill] sm:$0xff]  ;;  %v9261_v16 = vld [vmem:[#allocation70_spill] sm:$0xff] }
 0x1de   : > { %v9260_v1 = vld [vmem:[#allocation68_spill] sm:$0xff] }
 0x1e0   : > { %6102 = vmatpush3.bf16.msra.mxu1 %v6731_v60  ;;  %v3028_v60 = vmul.f32 %v7395_v26, %v8034_v36  ;;  %v9247_v26 = vld [vmem:[#allocation93_spill] sm:$0xff]  ;;  %v9248_v36 = vld [vmem:[#allocation32_spill] sm:$0xff] }
 0x1e1   : > { %6135 = vmatprep.subr.bf16.mxu1 %v6732_v27 }
 0x1e3   : > { %6072 = vmatmul.mubr.msk.bf16.gmra.mrb[8].mxu1 %vm427_vm0, %v9231_v28  ;;  %v9246_v28 = vld [vmem:[#allocation31_spill] sm:$0xff] }
 0x1e4   : > { %6075 = vmatprep.mubr.msk.bf16.mxu1 %vm427_vm0, %v9232_v32  ;;  %v3030_v32 = vmul.f32 %v9246_v28, %v9245_v53  ;;  %v9266_v28 = vld [vmem:[#allocation80_spill] sm:$0xff] }
 0x1eb   : > { %6076 = vmatmul.mubr.msk.bf16.gmra.mrb[12].mxu1 %vm427_vm0, %v9233_v10  ;;  %v3056_v10 = vpack.c.bf16 %v3028_v60, %v8068_v29  ;;  %v9263_v60 = vld [vmem:[#allocation78_spill] sm:$0xff] }
 0x1ec   : > { %6079 = vmatprep.mubr.msk.bf16.mxu1 %vm427_vm0, %v9234_v11  ;;  %v3057_v11 = vpack.c.bf16 %v3030_v32, %v8070_v47  ;;  %v9267_v32 = vld [vmem:[#allocation82_spill] sm:$0xff] }
 0x1ed   : > { %v9313_v47 = vld [vmem:[#allocation50_spill] sm:$0xff] }
 0x1f3   : > { %6080 = vmatmul.mubr.msk.bf16.gmra.mrb[16].mxu1 %vm427_vm0, %v9235_v51  ;;  %v3032_v51 = vmul.f32 %v9248_v36, %v9247_v26  ;;  %v9272_v36 = vld [vmem:[#allocation91_spill] sm:$0xff] }
 0x1f4   : > { %6083 = vmatprep.mubr.msk.bf16.mxu1 %vm427_vm0, %v9236_v43  ;;  %v6736_v43 = vld [vmem:[%s8975_s3 + $0xe0] sm:$0xff]  }
 0x1fb   : > { %6084 = vmatmul.mubr.msk.bf16.gmra.mrb[20].mxu1 %vm427_vm0, %v9237_v54  ;;  %v9249_v54 = vld [vmem:[#allocation94_spill] sm:$0xff] }
 0x1fc   : > { %6087 = vmatprep.mubr.msk.bf16.mxu1 %vm427_vm0, %v9238_v58  ;;  %v9250_v58 = vld [vmem:[#allocation39_spill] sm:$0xff] }
 0x203   : > { %6088 = vmatmul.mubr.msk.bf16.gmra.mrb[24].mxu1 %vm427_vm0, %v9239_v6  ;;  %v3034_v6 = vmul.f32 %v9250_v58, %v9249_v54 }
 0x204   : > { %6091 = vmatprep.mubr.msk.bf16.mxu1 %vm427_vm0, %v9240_v37  ;;  %v3058_v37 = vpack.c.bf16 %v3032_v51, %v8082_v57  ;;  %v9273_v51 = vld [vmem:[#allocation90_spill] sm:$0xff] }
 0x205   : > { %v3059_v56 = vpack.c.bf16 %v3034_v6, %v8084_v23  ;;  %v9274_v54 = vpack.c.bf16 %v9272_v36, %v9273_v51  ;;  %v9275_v6 = vld [vmem:[#allocation85_spill] sm:$0xff]  ;;  %v9294_v36 = vld [vmem:[#allocation75_spill] sm:$0xff] }
 0x206   : > { %v9295_v51 = vpack.c.bf16 %v7886_v48, %v9294_v36  ;;  %v6747_v36 = vld [vmem:[%s8977_s5 + $0x10] ss:$8 sps:$4 sm:$0xff]  }
 0x207   : > { %v4033_v57 = vld [vmem:[#allocation2 + $0x99] sm:$0xff] }
 0x20b   : > { %6092 = vmatmul.mubr.msk.bf16.gmra.mrb[28].mxu1 %vm427_vm0, %v8285_v39 }
 0x20c   : > { %6103 = vmatprep.mubr.msk.bf16.mxu1 %vm427_vm0, %v3053_v14  ;;  %v9254_v14 = vld [vmem:[#allocation57_spill] sm:$0xff] }
 0x20d   : > { %v9256_v30 = vpack.c.bf16 %v9254_v14, %v9255_v12  ;;  %v9278_v14 = vld [vmem:[#allocation40_spill] sm:$0xff] }
 0x20e   : > { %v9279_v12 = vpack.c.bf16 %v7621_v41, %v9278_v14  ;;  %v9282_v41 = vld [vmem:[#allocation43_spill] sm:$0xff]  ;;  %v9300_v14 = vld [vmem:[#allocation84_spill] sm:$0xff] }
 0x213   : > { %6104 = vmatmul.mubr.msk.bf16.vlgmr.msra.gmra.mrb[0].mxu1 %vm427_vm0, %v9244_v15  ;;  %v9262_v15 = vpack.c.bf16 %v9260_v1, %v9261_v16  ;;  %v9286_v1 = vld [vmem:[#allocation48_spill] sm:$0xff] }
 0x214   : > { %6136 = vmatpush3.bf16.msra.mxu1 %v6732_v27  ;;  %6107 = vmatprep.mubr.msk.bf16.mxu1 %vm427_vm0, %v3055_v46  ;;  %v6735_v27 = vld [vmem:[%s8975_s3 + $0xd8] sm:$0xff]   ;;  %v9287_v16 = vpack.c.bf16 %v7708_v55, %v9286_v1 }
 0x215   : > { %6137 = vmatprep.subr.bf16.mxu1 %v6733_v4 }
 0x218   : > { %6138 = vmatpush3.bf16.msra.mxu1 %v6733_v4  ;;  %v9258_v4 = vld [vmem:[#allocation64_spill] sm:$0xff] }
 0x219   : > { %6139 = vmatprep.subr.bf16.mxu1 %v6734_v19  ;;  %v9259_v46 = vpack.c.bf16 %v9257_v33, %v9258_v4  ;;  %v6739_v33 = vld [vmem:[%s8975_s3 + $0xf8] sm:$0xff]   ;;  %v9283_v4 = vpack.c.bf16 %v7651_v25, %v9282_v41 }
 0x21b   : > { %6108 = vmatmul.mubr.msk.bf16.gmra.mrb[4].mxu1 %vm427_vm0, %v3056_v10  ;;  %v9268_v10 = vpack.c.bf16 %v9266_v28, %v9267_v32  ;;  %v9290_v28 = vld [vmem:[#allocation62_spill] sm:$0xff] }
 0x21c   : > { %6111 = vmatprep.mubr.msk.bf16.mxu1 %vm427_vm0, %v3057_v11  ;;  %6140 = vmatpush3.bf16.msra.mxu1 %v6734_v19  ;;  %v9264_v19 = vld [vmem:[#allocation77_spill] sm:$0xff]  ;;  %v9270_v11 = vld [vmem:[#allocation86_spill] sm:$0xff]  ;;  %v9291_v32 = vpack.c.bf16 %v7809_v7, %v9290_v28  ;;  %v6746_v28 = vld [vmem:[%s8977_s5 + $0x4] ss:$8 sps:$4 sm:$0xff]  }
 0x21d   : > { %6141 = vmatprep.subr.bf16.mxu1 %v6735_v27  ;;  %v9265_v53 = vpack.c.bf16 %v9263_v60, %v9264_v19  ;;  %4568 = vmatprep.subr.bf16.mxu0 %v6746_v28 }
 0x220   : > { %6142 = vmatpush3.bf16.msra.mxu1 %v6735_v27  ;;  %v9269_v27 = vld [vmem:[#allocation87_spill] sm:$0xff] }
 0x221   : > { %6175 = vmatprep.subr.bf16.mxu1 %v6736_v43  ;;  %v9271_v26 = vpack.c.bf16 %v9269_v27, %v9270_v11 }
 0x223   : > { %6112 = vmatmul.mubr.msk.bf16.gmra.mrb[8].mxu1 %vm427_vm0, %v3058_v37  ;;  %v3052_v37 = vmul.f32 %v9275_v6, %v8086_v40  ;;  %v9280_v40 = vld [vmem:[#allocation41_spill] sm:$0xff] }
 0x224   : > { %6115 = vmatprep.mubr.msk.bf16.mxu1 %vm427_vm0, %v3059_v56 }
 0x225   : > { %v3068_v56 = vpack.c.bf16 %v3052_v37, %v8109_v42 }
 0x22b   : > { %6116 = vmatmul.mubr.msk.bf16.gmra.mrb[12].mxu1 %vm427_vm0, %v9253_v22  ;;  %v6737_v22 = vld [vmem:[%s8975_s3 + $0xe8] sm:$0xff]  }
 0x22c   : > { %6119 = vmatprep.mubr.msk.bf16.mxu1 %vm427_vm0, %v9256_v30  ;;  %v9281_v30 = vpack.c.bf16 %v7649_v9, %v9280_v40  ;;  %v9284_v9 = vld [vmem:[#allocation46_spill] sm:$0xff] }
 0x233   : > { %6120 = vmatmul.mubr.msk.bf16.gmra.mrb[16].mxu1 %vm427_vm0, %v9259_v46  ;;  %v6740_v46 = vld [vmem:[%s8975_s3 + $0x100] sm:$0xff]  }
 0x234   : > { %6123 = vmatprep.mubr.msk.bf16.mxu1 %vm427_vm0, %v9262_v15  ;;  %v9288_v15 = vld [vmem:[#allocation55_spill] sm:$0xff] }
 0x23b   : > { %6124 = vmatmul.mubr.msk.bf16.gmra.mrb[20].mxu1 %vm427_vm0, %v9265_v53 }
 0x23c   : > { %6127 = vmatprep.mubr.msk.bf16.mxu1 %vm427_vm0, %v9268_v10  ;;  %v9292_v10 = vld [vmem:[#allocation63_spill] sm:$0xff] }
 0x23d   : > { %v9293_v27 = vpack.c.bf16 %v9227_v17, %v9292_v10 }
 0x243   : > { %6128 = vmatmul.mubr.msk.bf16.gmra.mrb[24].mxu1 %vm427_vm0, %v9271_v26 }
 0x244   : > { %6131 = vmatprep.mubr.msk.bf16.mxu1 %vm427_vm0, %v9274_v54  ;;  %v9296_v54 = vld [vmem:[#allocation76_spill] sm:$0xff] }
 0x245   : > { %v9297_v37 = vpack.c.bf16 %v7918_v49, %v9296_v54  ;;  %v6750_v54 = vld [vmem:[%s8977_s5 + $0x20] ss:$8 sps:$4 sm:$0xff]  }
 0x24b   : > { %6132 = vmatmul.mubr.msk.bf16.gmra.mrb[28].mxu1 %vm427_vm0, %v3068_v56 }
 0x24c   : > { %6143 = vmatprep.mubr.msk.bf16.mxu1 %vm427_vm0, %v9277_v20  ;;  %v9298_v20 = vld [vmem:[#allocation83_spill] sm:$0xff] }
 0x253   : > { %6144 = vmatmul.mubr.msk.bf16.vlgmr.msra.gmra.mrb[0].mxu1 %vm427_vm0, %v9279_v12  ;;  %v9301_v12 = vpack.c.bf16 %v7984_v50, %v9300_v14 }
 0x254   : > { %6176 = vmatpush3.bf16.msra.mxu1 %v6736_v43  ;;  %6147 = vmatprep.mubr.msk.bf16.mxu1 %vm427_vm0, %v9281_v30  ;;  %v9285_v43 = vpack.c.bf16 %v7723_v5, %v9284_v9  ;;  %v9289_v5 = vpack.c.bf16 %v7807_v52, %v9288_v15  ;;  %v3374_v15 = vld [vmem:[#allocation2 + $0x11f] sm:$0xff] }
 0x255   : > { %6177 = vmatprep.subr.bf16.mxu1 %v6737_v22 }
 0x258   : > { %6178 = vmatpush3.bf16.msra.mxu1 %v6737_v22  ;;  %v9299_v22 = vpack.c.bf16 %v7962_v62, %v9298_v20  ;;  %v6755_v20 = vld [vmem:[%s8977_s5 + $0x34] ss:$8 sps:$4 sm:$0xff]  }
 0x259   : > { %6179 = vmatprep.subr.bf16.mxu1 %v6738_v61 }
 0x25b   : > { %6148 = vmatmul.mubr.msk.bf16.gmra.mrb[4].mxu1 %vm427_vm0, %v9283_v4  ;;  %v9304_v4 = vld [vmem:[#allocation95_spill] sm:$0xff] }
 0x25c   : > { %6151 = vmatprep.mubr.msk.bf16.mxu1 %vm427_vm0, %v9285_v43  ;;  %6180 = vmatpush3.bf16.msra.mxu1 %v6738_v61  ;;  %v3373_v61 = vld [vmem:[#allocation2 + $0x117] sm:$0xff]  ;;  %v9305_v9 = vpack.c.bf16 %v8052_v21, %v9304_v4  ;;  %v6744_v21 = vld [vmem:[%s8977_s5] ss:$8 sps:$4 sm:$0xff]  }
 0x25d   : > { %6181 = vmatprep.subr.bf16.mxu1 %v6739_v33  ;;  %v3405_v1 = vmul.f32 %v8221_v38, %v3373_v61  ;;  %4569 = vmatpush1.bf16.msra.mxu0 %v6744_v21  ;;  %v3704_v61 = vld [vmem:[#allocation2 + $0x60] sm:$0xff]  ;;  %v3705_v4 = vld [vmem:[#allocation2 + $0x68] sm:$0xff] }
 0x260   : > { %6182 = vmatpush3.bf16.msra.mxu1 %v6739_v33  ;;  %v9302_v33 = vld [vmem:[#allocation88_spill] sm:$0xff] }
 0x261   : > { %6215 = vmatprep.subr.bf16.mxu1 %v6740_v46  ;;  %v9303_v41 = vpack.c.bf16 %v8016_v3, %v9302_v33  ;;  %v3706_v33 = vld [vmem:[#allocation2 + $0x70] sm:$0xff] }
 0x263   : > { %6152 = vmatmul.mubr.msk.bf16.gmra.mrb[8].mxu1 %vm427_vm0, %v9287_v16  ;;  %v8397_v25 = vpop.f32.mrb[32].mxu0 }
 0x264   : > { %6155 = vmatprep.mubr.msk.bf16.mxu1 %vm427_vm0, %v9289_v5  ;;  %v8403_v60 = vpop.f32.mrb[33].mxu0  ;;  %v3422_v5 = vpack.c.bf16 %v3374_v15, %v3405_v1  ;;  %v3733_v1 = vpack.c.bf16 %v3706_v33, %v3705_v4  ;;  %v3711_v33 = vld [vmem:[#allocation2 + $0x98] sm:$0xff]  ;;  %v3716_v4 = vld [vmem:[#allocation2 + $0xc0] sm:$0xff] }
 0x265   : > { %v8405_v19 = vpop.f32.mrb[34].mxu0 }
 0x266   : > { %v8407_v53 = vpop.f32.mrb[35].mxu0 }
 0x26b   : > { %6156 = vmatmul.mubr.msk.bf16.gmra.mrb[12].mxu1 %vm427_vm0, %v9291_v32  ;;  %v8413_v55 = vpop.f32.mrb[36].mxu0  ;;  %v6749_v32 = vld [vmem:[%s8977_s5 + $0x14] ss:$8 sps:$4 sm:$0xff]  }
 0x26c   : > { %6159 = vmatprep.mubr.msk.bf16.mxu1 %vm427_vm0, %v9293_v27  ;;  %v8419_v52 = vpop.f32.mrb[37].mxu0  ;;  %4570 = vmatprep.subr.bf16.mxu0 %v6749_v32  ;;  %v3708_v32 = vld [vmem:[#allocation2 + $0x80] sm:$0xff] }
 0x26d   : > { %v8421_v11 = vpop.f32.mrb[38].mxu0  ;;  %4571 = vmatpush1.bf16.msra.mxu0 %v6747_v36  ;;  %v3710_v36 = vld [vmem:[#allocation2 + $0x90] sm:$0xff] }
 0x26e   : > { %v8423_v26 = vpop.f32.mrb[39].mxu0 }
 0x273   : > { %6160 = vmatmul.mubr.msk.bf16.gmra.mrb[16].mxu1 %vm427_vm0, %v9295_v51  ;;  %v8429_v7 = vpop.f32.mrb[40].mxu0  ;;  %v6741_v51 = vld [vmem:[%s8975_s3 + $0x108] sm:$0xff]  }
 0x274   : > { %6163 = vmatprep.mubr.msk.bf16.mxu1 %vm427_vm0, %v9297_v37  ;;  %v8435_v17 = vpop.f32.mrb[41].mxu0 }
 0x275   : > { %v8437_v56 = vpop.f32.mrb[42].mxu0 }
 0x276   : > { %v8439_v2 = vpop.f32.mrb[43].mxu0 }
 0x27b   : > { %6164 = vmatmul.mubr.msk.bf16.gmra.mrb[20].mxu1 %vm427_vm0, %v9299_v22  ;;  %v8445_v48 = vpop.f32.mrb[44].mxu0 }
 0x27c   : > { %6167 = vmatprep.mubr.msk.bf16.mxu1 %vm427_vm0, %v9301_v12  ;;  %v8451_v49 = vpop.f32.mrb[45].mxu0 }
 0x27d   : > { %v8453_v40 = vpop.f32.mrb[46].mxu0 }
 0x27e   : > { %v8455_v30 = vpop.f32.mrb[47].mxu0 }
 0x283   : > { %6168 = vmatmul.mubr.msk.bf16.gmra.mrb[24].mxu1 %vm427_vm0, %v9303_v41  ;;  %v8461_v62 = vpop.f32.mrb[48].mxu0 }
 0x284   : > { %6171 = vmatprep.mubr.msk.bf16.mxu1 %vm427_vm0, %v9305_v9  ;;  %v8467_v50 = vpop.f32.mrb[49].mxu0  ;;  %v6743_v9 = vld [vmem:[%s8975_s3 + $0x118] sm:$0xff]  }
 0x285   : > { %v8469_v43 = vpop.f32.mrb[50].mxu0 }
 0x286   : > { %v8472_v16 = vpop.f32.mrb[51].mxu0 }
 0x28b   : > { %6172 = vmatmul.mubr.msk.bf16.gmra.mrb[28].mxu1 %vm427_vm0, %v3422_v5  ;;  %v8475_v3 = vpop.f32.mrb[52].mxu0 }
 0x28c   : > { %6183 = vmatprep.mubr.msk.bf16.mxu1 %vm427_vm0, %v8238_v59  ;;  %v8485_v38 = vpop.f32.mrb[53].mxu0  ;;  %v6752_v59 = vld [vmem:[%s8977_s5 + $0x24] ss:$8 sps:$4 sm:$0xff]  }
 0x28d   : > { %v8490_v10 = vpop.f32.mrb[54].mxu0  ;;  %4572 = vmatprep.subr.bf16.mxu0 %v6752_v59  ;;  %v3707_v59 = vld [vmem:[#allocation2 + $0x78] sm:$0xff] }
 0x28e   : > { %v8492_v27 = vpop.f32.mrb[55].mxu0  ;;  %4573 = vmatpush1.bf16.msra.mxu0 %v6750_v54  ;;  %v3709_v54 = vld [vmem:[#allocation2 + $0x88] sm:$0xff] }
 0x28f   : > { %4574 = vmatprep.subr.bf16.mxu0 %v6755_v20  ;;  %v3735_v20 = vpack.c.bf16 %v3710_v36, %v3709_v54  ;;  %v3722_v54 = vld [vmem:[#allocation2 + $0xf0] sm:$0xff] }
 0x293   : > { %6184 = vmatmul.mubr.msk.bf16.vlgmr.msra.gmra.mrb[0].mxu1 %vm427_vm0, %v8243_v31  ;;  %v8508_v37 = vpop.f32.mrb[56].mxu0  ;;  %v6742_v31 = vld [vmem:[%s8975_s3 + $0x110] sm:$0xff]  }
 0x294   : > { %6216 = vmatpush3.bf16.msra.mxu1 %v6740_v46  ;;  %6187 = vmatprep.mubr.msk.bf16.mxu1 %vm427_vm0, %v8253_v35  ;;  %v8515_v22 = vpop.f32.mrb[57].mxu0  ;;  %v6753_v46 = vld [vmem:[%s8977_s5 + $0x30] ss:$8 sps:$4 sm:$0xff]  }
 0x295   : > { %v8517_v14 = vpop.f32.mrb[58].mxu0  ;;  %6217 = vmatprep.subr.bf16.mxu1 %v6741_v51  ;;  %v3703_v35 = vld [vmem:[#allocation2 + $0x58] sm:$0xff]  ;;  %4575 = vmatpush1.bf16.msra.mxu0 %v6753_v46  ;;  %v3714_v46 = vld [vmem:[#allocation2 + $0xb0] sm:$0xff] }
 0x296   : > { %v8522_v12 = vpop.f32.mrb[59].mxu0  ;;  %v3732_v41 = vpack.c.bf16 %v3704_v61, %v3703_v35  ;;  %v3712_v61 = vld [vmem:[#allocation2 + $0xa0] sm:$0xff]  ;;  %v3713_v35 = vld [vmem:[#allocation2 + $0xa8] sm:$0xff] }
 0x298   : > { %6218 = vmatpush3.bf16.msra.mxu1 %v6741_v51  ;;  %v3734_v51 = vpack.c.bf16 %v3708_v32, %v3707_v59  ;;  %v3717_v59 = vld [vmem:[#allocation2 + $0xc8] sm:$0xff] }
 0x299   : > { %6219 = vmatprep.subr.bf16.mxu1 %v6742_v31 }
 0x29b   : > { %6188 = vmatmul.mubr.msk.bf16.gmra.mrb[4].mxu1 %vm427_vm0, %v3732_v41  ;;  %v8531_v15 = vpop.f32.mrb[60].mxu0  ;;  %v3737_v41 = vpack.c.bf16 %v3714_v46, %v3713_v35  ;;  %v3723_v35 = vld [vmem:[#allocation2 + $0xf8] sm:$0xff] }
 0x29c   : > { %6191 = vmatprep.mubr.msk.bf16.mxu1 %vm427_vm0, %v3733_v1  ;;  %v8534_v5 = vpop.f32.mrb[61].mxu0  ;;  %6220 = vmatpush3.bf16.msra.mxu1 %v6742_v31  ;;  %v3736_v31 = vpack.c.bf16 %v3712_v61, %v3711_v33  ;;  %v3718_v1 = vld [vmem:[#allocation2 + $0xd0] sm:$0xff]  ;;  %v3721_v33 = vld [vmem:[#allocation2 + $0xe8] sm:$0xff] }
 0x29d   : > { %v8536_v21 = vpop.f32.mrb[62].mxu0  ;;  %6221 = vmatprep.subr.bf16.mxu1 %v6743_v9  ;;  %v3739_v36 = vpack.c.bf16 %v3718_v1, %v3717_v59  ;;  %v3741_v46 = vpack.c.bf16 %v3722_v54, %v3721_v33  ;;  %v3728_v1 = vld [vmem:[#allocation2 + $0x120] sm:$0xff]  ;;  %v9306_v59 = vld [vmem:[#allocation34_spill] sm:$0xff] }
 0x29e   : > { %v8538_v28 = vpop.f32.mrb[63].mxu0  ;;  %v9308_v54 = vld [vmem:[#allocation38_spill] sm:$0xff] }
 0x2a0   : > { %6222 = vmatpush3.bf16.msra.mxu1 %v6743_v9  ;;  %v3715_v9 = vld [vmem:[#allocation2 + $0xb8] sm:$0xff] }
 0x2a1   : > { %v3738_v32 = vpack.c.bf16 %v3716_v4, %v3715_v9  ;;  %v3727_v4 = vld [vmem:[#allocation2 + $0x118] sm:$0xff] }
 0x2a2   : > { %v3744_v9 = vpack.c.bf16 %v3728_v1, %v3727_v4  ;;  %v4040_v1 = vld [vmem:[#allocation2 + $0xd1] sm:$0xff] }
 0x2a3   : > { %6192 = vmatmul.mubr.msk.bf16.gmra.mrb[8].mxu1 %vm427_vm0, %v3734_v51  ;;  %v3720_v51 = vld [vmem:[#allocation2 + $0xe0] sm:$0xff] }
 0x2a4   : > { %6195 = vmatprep.mubr.msk.bf16.mxu1 %vm427_vm0, %v3735_v20  ;;  %v3719_v20 = vld [vmem:[#allocation2 + $0xd8] sm:$0xff] }
 0x2a5   : > { %v3740_v61 = vpack.c.bf16 %v3720_v51, %v3719_v20  ;;  %v9307_v51 = vld [vmem:[#allocation37_spill] sm:$0xff] }
 0x2a6   : > { %v9309_v20 = vpack.c.bf16 %v9307_v51, %v9308_v54  ;;  %v4039_v51 = vld [vmem:[#allocation2 + $0xc9] sm:$0xff] }
 0x2ab   : > { %6196 = vmatmul.mubr.msk.bf16.gmra.mrb[12].mxu1 %vm427_vm0, %v3736_v31  ;;  %v3724_v31 = vld [vmem:[#allocation2 + $0x100] sm:$0xff] }
 0x2ac   : > { %6199 = vmatprep.mubr.msk.bf16.mxu1 %vm427_vm0, %v3737_v41  ;;  %v3742_v41 = vpack.c.bf16 %v3724_v31, %v3723_v35  ;;  %v4034_v35 = vld [vmem:[#allocation2 + $0xa1] sm:$0xff] }
 0x2b3   : > { %6200 = vmatmul.mubr.msk.bf16.gmra.mrb[16].mxu1 %vm427_vm0, %v3738_v32  ;;  %v4019_v32 = vld [vmem:[#allocation2 + $0x29] sm:$0xff] }
 0x2b4   : > { %6203 = vmatprep.mubr.msk.bf16.mxu1 %vm427_vm0, %v3739_v36  ;;  %v4083_v36 = vpack.c.bf16 %v9306_v59, %v4019_v32  ;;  %v4037_v59 = vld [vmem:[#allocation2 + $0xb9] sm:$0xff] }
 0x2bb   : > { %6204 = vmatmul.mubr.msk.bf16.gmra.mrb[20].mxu1 %vm427_vm0, %v3740_v61  ;;  %v9310_v61 = vpack.c.bf16 %v8061_v44, %v8068_v29  ;;  %v9311_v44 = vpack.c.bf16 %v8078_v63, %v8084_v23  ;;  %v4036_v29 = vld [vmem:[#allocation2 + $0xb1] sm:$0xff]  ;;  %v9314_v63 = vld [vmem:[#allocation51_spill] sm:$0xff] }
 0x2bc   : > { %6207 = vmatprep.mubr.msk.bf16.mxu1 %vm427_vm0, %v3741_v46  ;;  %v4031_v46 = vld [vmem:[#allocation2 + $0x89] sm:$0xff] }
 0x2c3   : > { %6208 = vmatmul.mubr.msk.bf16.gmra.mrb[24].mxu1 %vm427_vm0, %v3742_v41  ;;  %v4068_v41 = vmul.f32 %v9313_v47, %v4036_v29  ;;  %v4043_v29 = vld [vmem:[#allocation2 + $0xe9] sm:$0xff]  ;;  %v9318_v47 = vld [vmem:[#allocation74_spill] sm:$0xff] }
 0x2c4   : > { %6211 = vmatprep.mubr.msk.bf16.mxu1 %vm427_vm0, %v8285_v39  ;;  %v4032_v39 = vld [vmem:[#allocation2 + $0x91] sm:$0xff] }
 0x2c5   : > { %v4064_v33 = vmul.f32 %v9250_v58, %v4032_v39  ;;  %v4038_v58 = vld [vmem:[#allocation2 + $0xc1] sm:$0xff] }
 0x2c6   : > { %v4070_v23 = vmul.f32 %v9314_v63, %v4038_v58  ;;  %v9316_v39 = vld [vmem:[#allocation60_spill] sm:$0xff]  ;;  %v4049_v58 = vld [vmem:[#allocation2 + $0x119] sm:$0xff] }
 0x2c7   : > { %v4089_v31 = vpack.c.bf16 %v4064_v33, %v4031_v46  ;;  %v9317_v46 = vld [vmem:[#allocation71_spill] sm:$0xff] }
 0x2c8   : > { %v6758_v63 = vld [vmem:[%s8979_s7 + $0x4] ss:$8 sps:$4 sm:$0xff]  }
 0x2c9   : > { %4809 = vmatprep.subr.bf16.mxu0 %v6758_v63 }
 0x2cb   : > { %6212 = vmatmul.mubr.msk.bf16.gmra.mrb[28].mxu1 %vm427_vm0, %v3744_v9  ;;  %v9315_v9 = vld [vmem:[#allocation53_spill] sm:$0xff] }
 0x2cc   : > { %6223 = vmatprep.mubr.msk.bf16.mxu1 %vm427_vm0, %v4083_v36  ;;  %v4072_v32 = vmul.f32 %v9315_v9, %v4040_v1  ;;  %v4092_v36 = vpack.c.bf16 %v4070_v23, %v4037_v59  ;;  %v6905_v23 = vmov 0  }
 0x2cd   : > { %4600 = vmatprep.mubr.bf16.mxu0 %v6905_v23 }
 0x2ce   : > { %v4093_v54 = vpack.c.bf16 %v4072_v32, %v4039_v51 }
 0x2d3   : > { %6224 = vmatmul.mubr.msk.bf16.vlgmr.msra.gmra.mrb[0].mxu1 %vm427_vm0, %v9309_v20  ;;  %v4042_v20 = vld [vmem:[#allocation2 + $0xe1] sm:$0xff] }
 0x2d4   : > { %6227 = vmatprep.mubr.msk.bf16.mxu1 %vm427_vm0, %v9310_v61  ;;  %v4044_v61 = vld [vmem:[#allocation2 + $0xf1] sm:$0xff]  ;;  %v4074_v33 = vmul.f32 %v9316_v39, %v4042_v20 }
 0x2db   : > { %6228 = vmatmul.mubr.msk.bf16.gmra.mrb[4].mxu1 %vm427_vm0, %v4086_v18  ;;  %v4066_v18 = vmul.f32 %v9312_v45, %v4034_v35  ;;  %v4041_v35 = vld [vmem:[#allocation2 + $0xd9] sm:$0xff] }
 0x2dc   : > { %6231 = vmatprep.mubr.msk.bf16.mxu1 %vm427_vm0, %v4087_v34  ;;  %v4035_v34 = vld [vmem:[#allocation2 + $0xa9] sm:$0xff] }
 0x2dd   : > { %v4090_v8 = vpack.c.bf16 %v4066_v18, %v4033_v57  ;;  %v4091_v4 = vpack.c.bf16 %v4068_v41, %v4035_v34  ;;  %v4046_v18 = vld [vmem:[#allocation2 + $0x101] sm:$0xff]  ;;  %v4045_v57 = vld [vmem:[#allocation2 + $0xf9] sm:$0xff] }
 0x2de   : > { %v4078_v41 = vmul.f32 %v9318_v47, %v4046_v18  ;;  %v6761_v47 = vld [vmem:[%s8979_s7 + $0x14] ss:$8 sps:$4 sm:$0xff]  }
 0x2e0   : > { %v4096_v34 = vpack.c.bf16 %v4078_v41, %v4045_v57 }
 0x2e3   : > { %6232 = vmatmul.mubr.msk.bf16.gmra.mrb[8].mxu1 %vm427_vm0, %v9311_v44  ;;  %v4094_v44 = vpack.c.bf16 %v4074_v33, %v4041_v35 }
 0x2e4   : > { %6235 = vmatprep.mubr.msk.bf16.mxu1 %vm427_vm0, %v4089_v31  ;;  %v4076_v31 = vmul.f32 %v9317_v46, %v4044_v61 }
 0x2e6   : > { %v4095_v45 = vpack.c.bf16 %v4076_v31, %v4043_v29 }
 0x2eb   : > { %6236 = vmatmul.mubr.msk.bf16.gmra.mrb[12].mxu1 %vm427_vm0, %v4090_v8  ;;  %v4050_v8 = vld [vmem:[#allocation2 + $0x121] sm:$0xff] }
 0x2ec   : > { %6239 = vmatprep.mubr.msk.bf16.mxu1 %vm427_vm0, %v4091_v4  ;;  %v4082_v4 = vmul.f32 %v9275_v6, %v4050_v8  ;;  %v8603_v6 = vld [vmem:[%s8976_s4] ss:$0 sm:$0xff] }
 0x2ee   : > { %v4098_v1 = vpack.c.bf16 %v4082_v4, %v4049_v58 }
 0x2f3   : > { %6240 = vmatmul.mubr.msk.bf16.gmra.mrb[16].mxu1 %vm427_vm0, %v4092_v36 }
 0x2f4   : > { %6243 = vmatprep.mubr.msk.bf16.mxu1 %vm427_vm0, %v4093_v54 }
 0x2fb   : > { %6244 = vmatmul.mubr.msk.bf16.gmra.mrb[20].mxu1 %vm427_vm0, %v4094_v44 }
 0x2fc   : > { %6247 = vmatprep.mubr.msk.bf16.mxu1 %vm427_vm0, %v4095_v45 }
 0x303   : > { %6248 = vmatmul.mubr.msk.bf16.gmra.mrb[24].mxu1 %vm427_vm0, %v4096_v34 }
 0x304   : > { %6251 = vmatprep.mubr.msk.bf16.mxu1 %vm427_vm0, %v4097_v13 }
 0x30b   : > { %6252 = vmatmul.mubr.msk.bf16.gmra.mrb[28].mxu1 %vm427_vm0, %v4098_v1 }
 0x3a6   : > { %v6225_v9 = vpop.f32.mrb[0].mxu1 }
 0x3a7   : > { %v6255_v0 = vadd.f32 %v6225_v9, %v8397_v25  ;;  %v4214_v42 = vpop.f32.mrb[1].mxu1 }
 0x3a8   : > { %v6256_v13 = vadd.f32 %v4214_v42, %v8403_v60  ;;  %v6226_v32 = vpop.f32.mrb[2].mxu1 }
 0x3a9   : > { %v4382_v59 = vadd.f32 %v6255_v0, %v8603_v6  ;;  %v6257_v36 = vadd.f32 %v6226_v32, %v8405_v19  ;;  %v4217_v51 = vpop.f32.mrb[3].mxu1  ;;  %v6756_v19 = vld [vmem:[%s8979_s7] ss:$8 sps:$4 sm:$0xff]  }
 0x3aa   : > { %v4380_v54 = vadd.f32 %v6256_v13, %v8603_v6  ;;  %v6258_v20 = vadd.f32 %v4217_v51, %v8407_v53 }
 0x3ab   : > { %v4383_v61 = vadd.f32 %v6257_v36, %v8603_v6  ;;  %v4414_v33 = vmax.f32 %v4382_v59, 0.0  ;;  %v6762_v59 = vld [vmem:[%s8979_s7 + $0x20] ss:$8 sps:$4 sm:$0xff]  }
 0x3ac   : > { %v4381_v39 = vadd.f32 %v6258_v20, %v8603_v6  ;;  %v4412_v25 = vmax.f32 %v4380_v54, 0.0  ;;  %v6767_v20 = vld [vmem:[%s8979_s7 + $0x34] ss:$8 sps:$4 sm:$0xff]  }
 0x3ad   : > { %v4415_v46 = vmax.f32 %v4383_v61, 0.0 }
 0x3ae   : > { %v4413_v31 = vmax.f32 %v4381_v39, 0.0  ;;  %v6229_v35 = vpop.f32.mrb[4].mxu1 }
 0x3af   : > { %v4445_v60 = vpack.c.bf16 %v4415_v46, %v4414_v33  ;;  %v6259_v44 = vadd.f32 %v6229_v35, %v8413_v55  ;;  %v4230_v29 = vpop.f32.mrb[5].mxu1 }
 0x3b0   : > { %v4444_v45 = vpack.c.bf16 %v4413_v31, %v4412_v25  ;;  %v6260_v53 = vadd.f32 %v4230_v29, %v8419_v52  ;;  %v6230_v18 = vpop.f32.mrb[6].mxu1  ;;  %v6759_v52 = vld [vmem:[%s8979_s7 + $0x10] ss:$8 sps:$4 sm:$0xff]  }
 0x3b1   : > { %v4386_v41 = vadd.f32 %v6259_v44, %v8603_v6  ;;  %v6261_v57 = vadd.f32 %v6230_v18, %v8421_v11  ;;  %v4233_v8 = vpop.f32.mrb[7].mxu1  ;;  %v6764_v11 = vld [vmem:[%s8979_s7 + $0x24] ss:$8 sps:$4 sm:$0xff]  }
 0x3b2   : > { %v4384_v55 = vadd.f32 %v6260_v53, %v8603_v6  ;;  %v6262_v34 = vadd.f32 %v4233_v8, %v8423_v26  ;;  %5608 = vmatmul.mubr.msk.bf16.vlgmr.msra.gmra.mrb[64].mxu0 %vm427_vm0, %v4444_v45 }
 0x3b3   : > { %v4387_v4 = vadd.f32 %v6261_v57, %v8603_v6  ;;  %4810 = vmatpush1.bf16.msra.mxu0 %v6756_v19  ;;  %4610 = vmatprep.mubr.bf16.mxu0 %v6905_v23  ;;  %v4418_v1 = vmax.f32 %v4386_v41, 0.0 }
 0x3b4   : > { %v4385_v58 = vadd.f32 %v6262_v34, %v8603_v6  ;;  %4811 = vmatprep.subr.bf16.mxu0 %v6761_v47  ;;  %v4416_v63 = vmax.f32 %v4384_v55, 0.0 }
 0x3b5   : > { %v4419_v26 = vmax.f32 %v4387_v4, 0.0 }
 0x3b6   : > { %v4417_v9 = vmax.f32 %v4385_v58, 0.0  ;;  %v6233_v0 = vpop.f32.mrb[8].mxu1 }
 0x3b7   : > { %v4447_v42 = vpack.c.bf16 %v4419_v26, %v4418_v1  ;;  %v6263_v13 = vadd.f32 %v6233_v0, %v8429_v7  ;;  %v4246_v32 = vpop.f32.mrb[9].mxu1  ;;  %4812 = vmatpush1.bf16.msra.mxu0 %v6759_v52 }
 0x3b8   : > { %v4446_v36 = vpack.c.bf16 %v4417_v9, %v4416_v63  ;;  %v6264_v51 = vadd.f32 %v4246_v32, %v8435_v17  ;;  %v6234_v54 = vpop.f32.mrb[10].mxu1  ;;  %4813 = vmatprep.subr.bf16.mxu0 %v6764_v11  ;;  %v6765_v17 = vld [vmem:[%s8979_s7 + $0x30] ss:$8 sps:$4 sm:$0xff]  }
 0x3b9   : > { %v4390_v61 = vadd.f32 %v6263_v13, %v8603_v6  ;;  %v6265_v39 = vadd.f32 %v6234_v54, %v8437_v56  ;;  %v4249_v7 = vpop.f32.mrb[11].mxu1 }
 0x3ba   : > { %v4388_v33 = vadd.f32 %v6264_v51, %v8603_v6  ;;  %v6266_v46 = vadd.f32 %v4249_v7, %v8439_v2  ;;  %5609 = vmatmul.mubr.msk.bf16.gmra.mrb[68].mxu0 %vm427_vm0, %v4445_v60 }
 0x3bb   : > { %v4391_v25 = vadd.f32 %v6265_v39, %v8603_v6  ;;  %4620 = vmatprep.mubr.bf16.mxu0 %v6905_v23  ;;  %4814 = vmatpush1.bf16.msra.mxu0 %v6762_v59  ;;  %v4422_v56 = vmax.f32 %v4390_v61, 0.0 }
 0x3bc   : > { %v4389_v31 = vadd.f32 %v6266_v46, %v8603_v6  ;;  %4815 = vmatprep.subr.bf16.mxu0 %v6767_v20  ;;  %v4420_v44 = vmax.f32 %v4388_v33, 0.0 }
 0x3bd   : > { %v4423_v35 = vmax.f32 %v4391_v25, 0.0 }
 0x3be   : > { %v4421_v29 = vmax.f32 %v4389_v31, 0.0  ;;  %v6237_v19 = vpop.f32.mrb[12].mxu1 }
 0x3bf   : > { %v8654_v2 = vpack.c.bf16 %v4423_v35, %v4422_v56  ;;  %v6267_v60 = vadd.f32 %v6237_v19, %v8445_v48  ;;  %v4262_v45 = vpop.f32.mrb[13].mxu1  ;;  %4816 = vmatpush1.bf16.msra.mxu0 %v6765_v17 }
 0x3c0   : > { %v4448_v53 = vpack.c.bf16 %v4421_v29, %v4420_v44  ;;  %v6268_v18 = vadd.f32 %v4262_v45, %v8451_v49  ;;  %v6238_v47 = vpop.f32.mrb[14].mxu1 }
 0x3c1   : > { %v4394_v41 = vadd.f32 %v6267_v60, %v8603_v6  ;;  %v6269_v57 = vadd.f32 %v6238_v47, %v8453_v40  ;;  %v4265_v8 = vpop.f32.mrb[15].mxu1 }
 0x3c2   : > { %v4392_v55 = vadd.f32 %v6268_v18, %v8603_v6  ;;  %v6270_v34 = vadd.f32 %v4265_v8, %v8455_v30  ;;  %5610 = vmatmul.mubr.msk.bf16.gmra.mrb[72].mxu0 %vm427_vm0, %v4446_v36 }
 0x3c3   : > { %v4395_v4 = vadd.f32 %v6269_v57, %v8603_v6  ;;  %4630 = vmatprep.mubr.bf16.mxu0 %v6905_v23  ;;  %v4426_v52 = vmax.f32 %v4394_v41, 0.0 }
 0x3c4   : > { %v4393_v48 = vadd.f32 %v6270_v34, %v8603_v6  ;;  %v4424_v58 = vmax.f32 %v4392_v55, 0.0 }
 0x3c5   : > { %v4427_v49 = vmax.f32 %v4395_v4, 0.0 }
 0x3c6   : > { %v4425_v11 = vmax.f32 %v4393_v48, 0.0  ;;  %v6241_v1 = vpop.f32.mrb[16].mxu1 }
 0x3c7   : > { %v8666_v26 = vpack.c.bf16 %v4427_v49, %v4426_v52  ;;  %v6271_v40 = vadd.f32 %v6241_v1, %v8461_v62  ;;  %v4278_v63 = vpop.f32.mrb[17].mxu1 }
 0x3c8   : > { %v8669_v9 = vpack.c.bf16 %v4425_v11, %v4424_v58  ;;  %v6272_v30 = vadd.f32 %v4278_v63, %v8467_v50  ;;  %v6242_v0 = vpop.f32.mrb[18].mxu1 }
 0x3c9   : > { %v4398_v13 = vadd.f32 %v6271_v40, %v8603_v6  ;;  %v6273_v32 = vadd.f32 %v6242_v0, %v8469_v43  ;;  %v4281_v59 = vpop.f32.mrb[19].mxu1 }
 0x3ca   : > { %v4396_v36 = vadd.f32 %v6272_v30, %v8603_v6  ;;  %v6274_v51 = vadd.f32 %v4281_v59, %v8472_v16  ;;  %5611 = vmatmul.mubr.msk.bf16.gmra.mrb[76].mxu0 %vm427_vm0, %v4447_v42 }
 0x3cb   : > { %v4399_v54 = vadd.f32 %v6273_v32, %v8603_v6  ;;  %4640 = vmatprep.mubr.bf16.mxu0 %v6905_v23  ;;  %v4430_v20 = vmax.f32 %v4398_v13, 0.0 }
 0x3cc   : > { %v4397_v62 = vadd.f32 %v6274_v51, %v8603_v6  ;;  %v4428_v61 = vmax.f32 %v4396_v36, 0.0 }
 0x3cd   : > { %v4431_v50 = vmax.f32 %v4399_v54, 0.0 }
 0x3ce   : > { %v4429_v39 = vmax.f32 %v4397_v62, 0.0  ;;  %v6245_v7 = vpop.f32.mrb[20].mxu1 }
 0x3cf   : > { %v8680_v33 = vpack.c.bf16 %v4431_v50, %v4430_v20  ;;  %v6275_v43 = vadd.f32 %v6245_v7, %v8475_v3  ;;  %v4294_v46 = vpop.f32.mrb[21].mxu1  ;;  %v9325_v7 = vld [vmem:[#allocation19_spill] sm:$0xff] }
 0x3d0   : > { %v4452_v25 = vpack.c.bf16 %v4429_v39, %v4428_v61  ;;  %v6276_v16 = vadd.f32 %v4294_v46, %v8485_v38  ;;  %v6246_v42 = vpop.f32.mrb[22].mxu1  ;;  %v9323_v61 = vld [vmem:[#allocation17_spill] sm:$0xff]  ;;  %v9324_v39 = vld [vmem:[#allocation18_spill] sm:$0xff] }
 0x3d1   : > { %v4402_v17 = vadd.f32 %v6275_v43, %v8603_v6  ;;  %v6277_v31 = vadd.f32 %v6246_v42, %v8490_v10  ;;  %v4297_v56 = vpop.f32.mrb[23].mxu1  ;;  %v9327_v43 = vld [vmem:[#allocation21_spill] sm:$0xff]  ;;  %v9328_v46 = vld [vmem:[#allocation22_spill] sm:$0xff] }
 0x3d2   : > { %v4400_v35 = vadd.f32 %v6276_v16, %v8603_v6  ;;  %v6278_v44 = vadd.f32 %v4297_v56, %v8492_v27  ;;  %5612 = vmatmul.mubr.msk.bf16.gmra.mrb[80].mxu0 %vm427_vm0, %v4448_v53  ;;  %v9330_v16 = vld [vmem:[#allocation24_spill] sm:$0xff]  ;;  %v9331_v42 = vld [vmem:[#allocation25_spill] sm:$0xff] }
 0x3d3   : > { %v4403_v29 = vadd.f32 %v6277_v31, %v8603_v6  ;;  %4650 = vmatprep.mubr.bf16.mxu0 %v6905_v23  ;;  %v4434_v19 = vmax.f32 %v4402_v17, 0.0  ;;  %v9332_v17 = vld [vmem:[#allocation26_spill] sm:$0xff]  ;;  %v9333_v31 = vld [vmem:[#allocation27_spill] sm:$0xff]  ;;  %v9334_v56 = vld [vmem:[#allocation28_spill] sm:$0xff] }
 0x3d4   : > { %v4401_v3 = vadd.f32 %v6278_v44, %v8603_v6  ;;  %v4432_v60 = vmax.f32 %v4400_v35, 0.0  ;;  %v4472_v35 = vsub.s32 0, %v9229_v24  ;;  %v4468_v44 = vld [vmem:[%s8978_s6] sm:$0x3] }
 0x3d5   : > { %v4435_v38 = vmax.f32 %v4403_v29, 0.0  ;;  %v4476_v29 = vsub.s32 1, %v9229_v24 }
 0x3d6   : > { %v4433_v45 = vmax.f32 %v4401_v3, 0.0  ;;  %v6249_v18 = vpop.f32.mrb[24].mxu1  ;;  %v8786_v3 = vrot.slane %v4468_v44, %v4472_v35 }
 0x3d7   : > { %v4455_v47 = vpack.c.bf16 %v4435_v38, %v4434_v19  ;;  %v6279_v10 = vadd.f32 %v6249_v18, %v8508_v37  ;;  %v4310_v41 = vpop.f32.mrb[25].mxu1  ;;  %v8788_v19 = vrot.slane %v4468_v44, %v4476_v29 }
 0x3d8   : > { %v4454_v57 = vpack.c.bf16 %v4433_v45, %v4432_v60  ;;  %v6280_v27 = vadd.f32 %v4310_v41, %v8515_v22  ;;  %v6250_v8 = vpop.f32.mrb[26].mxu1 }
 0x3d9   : > { %v4406_v53 = vadd.f32 %v6279_v10, %v8603_v6  ;;  %v6281_v55 = vadd.f32 %v6250_v8, %v8517_v14  ;;  %v4313_v34 = vpop.f32.mrb[27].mxu1 }
 0x3da   : > { %v4404_v4 = vadd.f32 %v6280_v27, %v8603_v6  ;;  %v6282_v48 = vadd.f32 %v4313_v34, %v8522_v12  ;;  %5613 = vmatmul.mubr.msk.bf16.gmra.mrb[84].mxu0 %vm427_vm0, %v8654_v2 }
 0x3db   : > { %v4407_v52 = vadd.f32 %v6281_v55, %v8603_v6  ;;  %4660 = vmatprep.mubr.bf16.mxu0 %v6905_v23  ;;  %v4438_v22 = vmax.f32 %v4406_v53, 0.0 }
 0x3dc   : > { %v4405_v37 = vadd.f32 %v6282_v48, %v8603_v6  ;;  %v4436_v58 = vmax.f32 %v4404_v4, 0.0 }
 0x3dd   : > { %v4439_v49 = vmax.f32 %v4407_v52, 0.0 }
 0x3de   : > { %v4437_v11 = vmax.f32 %v4405_v37, 0.0  ;;  %v6253_v1 = vpop.f32.mrb[28].mxu1 }
 0x3df   : > { %v4457_v14 = vpack.c.bf16 %v4439_v49, %v4438_v22  ;;  %v6283_v40 = vadd.f32 %v6253_v1, %v8531_v15  ;;  %v4326_v63 = vpop.f32.mrb[29].mxu1 }
 0x3e0   : > { %v4456_v30 = vpack.c.bf16 %v4437_v11, %v4436_v58  ;;  %v6284_v12 = vadd.f32 %v4326_v63, %v8534_v5  ;;  %v6254_v0 = vpop.f32.mrb[30].mxu1 }
 0x3e1   : > { %v4410_v2 = vadd.f32 %v6283_v40, %v8603_v6  ;;  %v6285_v13 = vadd.f32 %v6254_v0, %v8536_v21  ;;  %v4329_v32 = vpop.f32.mrb[31].mxu1 }
 0x3e2   : > { %v4408_v59 = vadd.f32 %v6284_v12, %v8603_v6  ;;  %v6286_v36 = vadd.f32 %v4329_v32, %v8538_v28  ;;  %5614 = vmatmul.mubr.msk.bf16.gmra.mrb[88].mxu0 %vm427_vm0, %v8669_v9  ;;  %v9319_v28 = vld [vmem:[#allocation13_spill] sm:$0xff]  ;;  %v9322_v9 = vld [vmem:[#allocation16_spill] sm:$0xff] }
 0x3e3   : > { %v4411_v51 = vadd.f32 %v6285_v13, %v8603_v6  ;;  %4670 = vmatprep.mubr.bf16.mxu0 %v6905_v23  ;;  %v4442_v5 = vmax.f32 %v4410_v2, 0.0 }
 0x3e4   : > { %v4409_v15 = vadd.f32 %v6286_v36, %v8603_v6  ;;  %v4440_v62 = vmax.f32 %v4408_v59, 0.0  ;;  %v9320_v6 = vld [vmem:[#allocation14_spill] sm:$0xff] }
 0x3e5   : > { %v4443_v54 = vmax.f32 %v4411_v51, 0.0 }
 0x3e6   : > { %v4441_v20 = vmax.f32 %v4409_v15, 0.0 }
 0x3e7   : > { %v4459_v50 = vpack.c.bf16 %v4443_v54, %v4442_v5 }
 0x3e8   : > { %v4458_v21 = vpack.c.bf16 %v4441_v20, %v4440_v62 }
 0x3ea   : > { %5615 = vmatmul.mubr.msk.bf16.gmra.mrb[92].mxu0 %vm427_vm0, %v8666_v26  ;;  %v9321_v26 = vld [vmem:[#allocation15_spill] sm:$0xff] }
 0x3eb   : > { %4680 = vmatprep.mubr.bf16.mxu0 %v6905_v23 }
 0x3f2   : > { %5616 = vmatmul.mubr.msk.bf16.gmra.mrb[96].mxu0 %vm427_vm0, %v4452_v25  ;;  %v9329_v25 = vld [vmem:[#allocation23_spill] sm:$0xff] }
 0x3f3   : > { %4690 = vmatprep.mubr.bf16.mxu0 %v6905_v23 }
 0x3fa   : > { %5617 = vmatmul.mubr.msk.bf16.gmra.mrb[100].mxu0 %vm427_vm0, %v8680_v33  ;;  %v9326_v33 = vld [vmem:[#allocation20_spill] sm:$0xff] }
 0x3fb   : > { %4700 = vmatprep.mubr.bf16.mxu0 %v6905_v23 }
 0x402   : > { %5618 = vmatmul.mubr.msk.bf16.gmra.mrb[104].mxu0 %vm427_vm0, %v4454_v57 }
 0x403   : > { %4710 = vmatprep.mubr.bf16.mxu0 %v6905_v23 }
 0x40a   : > { %5619 = vmatmul.mubr.msk.bf16.gmra.mrb[108].mxu0 %vm427_vm0, %v4455_v47 }
 0x40b   : > { %4720 = vmatprep.mubr.bf16.mxu0 %v6905_v23 }
 0x412   : > { %5620 = vmatmul.mubr.msk.bf16.gmra.mrb[112].mxu0 %vm427_vm0, %v4456_v30 }
 0x413   : > { %4730 = vmatprep.mubr.bf16.mxu0 %v6905_v23 }
 0x41a   : > { %5621 = vmatmul.mubr.msk.bf16.gmra.mrb[116].mxu0 %vm427_vm0, %v4457_v14 }
 0x41b   : > { %4740 = vmatprep.mubr.bf16.mxu0 %v6905_v23 }
 0x422   : > { %5622 = vmatmul.mubr.msk.bf16.gmra.mrb[120].mxu0 %vm427_vm0, %v4458_v21 }
 0x423   : > { %4750 = vmatprep.mubr.bf16.mxu0 %v6905_v23 }
 0x42a   : > { %5623 = vmatmul.mubr.msk.bf16.gmra.mrb[124].mxu0 %vm427_vm0, %v4459_v50 }
 0x42b   : > { %4841 = vmatprep.mubr.bf16.mxu0 %v6905_v23 }
 0x432   : > { %5632 = vmatmul.mubr.msk.bf16.vlgmr.msra.gmra.mrb[64].mxu0 %vm427_vm0, %v9319_v28 }
 0x433   : > { %4851 = vmatprep.mubr.bf16.mxu0 %v6905_v23 }
 0x43a   : > { %5633 = vmatmul.mubr.msk.bf16.gmra.mrb[68].mxu0 %vm427_vm0, %v9320_v6 }
 0x43b   : > { %4861 = vmatprep.mubr.bf16.mxu0 %v6905_v23 }
 0x442   : > { %5634 = vmatmul.mubr.msk.bf16.gmra.mrb[72].mxu0 %vm427_vm0, %v9321_v26 }
 0x443   : > { %4871 = vmatprep.mubr.bf16.mxu0 %v6905_v23 }
 0x44a   : > { %5635 = vmatmul.mubr.msk.bf16.gmra.mrb[76].mxu0 %vm427_vm0, %v9322_v9 }
 0x44b   : > { %4881 = vmatprep.mubr.bf16.mxu0 %v6905_v23 }
 0x452   : > { %5636 = vmatmul.mubr.msk.bf16.gmra.mrb[80].mxu0 %vm427_vm0, %v9323_v61 }
 0x453   : > { %4891 = vmatprep.mubr.bf16.mxu0 %v6905_v23 }
 0x45a   : > { %5637 = vmatmul.mubr.msk.bf16.gmra.mrb[84].mxu0 %vm427_vm0, %v9324_v39 }
 0x45b   : > { %4901 = vmatprep.mubr.bf16.mxu0 %v6905_v23 }
 0x462   : > { %5638 = vmatmul.mubr.msk.bf16.gmra.mrb[88].mxu0 %vm427_vm0, %v9325_v7 }
 0x463   : > { %4911 = vmatprep.mubr.bf16.mxu0 %v6905_v23 }
 0x46a   : > { %5639 = vmatmul.mubr.msk.bf16.gmra.mrb[92].mxu0 %vm427_vm0, %v9326_v33 }
 0x46b   : > { %4921 = vmatprep.mubr.bf16.mxu0 %v6905_v23 }
 0x472   : > { %5640 = vmatmul.mubr.msk.bf16.gmra.mrb[96].mxu0 %vm427_vm0, %v9327_v43 }
 0x473   : > { %4931 = vmatprep.mubr.bf16.mxu0 %v6905_v23 }
 0x47a   : > { %5641 = vmatmul.mubr.msk.bf16.gmra.mrb[100].mxu0 %vm427_vm0, %v9328_v46 }
 0x47b   : > { %4941 = vmatprep.mubr.bf16.mxu0 %v6905_v23 }
 0x482   : > { %5642 = vmatmul.mubr.msk.bf16.gmra.mrb[104].mxu0 %vm427_vm0, %v9329_v25 }
 0x483   : > { %4951 = vmatprep.mubr.bf16.mxu0 %v6905_v23 }
 0x48a   : > { %5643 = vmatmul.mubr.msk.bf16.gmra.mrb[108].mxu0 %vm427_vm0, %v9330_v16 }
 0x48b   : > { %4961 = vmatprep.mubr.bf16.mxu0 %v6905_v23 }
 0x492   : > { %5644 = vmatmul.mubr.msk.bf16.gmra.mrb[112].mxu0 %vm427_vm0, %v9331_v42 }
 0x493   : > { %4971 = vmatprep.mubr.bf16.mxu0 %v6905_v23 }
 0x49a   : > { %5645 = vmatmul.mubr.msk.bf16.gmra.mrb[116].mxu0 %vm427_vm0, %v9332_v17 }
 0x49b   : > { %4981 = vmatprep.mubr.bf16.mxu0 %v6905_v23 }
 0x4a2   : > { %5646 = vmatmul.mubr.msk.bf16.gmra.mrb[120].mxu0 %vm427_vm0, %v9333_v31 }
 0x4a3   : > { %4991 = vmatprep.mubr.bf16.mxu0 %v6905_v23 }
 0x4aa   : > { %5647 = vmatmul.mubr.msk.bf16.gmra.mrb[124].mxu0 %vm427_vm0, %v9334_v56 }
 0x505   : > { %v4843_v38 = vpop.f32.mrb[64].mxu0 }
 0x506   : > { %v6287_v60 = vadd.f32 %v4843_v38, %v8786_v3  ;;  %v4845_v23 = vpop.f32.mrb[65].mxu0 }
 0x507   : > { %v6288_v45 = vadd.f32 %v4845_v23, %v8788_v19  ;;  %v4847_v18 = vpop.f32.mrb[66].mxu0 }
 0x508   : > { %v5066_v47 = vmax.f32 %v6287_v60, 0.0  ;;  %v6289_v10 = vadd.f32 %v4847_v18, %v8786_v3  ;;  %v4849_v41 = vpop.f32.mrb[67].mxu0 }
 0x509   : > { %v5067_v57 = vmax.f32 %v6288_v45, 0.0  ;;  %v6290_v27 = vadd.f32 %v4849_v41, %v8788_v19 }
 0x50a   : > { %5130 = vst [vmem:[%s8795_s22] sm:$0xff] %v5066_v47  ;;  %v5068_v24 = vmax.f32 %v6289_v10, 0.0 }
 0x50b   : > { %5131 = vst [vmem:[%s8795_s22 + $0x8] sm:$0xff] %v5067_v57  ;;  %v5069_v8 = vmax.f32 %v6290_v27, 0.0 }
 0x50c   : > { %5132 = vst [vmem:[%s8795_s22 + $0x10] sm:$0xff] %v5068_v24 }
 0x50d   : > { %5133 = vst [vmem:[%s8795_s22 + $0x18] sm:$0xff] %v5069_v8  ;;  %v4853_v53 = vpop.f32.mrb[68].mxu0 }
 0x50e   : > { %v6291_v55 = vadd.f32 %v4853_v53, %v8786_v3  ;;  %v4855_v34 = vpop.f32.mrb[69].mxu0 }
 0x50f   : > { %v6292_v4 = vadd.f32 %v4855_v34, %v8788_v19  ;;  %v4857_v48 = vpop.f32.mrb[70].mxu0 }
 0x510   : > { %v5070_v52 = vmax.f32 %v6291_v55, 0.0  ;;  %v6293_v37 = vadd.f32 %v4857_v48, %v8786_v3  ;;  %v4859_v22 = vpop.f32.mrb[71].mxu0 }
 0x511   : > { %v5071_v49 = vmax.f32 %v6292_v4, 0.0  ;;  %v6294_v58 = vadd.f32 %v4859_v22, %v8788_v19 }
 0x512   : > { %5134 = vst [vmem:[%s8795_s22 + $0x20] sm:$0xff] %v5070_v52  ;;  %v5072_v11 = vmax.f32 %v6293_v37, 0.0 }
 0x513   : > { %5135 = vst [vmem:[%s8795_s22 + $0x28] sm:$0xff] %v5071_v49  ;;  %v5073_v1 = vmax.f32 %v6294_v58, 0.0 }
 0x514   : > { %5136 = vst [vmem:[%s8795_s22 + $0x30] sm:$0xff] %v5072_v11 }
 0x515   : > { %5137 = vst [vmem:[%s8795_s22 + $0x38] sm:$0xff] %v5073_v1  ;;  %v4863_v14 = vpop.f32.mrb[72].mxu0 }
 0x516   : > { %v6295_v40 = vadd.f32 %v4863_v14, %v8786_v3  ;;  %v4865_v63 = vpop.f32.mrb[73].mxu0 }
 0x517   : > { %v6296_v30 = vadd.f32 %v4865_v63, %v8788_v19  ;;  %v4867_v12 = vpop.f32.mrb[74].mxu0 }
 0x518   : > { %v5074_v0 = vmax.f32 %v6295_v40, 0.0  ;;  %v6297_v2 = vadd.f32 %v4867_v12, %v8786_v3  ;;  %v4869_v13 = vpop.f32.mrb[75].mxu0 }
 0x519   : > { %v5075_v32 = vmax.f32 %v6296_v30, 0.0  ;;  %v6298_v59 = vadd.f32 %v4869_v13, %v8788_v19 }
 0x51a   : > { %5138 = vst [vmem:[%s8795_s22 + $0x40] sm:$0xff] %v5074_v0  ;;  %v5076_v36 = vmax.f32 %v6297_v2, 0.0 }
 0x51b   : > { %5139 = vst [vmem:[%s8795_s22 + $0x48] sm:$0xff] %v5075_v32  ;;  %v5077_v51 = vmax.f32 %v6298_v59, 0.0 }
 0x51c   : > { %5140 = vst [vmem:[%s8795_s22 + $0x50] sm:$0xff] %v5076_v36 }
 0x51d   : > { %5141 = vst [vmem:[%s8795_s22 + $0x58] sm:$0xff] %v5077_v51  ;;  %v4873_v15 = vpop.f32.mrb[76].mxu0 }
 0x51e   : > { %v6299_v5 = vadd.f32 %v4873_v15, %v8786_v3  ;;  %v4875_v54 = vpop.f32.mrb[77].mxu0 }
 0x51f   : > { %v6300_v62 = vadd.f32 %v4875_v54, %v8788_v19  ;;  %v4877_v20 = vpop.f32.mrb[78].mxu0 }
 0x520   : > { %v5078_v50 = vmax.f32 %v6299_v5, 0.0  ;;  %v6301_v21 = vadd.f32 %v4877_v20, %v8786_v3  ;;  %v4879_v28 = vpop.f32.mrb[79].mxu0 }
 0x521   : > { %v5079_v6 = vmax.f32 %v6300_v62, 0.0  ;;  %v6302_v26 = vadd.f32 %v4879_v28, %v8788_v19 }
 0x522   : > { %5142 = vst [vmem:[%s8795_s22 + $0x60] sm:$0xff] %v5078_v50  ;;  %v5080_v9 = vmax.f32 %v6301_v21, 0.0 }
 0x523   : > { %5143 = vst [vmem:[%s8795_s22 + $0x68] sm:$0xff] %v5079_v6  ;;  %v5081_v61 = vmax.f32 %v6302_v26, 0.0 }
 0x524   : > { %5144 = vst [vmem:[%s8795_s22 + $0x70] sm:$0xff] %v5080_v9 }
 0x525   : > { %5145 = vst [vmem:[%s8795_s22 + $0x78] sm:$0xff] %v5081_v61  ;;  %v4883_v39 = vpop.f32.mrb[80].mxu0 }
 0x526   : > { %v6303_v7 = vadd.f32 %v4883_v39, %v8786_v3  ;;  %v4885_v33 = vpop.f32.mrb[81].mxu0 }
 0x527   : > { %v6304_v43 = vadd.f32 %v4885_v33, %v8788_v19  ;;  %v4887_v46 = vpop.f32.mrb[82].mxu0 }
 0x528   : > { %v5082_v25 = vmax.f32 %v6303_v7, 0.0  ;;  %v6305_v16 = vadd.f32 %v4887_v46, %v8786_v3  ;;  %v4889_v42 = vpop.f32.mrb[83].mxu0 }
 0x529   : > { %v5083_v17 = vmax.f32 %v6304_v43, 0.0  ;;  %v6306_v31 = vadd.f32 %v4889_v42, %v8788_v19 }
 0x52a   : > { %5146 = vst [vmem:[%s8795_s22 + $0x80] sm:$0xff] %v5082_v25  ;;  %v5084_v56 = vmax.f32 %v6305_v16, 0.0 }
 0x52b   : > { %5147 = vst [vmem:[%s8795_s22 + $0x88] sm:$0xff] %v5083_v17  ;;  %v5085_v35 = vmax.f32 %v6306_v31, 0.0 }
 0x52c   : > { %5148 = vst [vmem:[%s8795_s22 + $0x90] sm:$0xff] %v5084_v56 }
 0x52d   : > { %5149 = vst [vmem:[%s8795_s22 + $0x98] sm:$0xff] %v5085_v35  ;;  %v4893_v44 = vpop.f32.mrb[84].mxu0 }
 0x52e   : > { %v6307_v29 = vadd.f32 %v4893_v44, %v8786_v3  ;;  %v4895_v38 = vpop.f32.mrb[85].mxu0 }
 0x52f   : > { %v6308_v60 = vadd.f32 %v4895_v38, %v8788_v19  ;;  %v4897_v23 = vpop.f32.mrb[86].mxu0 }
 0x530   : > { %v5086_v45 = vmax.f32 %v6307_v29, 0.0  ;;  %v6309_v18 = vadd.f32 %v4897_v23, %v8786_v3  ;;  %v4899_v47 = vpop.f32.mrb[87].mxu0 }
 0x531   : > { %v5087_v10 = vmax.f32 %v6308_v60, 0.0  ;;  %v6310_v41 = vadd.f32 %v4899_v47, %v8788_v19 }
 0x532   : > { %5150 = vst [vmem:[%s8795_s22 + $0xa0] sm:$0xff] %v5086_v45  ;;  %v5088_v57 = vmax.f32 %v6309_v18, 0.0 }
 0x533   : > { %5151 = vst [vmem:[%s8795_s22 + $0xa8] sm:$0xff] %v5087_v10  ;;  %v5089_v27 = vmax.f32 %v6310_v41, 0.0 }
 0x534   : > { %5152 = vst [vmem:[%s8795_s22 + $0xb0] sm:$0xff] %v5088_v57 }
 0x535   : > { %5153 = vst [vmem:[%s8795_s22 + $0xb8] sm:$0xff] %v5089_v27  ;;  %v4903_v24 = vpop.f32.mrb[88].mxu0 }
 0x536   : > { %v6311_v8 = vadd.f32 %v4903_v24, %v8786_v3  ;;  %v4905_v53 = vpop.f32.mrb[89].mxu0 }
 0x537   : > { %v6312_v55 = vadd.f32 %v4905_v53, %v8788_v19  ;;  %v4907_v34 = vpop.f32.mrb[90].mxu0 }
 0x538   : > { %v5090_v4 = vmax.f32 %v6311_v8, 0.0  ;;  %v6313_v48 = vadd.f32 %v4907_v34, %v8786_v3  ;;  %v4909_v52 = vpop.f32.mrb[91].mxu0 }
 0x539   : > { %v5091_v37 = vmax.f32 %v6312_v55, 0.0  ;;  %v6314_v22 = vadd.f32 %v4909_v52, %v8788_v19 }
 0x53a   : > { %5154 = vst [vmem:[%s8795_s22 + $0xc0] sm:$0xff] %v5090_v4  ;;  %v5092_v49 = vmax.f32 %v6313_v48, 0.0 }
 0x53b   : > { %5155 = vst [vmem:[%s8795_s22 + $0xc8] sm:$0xff] %v5091_v37  ;;  %v5093_v58 = vmax.f32 %v6314_v22, 0.0 }
 0x53c   : > { %5156 = vst [vmem:[%s8795_s22 + $0xd0] sm:$0xff] %v5092_v49 }
 0x53d   : > { %5157 = vst [vmem:[%s8795_s22 + $0xd8] sm:$0xff] %v5093_v58  ;;  %v4913_v11 = vpop.f32.mrb[92].mxu0 }
 0x53e   : > { %v6315_v1 = vadd.f32 %v4913_v11, %v8786_v3  ;;  %v4915_v14 = vpop.f32.mrb[93].mxu0 }
 0x53f   : > { %v6316_v40 = vadd.f32 %v4915_v14, %v8788_v19  ;;  %v4917_v63 = vpop.f32.mrb[94].mxu0 }
 0x540   : > { %v5094_v30 = vmax.f32 %v6315_v1, 0.0  ;;  %v6317_v12 = vadd.f32 %v4917_v63, %v8786_v3  ;;  %v4919_v0 = vpop.f32.mrb[95].mxu0 }
 0x541   : > { %v5095_v2 = vmax.f32 %v6316_v40, 0.0  ;;  %v6318_v13 = vadd.f32 %v4919_v0, %v8788_v19 }
 0x542   : > { %5158 = vst [vmem:[%s8795_s22 + $0xe0] sm:$0xff] %v5094_v30  ;;  %v5096_v32 = vmax.f32 %v6317_v12, 0.0 }
 0x543   : > { %5159 = vst [vmem:[%s8795_s22 + $0xe8] sm:$0xff] %v5095_v2  ;;  %v5097_v59 = vmax.f32 %v6318_v13, 0.0 }
 0x544   : > { %5160 = vst [vmem:[%s8795_s22 + $0xf0] sm:$0xff] %v5096_v32 }
 0x545   : > { %5161 = vst [vmem:[%s8795_s22 + $0xf8] sm:$0xff] %v5097_v59  ;;  %v4923_v36 = vpop.f32.mrb[96].mxu0 }
 0x546   : > { %v6319_v51 = vadd.f32 %v4923_v36, %v8786_v3  ;;  %v4925_v15 = vpop.f32.mrb[97].mxu0 }
 0x547   : > { %v6320_v5 = vadd.f32 %v4925_v15, %v8788_v19  ;;  %v4927_v54 = vpop.f32.mrb[98].mxu0 }
 0x548   : > { %v5098_v62 = vmax.f32 %v6319_v51, 0.0  ;;  %v6321_v20 = vadd.f32 %v4927_v54, %v8786_v3  ;;  %v4929_v50 = vpop.f32.mrb[99].mxu0 }
 0x549   : > { %v5099_v21 = vmax.f32 %v6320_v5, 0.0  ;;  %v6322_v28 = vadd.f32 %v4929_v50, %v8788_v19 }
 0x54a   : > { %5162 = vst [vmem:[%s8795_s22 + $0x100] sm:$0xff] %v5098_v62  ;;  %v5100_v6 = vmax.f32 %v6321_v20, 0.0 }
 0x54b   : > { %5163 = vst [vmem:[%s8795_s22 + $0x108] sm:$0xff] %v5099_v21  ;;  %v5101_v26 = vmax.f32 %v6322_v28, 0.0 }
 0x54c   : > { %5164 = vst [vmem:[%s8795_s22 + $0x110] sm:$0xff] %v5100_v6 }
 0x54d   : > { %5165 = vst [vmem:[%s8795_s22 + $0x118] sm:$0xff] %v5101_v26  ;;  %v4933_v9 = vpop.f32.mrb[100].mxu0 }
 0x54e   : > { %v6323_v61 = vadd.f32 %v4933_v9, %v8786_v3  ;;  %v4935_v39 = vpop.f32.mrb[101].mxu0 }
 0x54f   : > { %v6324_v7 = vadd.f32 %v4935_v39, %v8788_v19  ;;  %v4937_v33 = vpop.f32.mrb[102].mxu0 }
 0x550   : > { %v5102_v43 = vmax.f32 %v6323_v61, 0.0  ;;  %v6325_v46 = vadd.f32 %v4937_v33, %v8786_v3  ;;  %v4939_v25 = vpop.f32.mrb[103].mxu0 }
 0x551   : > { %v5103_v16 = vmax.f32 %v6324_v7, 0.0  ;;  %v6326_v42 = vadd.f32 %v4939_v25, %v8788_v19 }
 0x552   : > { %5166 = vst [vmem:[%s8795_s22 + $0x120] sm:$0xff] %v5102_v43  ;;  %v5104_v17 = vmax.f32 %v6325_v46, 0.0 }
 0x553   : > { %5167 = vst [vmem:[%s8795_s22 + $0x128] sm:$0xff] %v5103_v16  ;;  %v5105_v31 = vmax.f32 %v6326_v42, 0.0 }
 0x554   : > { %5168 = vst [vmem:[%s8795_s22 + $0x130] sm:$0xff] %v5104_v17 }
 0x555   : > { %5169 = vst [vmem:[%s8795_s22 + $0x138] sm:$0xff] %v5105_v31  ;;  %v4943_v56 = vpop.f32.mrb[104].mxu0 }
 0x556   : > { %v6327_v35 = vadd.f32 %v4943_v56, %v8786_v3  ;;  %v4945_v44 = vpop.f32.mrb[105].mxu0 }
 0x557   : > { %v6328_v29 = vadd.f32 %v4945_v44, %v8788_v19  ;;  %v4947_v38 = vpop.f32.mrb[106].mxu0 }
 0x558   : > { %v5106_v60 = vmax.f32 %v6327_v35, 0.0  ;;  %v6329_v23 = vadd.f32 %v4947_v38, %v8786_v3  ;;  %v4949_v45 = vpop.f32.mrb[107].mxu0 }
 0x559   : > { %v5107_v18 = vmax.f32 %v6328_v29, 0.0  ;;  %v6330_v47 = vadd.f32 %v4949_v45, %v8788_v19 }
 0x55a   : > { %5170 = vst [vmem:[%s8795_s22 + $0x140] sm:$0xff] %v5106_v60  ;;  %v5108_v10 = vmax.f32 %v6329_v23, 0.0 }
 0x55b   : > { %5171 = vst [vmem:[%s8795_s22 + $0x148] sm:$0xff] %v5107_v18  ;;  %v5109_v41 = vmax.f32 %v6330_v47, 0.0 }
 0x55c   : > { %5172 = vst [vmem:[%s8795_s22 + $0x150] sm:$0xff] %v5108_v10 }
 0x55d   : > { %5173 = vst [vmem:[%s8795_s22 + $0x158] sm:$0xff] %v5109_v41  ;;  %v4953_v57 = vpop.f32.mrb[108].mxu0 }
 0x55e   : > { %v6331_v27 = vadd.f32 %v4953_v57, %v8786_v3  ;;  %v4955_v24 = vpop.f32.mrb[109].mxu0 }
 0x55f   : > { %v6332_v8 = vadd.f32 %v4955_v24, %v8788_v19  ;;  %v4957_v53 = vpop.f32.mrb[110].mxu0 }
 0x560   : > { %v5110_v55 = vmax.f32 %v6331_v27, 0.0  ;;  %v6333_v34 = vadd.f32 %v4957_v53, %v8786_v3  ;;  %v4959_v4 = vpop.f32.mrb[111].mxu0 }
 0x561   : > { %v5111_v48 = vmax.f32 %v6332_v8, 0.0  ;;  %v6334_v52 = vadd.f32 %v4959_v4, %v8788_v19 }
 0x562   : > { %5174 = vst [vmem:[%s8795_s22 + $0x160] sm:$0xff] %v5110_v55  ;;  %v5112_v37 = vmax.f32 %v6333_v34, 0.0 }
 0x563   : > { %5175 = vst [vmem:[%s8795_s22 + $0x168] sm:$0xff] %v5111_v48  ;;  %v5113_v22 = vmax.f32 %v6334_v52, 0.0 }
 0x564   : > { %5176 = vst [vmem:[%s8795_s22 + $0x170] sm:$0xff] %v5112_v37 }
 0x565   : > { %5177 = vst [vmem:[%s8795_s22 + $0x178] sm:$0xff] %v5113_v22  ;;  %v4963_v49 = vpop.f32.mrb[112].mxu0 }
 0x566   : > { %v6335_v58 = vadd.f32 %v4963_v49, %v8786_v3  ;;  %v4965_v11 = vpop.f32.mrb[113].mxu0 }
 0x567   : > { %v6336_v1 = vadd.f32 %v4965_v11, %v8788_v19  ;;  %v4967_v14 = vpop.f32.mrb[114].mxu0 }
 0x568   : > { %v5114_v40 = vmax.f32 %v6335_v58, 0.0  ;;  %v6337_v63 = vadd.f32 %v4967_v14, %v8786_v3  ;;  %v4969_v30 = vpop.f32.mrb[115].mxu0 }
 0x569   : > { %v5115_v12 = vmax.f32 %v6336_v1, 0.0  ;;  %v6338_v0 = vadd.f32 %v4969_v30, %v8788_v19 }
 0x56a   : > { %5178 = vst [vmem:[%s8795_s22 + $0x180] sm:$0xff] %v5114_v40  ;;  %v5116_v2 = vmax.f32 %v6337_v63, 0.0 }
 0x56b   : > { %5179 = vst [vmem:[%s8795_s22 + $0x188] sm:$0xff] %v5115_v12  ;;  %v5117_v13 = vmax.f32 %v6338_v0, 0.0 }
 0x56c   : > { %5180 = vst [vmem:[%s8795_s22 + $0x190] sm:$0xff] %v5116_v2 }
 0x56d   : > { %5181 = vst [vmem:[%s8795_s22 + $0x198] sm:$0xff] %v5117_v13  ;;  %v4973_v32 = vpop.f32.mrb[116].mxu0 }
 0x56e   : > { %v6339_v59 = vadd.f32 %v4973_v32, %v8786_v3  ;;  %v4975_v36 = vpop.f32.mrb[117].mxu0 }
 0x56f   : > { %v6340_v51 = vadd.f32 %v4975_v36, %v8788_v19  ;;  %v4977_v15 = vpop.f32.mrb[118].mxu0 }
 0x570   : > { %v5118_v5 = vmax.f32 %v6339_v59, 0.0  ;;  %v6341_v54 = vadd.f32 %v4977_v15, %v8786_v3  ;;  %v4979_v62 = vpop.f32.mrb[119].mxu0 }
 0x571   : > { %v5119_v20 = vmax.f32 %v6340_v51, 0.0  ;;  %v6342_v50 = vadd.f32 %v4979_v62, %v8788_v19 }
 0x572   : > { %5182 = vst [vmem:[%s8795_s22 + $0x1a0] sm:$0xff] %v5118_v5  ;;  %v5120_v21 = vmax.f32 %v6341_v54, 0.0 }
 0x573   : > { %5183 = vst [vmem:[%s8795_s22 + $0x1a8] sm:$0xff] %v5119_v20  ;;  %v5121_v28 = vmax.f32 %v6342_v50, 0.0 }
 0x574   : > { %5184 = vst [vmem:[%s8795_s22 + $0x1b0] sm:$0xff] %v5120_v21 }
 0x575   : > { %5185 = vst [vmem:[%s8795_s22 + $0x1b8] sm:$0xff] %v5121_v28  ;;  %v4983_v6 = vpop.f32.mrb[120].mxu0 }
 0x576   : > { %v6343_v26 = vadd.f32 %v4983_v6, %v8786_v3  ;;  %v4985_v9 = vpop.f32.mrb[121].mxu0 }
 0x577   : > { %v6344_v61 = vadd.f32 %v4985_v9, %v8788_v19  ;;  %v4987_v39 = vpop.f32.mrb[122].mxu0 }
 0x578   : > { %v5122_v7 = vmax.f32 %v6343_v26, 0.0  ;;  %v6345_v33 = vadd.f32 %v4987_v39, %v8786_v3  ;;  %v4989_v43 = vpop.f32.mrb[123].mxu0 }
 0x579   : > { %v5123_v46 = vmax.f32 %v6344_v61, 0.0  ;;  %v6346_v25 = vadd.f32 %v4989_v43, %v8788_v19 }
 0x57a   : > { %5186 = vst [vmem:[%s8795_s22 + $0x1c0] sm:$0xff] %v5122_v7  ;;  %v5124_v16 = vmax.f32 %v6345_v33, 0.0 }
 0x57b   : > { %5187 = vst [vmem:[%s8795_s22 + $0x1c8] sm:$0xff] %v5123_v46  ;;  %v5125_v42 = vmax.f32 %v6346_v25, 0.0 }
 0x57c   : > { %5188 = vst [vmem:[%s8795_s22 + $0x1d0] sm:$0xff] %v5124_v16 }
 0x57d   : > { %5189 = vst [vmem:[%s8795_s22 + $0x1d8] sm:$0xff] %v5125_v42  ;;  %v4993_v17 = vpop.f32.mrb[124].mxu0 }
 0x57e   : > { %v6347_v31 = vadd.f32 %v4993_v17, %v8786_v3  ;;  %v4995_v56 = vpop.f32.mrb[125].mxu0 }
 0x57f   : > { %v6348_v35 = vadd.f32 %v4995_v56, %v8788_v19  ;;  %v4997_v44 = vpop.f32.mrb[126].mxu0 }
 0x580   : > { %v5126_v29 = vmax.f32 %v6347_v31, 0.0  ;;  %v6349_v38 = vadd.f32 %v4997_v44, %v8786_v3  ;;  %v4999_v60 = vpop.f32.mrb[127].mxu0 }
 0x581   : > { %v5127_v23 = vmax.f32 %v6348_v35, 0.0  ;;  %v6350_v45 = vadd.f32 %v4999_v60, %v8788_v19 }
 0x582   : > { %5190 = vst [vmem:[%s8795_s22 + $0x1e0] sm:$0xff] %v5126_v29  ;;  %v5128_v18 = vmax.f32 %v6349_v38, 0.0 }
 0x583   : > { %5191 = vst [vmem:[%s8795_s22 + $0x1e8] sm:$0xff] %v5127_v23  ;;  %v5129_v47 = vmax.f32 %v6350_v45, 0.0 }
 0x584   : > { %5192 = vst [vmem:[%s8795_s22 + $0x1f0] sm:$0xff] %v5128_v18 }
 0x585   : > { %5193 = vst [vmem:[%s8795_s22 + $0x1f8] sm:$0xff] %v5129_v47 }
 0x586   : > { %6839 = shalt.err (!%p6836_p7)
}
 0x587   : > { %s6840_s19 = scalar_lea.hbm %s8923_s15, 8192  ;;  %s6844_s22 = scalar_lea.hbm %s8980_s8, 16384 }
 0x588   : > { %p6841_p9 = scmp.ne.s32.totalorder %s8923_s15, %s6840_s19  ;;  %p6845_p5 = scmp.lt.u32.totalorder %s8923_s15, %s8980_s8 }
 0x589   : > { %p6846_p11 = scmp.lt.u32.totalorder %s6844_s22, %s6840_s19  ;;  %p6848_p4 = scmp.lt.u32.totalorder %s6840_s19, %s8923_s15 }
 0x58a   : > { %p6842_p2 = pnand %p6841_p9, %p7045_p12 }
 0x58b   : > { %p6847_p1 = por %p6846_p11, %p6845_p5 }
 0x58c   : > { %p6843_p0 = pneg %p6842_p2 }
 0x58d   : > { %p6849_p6 = por %p6848_p4, %p6847_p1 }
 0x58f   : > { %p6850_p8 = pnand %p6849_p6, %p6843_p0 }
 0x591   : > { %6853 = shalt.err (!%p6850_p8)
}
 0x592   : > { %s6907_s25 = smov 256   ;;  %s6908_s11 = smov 16  }
 0x593   : > { %6645 = dma.vmem_to_hbm [thread:$0]  (%p7045_p12), %s8925_s26, 8192, %s8923_s15, %s5195_s9, %s6907_s25, %s6907_s25, %s6908_s11  }
 0x594 PF: > { %s5223_s13 = sand.u32 1, %s6884_s27   ;;  %p9335_p10 = scmp.ne.s32.totalorder %s9077_s12, 0 }
 0x595   : > { %p9336_p13 = scmp.ge.s32.totalorder %s6896_s30, 2  ;;  %s5224_s21 = scalar_lea.sflag [#allocation5], %s5223_s13 }
 0x597   : > { %p6656_p3 = pnand %p9336_p13, %p9335_p10 }
 0x599   : > { %6879 = dma.done.wait (!%p6656_p3), %s5224_s21, 8192  }
 0x59a   : > { %6881 = vsyncadd (!%p6656_p3), %s5224_s21, 4294959104  ;;  %s9337_s30 = sld [smem:[#allocation12_spill]]  ;;  %s9338_s27 = smov %s6888_s28 }
 0x59b   : > { %s9339_s28 = smov %s6892_s29  ;;  %s9340_s29 = smov %s7041_s23 }
 0x5a0   : > { %p22_p7 = scmp.ge.s32.totalorder %s9337_s30, 4  }
 0x5a2   :  { %24 = sbr.rel (!%p22_p7) target bundleno = 6 (0x6), region = 109 }
 0x5a9   :  { %5229 = vsyncpa [#allocation4], 1 }
 0x5aa   :  { %5231 = vsyncpa [#allocation4 + $0x1], 1 }
 0x5ab   :  { %5232 = vsyncpa [#allocation7], 1 }
 0x5ac   :  { %5233 = vsyncpa [#allocation5], 1 }
 0x5ad   :  { %5235 = vsyncpa [#allocation5 + $0x1], 1 }

</bundles_post_ra>
